<compile_context>
chip_gen: v6e
topology: v6e:2x2x1
jax: 0.10.0
libtpu: 0.0.40
codegen_flags: <defaults>
</compile_context>

<pallas_src>
import functools

import jax
import jax.numpy as jnp
from jax import lax
from jax.experimental import pallas as pl
from jax.experimental.pallas import tpu as pltpu

EMB = 50
HID = 100
NUM_LAYERS = 3
FC1 = 256
FC2 = 32
OUT = 2

# Lane-aligned (padded) sizes.
HP = 128      # hidden padded; each gate occupies one 128-lane block -> 4*HP = 512
EP = 128      # embedding dim padded
FC2P = 128    # fc2 output padded
OUTP = 128    # final output padded (sliced to OUT=2 in the wrapper)


def lstm_mlp_kernel(x_ref,                       # (T*Bp, EP)        bf16
                    wih0_ref, whh0_ref, b0_ref,  # (EP,4HP)(HP,4HP) bf16, (1,4HP) f32
                    wih1_ref, whh1_ref, b1_ref,
                    wih2_ref, whh2_ref, b2_ref,
                    fc1w_ref, fc1b_ref,          # (HP,256) bf16, (1,256) f32
                    fc2w_ref, fc2b_ref,          # (256,FC2P) bf16, (1,FC2P) f32
                    fc3w_ref, fc3b_ref,          # (FC2P,OUTP) bf16, (1,OUTP) f32
                    out_ref,                     # (Bp, OUTP) f32
                    xg_ref,                      # scratch (T*Bp, 4*HP) f32
                    hseq_ref,                    # scratch (T*Bp, HP)  bf16
                    *, seq_len, bp):
    f32 = jnp.float32
    bf16 = jnp.bfloat16

    def run_layer(xin, wih_ref, whh_ref, b_ref, is_last):
        # Batched input projection for ALL timesteps at once (one MXU matmul),
        # bias folded in here (once per layer, never inside the time loop).
        xg_ref[...] = (jnp.dot(xin, wih_ref[...], preferred_element_type=f32)
                       + b_ref[...])

        def step(t, carry):
            h, c = carry                                        # (Bp, HP) f32
            rows = pl.ds(pl.multiple_of(t * bp, bp), bp)
            # Recurrent half only; weights loaded from VMEM at point of use.
            gates = xg_ref[rows, :] + jnp.dot(
                h.astype(bf16), whh_ref[...], preferred_element_type=f32)
            i = jax.nn.sigmoid(gates[:, 0 * HP:1 * HP])
            f = jax.nn.sigmoid(gates[:, 1 * HP:2 * HP])
            g = jnp.tanh(gates[:, 2 * HP:3 * HP])
            o = jax.nn.sigmoid(gates[:, 3 * HP:4 * HP])
            c = f * c + i * g
            h = o * jnp.tanh(c)
            if not is_last:
                hseq_ref[rows, :] = h.astype(bf16)
            return h, c

        zeros = jnp.zeros((bp, HP), f32)
        h_last, _ = lax.fori_loop(0, seq_len, step, (zeros, zeros), unroll=True)
        return h_last

    run_layer(x_ref[...], wih0_ref, whh0_ref, b0_ref, False)
    run_layer(hseq_ref[...], wih1_ref, whh1_ref, b1_ref, False)
    h_last = run_layer(hseq_ref[...], wih2_ref, whh2_ref, b2_ref, True)

    # FC stack on the last timestep of the top LSTM layer.
    # dropout(p=0.5) -> identity in eval mode.
    last = h_last.astype(bf16)
    z1 = jnp.tanh(jnp.dot(last, fc1w_ref[...],
                          preferred_element_type=f32) + fc1b_ref[...])
    z2 = jnp.tanh(jnp.dot(z1.astype(bf16), fc2w_ref[...],
                          preferred_element_type=f32) + fc2b_ref[...])
    z3 = jax.nn.sigmoid(jnp.dot(z2.astype(bf16), fc3w_ref[...],
                                preferred_element_type=f32) + fc3b_ref[...])
    out_ref[...] = z3.astype(out_ref.dtype)


# ---------------------------------------------------------------------------
# Parameters (PyTorch layout) and one-time kernel-operand preparation.
# ---------------------------------------------------------------------------
def init_params(key, vocab_size):
    ks = jax.random.split(key, 20)

    def u(k, shape, scale):
        return jax.random.uniform(k, shape, jnp.float32, -scale, scale)

    params = {"embedding": jax.random.normal(ks[0], (vocab_size, EMB), jnp.float32)}
    s_lstm = 1.0 / jnp.sqrt(HID)
    lstm = []
    for l in range(NUM_LAYERS):
        in_sz = EMB if l == 0 else HID
        base = 1 + l * 4
        w_ih = u(ks[base + 0], (4 * HID, in_sz), s_lstm)   # PyTorch layout (4H, in)
        w_hh = u(ks[base + 1], (4 * HID, HID), s_lstm)
        b_ih = u(ks[base + 2], (4 * HID,), s_lstm)
        b_hh = u(ks[base + 3], (4 * HID,), s_lstm)
        lstm.append((w_ih, w_hh, b_ih, b_hh))
    params["lstm"] = lstm
    params["fc1"] = (u(ks[13], (FC1, HID), 1.0 / jnp.sqrt(HID)),
                     u(ks[14], (FC1,), 1.0 / jnp.sqrt(HID)))
    params["fc2"] = (u(ks[15], (FC2, FC1), 1.0 / jnp.sqrt(FC1)),
                     u(ks[16], (FC2,), 1.0 / jnp.sqrt(FC1)))
    params["fc3"] = (u(ks[17], (OUT, FC2), 1.0 / jnp.sqrt(FC2)),
                     u(ks[18], (OUT,), 1.0 / jnp.sqrt(FC2)))
    return params


def _pad2(a, rows, cols):
    out = jnp.zeros((rows, cols), a.dtype)
    return out.at[:a.shape[0], :a.shape[1]].set(a)


def prep_weights(params):
    """One-time prep: transpose to (in, out), fuse b_ih+b_hh, pad each gate to
    its own 128-lane block (zero padding), cast matmul operands to bf16."""
    prepped = {"embedding": _pad2(params["embedding"],
                                  params["embedding"].shape[0],
                                  EP).astype(jnp.bfloat16)}
    args = []
    for l, (w_ih, w_hh, b_ih, b_hh) in enumerate(params["lstm"]):
        in_sz = w_ih.shape[1]
        in_pad = EP if l == 0 else HP
        wi = jnp.transpose(w_ih)              # (in, 4H), cols ordered i,f,g,o
        wh = jnp.transpose(w_hh)              # (H, 4H)
        b = b_ih + b_hh                       # (4H,)
        wi_p = jnp.zeros((in_pad, 4 * HP), jnp.float32)
        wh_p = jnp.zeros((HP, 4 * HP), jnp.float32)
        b_p = jnp.zeros((1, 4 * HP), jnp.float32)
        for g in range(4):
            src = slice(g * HID, (g + 1) * HID)
            dst = slice(g * HP, g * HP + HID)
            wi_p = wi_p.at[:in_sz, dst].set(wi[:, src])
            wh_p = wh_p.at[:HID, dst].set(wh[:, src])
            b_p = b_p.at[:, dst].set(b[src][None, :])
        args += [wi_p.astype(jnp.bfloat16), wh_p.astype(jnp.bfloat16), b_p]

    fc1w, fc1b = params["fc1"]
    fc2w, fc2b = params["fc2"]
    fc3w, fc3b = params["fc3"]
    args += [_pad2(jnp.transpose(fc1w), HP, FC1).astype(jnp.bfloat16),
             fc1b.reshape(1, FC1).astype(jnp.float32),
             _pad2(jnp.transpose(fc2w), FC1, FC2P).astype(jnp.bfloat16),
             _pad2(fc2b.reshape(1, FC2), 1, FC2P),
             _pad2(jnp.transpose(fc3w), FC2P, OUTP).astype(jnp.bfloat16),
             _pad2(fc3b.reshape(1, OUT), 1, OUTP)]
    prepped["kernel_weights"] = args
    return prepped


def model_forward(tokens, prepped):
    B, T = tokens.shape
    BP = ((B + 7) // 8) * 8                                   # batch padded to sublanes

    # Glue: embedding gather (bf16, lane-padded table), time-major, pad batch,
    # flatten to (T*BP, EP) so the kernel needs no in-kernel reshapes.
    x = jnp.take(prepped["embedding"], tokens, axis=0)        # (B, T, EP) bf16
    x = jnp.transpose(x, (1, 0, 2))                           # (T, B, EP)
    xp = jnp.zeros((T, BP, EP), jnp.bfloat16).at[:, :B, :].set(x)
    xp = xp.reshape(T * BP, EP)

    vmem = pl.BlockSpec(memory_space=pltpu.MemorySpace.VMEM)
    weights = prepped["kernel_weights"]
    out = pl.pallas_call(
        functools.partial(lstm_mlp_kernel, seq_len=T, bp=BP),
        out_shape=jax.ShapeDtypeStruct((BP, OUTP), jnp.float32),
        in_specs=[vmem] * (1 + len(weights)),
        out_specs=vmem,
        scratch_shapes=[pltpu.VMEM((T * BP, 4 * HP), jnp.float32),   # xg
                        pltpu.VMEM((T * BP, HP), jnp.bfloat16)],     # hseq
    )(xp, *weights)
    return out[:B, :OUT]


if __name__ == "__main__":
    key = jax.random.PRNGKey(0)
    k_params, k_tokens = jax.random.split(key)

    VOCAB = 21          # len(words) + 1, synthetic
    B, T = 2, 8

    params = init_params(k_params, VOCAB)
    prepped = prep_weights(params)                 # one-time weight prep
    tokens = jax.random.randint(k_tokens, (B, T), 0, VOCAB, dtype=jnp.int32)

    fwd = jax.jit(model_forward)
    out = jax.block_until_ready(fwd(tokens, prepped))
    assert out.shape == (B, OUT), out.shape
    assert bool(jnp.all(jnp.isfinite(out)))
    print("KERNEL_OK")
</pallas_src>

<mosaic_0001>
module attributes {stable_mosaic.version = 11 : i64} {
  func.func @lstm_mlp_kernel(%arg0: memref<64x128xbf16, #tpu.memory_space<vmem>>, %arg1: memref<128x512xbf16, #tpu.memory_space<vmem>>, %arg2: memref<128x512xbf16, #tpu.memory_space<vmem>>, %arg3: memref<1x512xf32, #tpu.memory_space<vmem>>, %arg4: memref<128x512xbf16, #tpu.memory_space<vmem>>, %arg5: memref<128x512xbf16, #tpu.memory_space<vmem>>, %arg6: memref<1x512xf32, #tpu.memory_space<vmem>>, %arg7: memref<128x512xbf16, #tpu.memory_space<vmem>>, %arg8: memref<128x512xbf16, #tpu.memory_space<vmem>>, %arg9: memref<1x512xf32, #tpu.memory_space<vmem>>, %arg10: memref<128x256xbf16, #tpu.memory_space<vmem>>, %arg11: memref<1x256xf32, #tpu.memory_space<vmem>>, %arg12: memref<256x128xbf16, #tpu.memory_space<vmem>>, %arg13: memref<1x128xf32, #tpu.memory_space<vmem>>, %arg14: memref<128x128xbf16, #tpu.memory_space<vmem>>, %arg15: memref<1x128xf32, #tpu.memory_space<vmem>>, %arg16: memref<8x128xf32, #tpu.memory_space<vmem>>, %arg17: memref<64x512xf32, #tpu.memory_space<vmem>>, %arg18: memref<64x128xbf16, #tpu.memory_space<vmem>>) attributes {dimension_semantics = [], scalar_prefetch = 0 : i64, scratch_operands = 2 : i64, tpu.core_type = #tpu.core_type<tc>} {
    %c0 = arith.constant 0 : index
    %c0_0 = arith.constant 0 : index
    %0 = vector.load %arg0[%c0, %c0_0] : memref<64x128xbf16, #tpu.memory_space<vmem>>, vector<64x128xbf16>
    %c0_1 = arith.constant 0 : index
    %c0_2 = arith.constant 0 : index
    %1 = vector.load %arg1[%c0_1, %c0_2] : memref<128x512xbf16, #tpu.memory_space<vmem>>, vector<128x512xbf16>
    %cst = arith.constant dense<0.000000e+00> : vector<64x512xf32>
    %2 = tpu.matmul %0, %1, %cst {dimension_numbers = #tpu.dot_dimension_numbers<[1], [0], [0], [1], [0, 0, 1, 1], [], []>} : vector<64x128xbf16>, vector<128x512xbf16>, vector<64x512xf32> -> vector<64x512xf32>
    %c0_3 = arith.constant 0 : index
    %c0_4 = arith.constant 0 : index
    %3 = vector.load %arg3[%c0_3, %c0_4] : memref<1x512xf32, #tpu.memory_space<vmem>>, vector<1x512xf32>
    %4 = vector.broadcast %3 : vector<1x512xf32> to vector<64x512xf32>
    %5 = arith.addf %2, %4 : vector<64x512xf32>
    %c0_5 = arith.constant 0 : index
    %c0_6 = arith.constant 0 : index
    %6 = vector.load %arg17[%c0_5, %c0_6] : memref<64x512xf32, #tpu.memory_space<vmem>>, vector<64x512xf32>
    tpu.vector_store %arg17[%c0_5, %c0_6], %5 {strides = array<i32>} : memref<64x512xf32, #tpu.memory_space<vmem>>, vector<64x512xf32>,
    %cst_7 = arith.constant 0.000000e+00 : f32
    %7 = vector.broadcast %cst_7 : f32 to vector<8x128xf32>
    %c0_i32 = arith.constant 0 : i32
    %c8_i32 = arith.constant 8 : i32
    %8 = arith.muli %c0_i32, %c8_i32 : i32
    %9 = tpu.assume_multiple %8, 8 : i32
    %10 = arith.index_cast %9 : i32 to index
    %c0_8 = arith.constant 0 : index
    %11 = vector.load %arg17[%10, %c0_8] : memref<64x512xf32, #tpu.memory_space<vmem>>, vector<8x512xf32>
    %12 = arith.truncf %7 : vector<8x128xf32> to vector<8x128xbf16>
    %c0_9 = arith.constant 0 : index
    %c0_10 = arith.constant 0 : index
    %13 = vector.load %arg2[%c0_9, %c0_10] : memref<128x512xbf16, #tpu.memory_space<vmem>>, vector<128x512xbf16>
    %cst_11 = arith.constant dense<0.000000e+00> : vector<8x512xf32>
    %14 = tpu.matmul %12, %13, %cst_11 {dimension_numbers = #tpu.dot_dimension_numbers<[1], [0], [0], [1], [0, 0, 1, 1], [], []>} : vector<8x128xbf16>, vector<128x512xbf16>, vector<8x512xf32> -> vector<8x512xf32>
    %15 = arith.addf %11, %14 : vector<8x512xf32>
    %16 = vector.extract_strided_slice %15 {offsets = [0, 0], sizes = [8, 128], strides = [1, 1]} : vector<8x512xf32> to vector<8x128xf32>
    %17 = arith.negf %16 : vector<8x128xf32>
    %18 = math.exp %17 : vector<8x128xf32>
    %cst_12 = arith.constant 1.000000e+00 : f32
    %19 = vector.broadcast %cst_12 : f32 to vector<8x128xf32>
    %20 = arith.addf %19, %18 : vector<8x128xf32>
    %21 = arith.divf %19, %20 : vector<8x128xf32>
    %22 = vector.extract_strided_slice %15 {offsets = [0, 128], sizes = [8, 128], strides = [1, 1]} : vector<8x512xf32> to vector<8x128xf32>
    %23 = arith.negf %22 : vector<8x128xf32>
    %24 = math.exp %23 : vector<8x128xf32>
    %cst_13 = arith.constant 1.000000e+00 : f32
    %25 = vector.broadcast %cst_13 : f32 to vector<8x128xf32>
    %26 = arith.addf %25, %24 : vector<8x128xf32>
    %27 = arith.divf %25, %26 : vector<8x128xf32>
    %28 = vector.extract_strided_slice %15 {offsets = [0, 256], sizes = [8, 128], strides = [1, 1]} : vector<8x512xf32> to vector<8x128xf32>
    %29 = math.tanh %28 : vector<8x128xf32>
    %30 = vector.extract_strided_slice %15 {offsets = [0, 384], sizes = [8, 128], strides = [1, 1]} : vector<8x512xf32> to vector<8x128xf32>
    %31 = arith.negf %30 : vector<8x128xf32>
    %32 = math.exp %31 : vector<8x128xf32>
    %cst_14 = arith.constant 1.000000e+00 : f32
    %33 = vector.broadcast %cst_14 : f32 to vector<8x128xf32>
    %34 = arith.addf %33, %32 : vector<8x128xf32>
    %35 = arith.divf %33, %34 : vector<8x128xf32>
    %36 = arith.mulf %27, %7 : vector<8x128xf32>
    %37 = arith.mulf %21, %29 : vector<8x128xf32>
    %38 = arith.addf %36, %37 : vector<8x128xf32>
    %39 = math.tanh %38 : vector<8x128xf32>
    %40 = arith.mulf %35, %39 : vector<8x128xf32>
    %41 = arith.truncf %40 : vector<8x128xf32> to vector<8x128xbf16>
    %42 = arith.index_cast %9 : i32 to index
    %c0_15 = arith.constant 0 : index
    %43 = vector.load %arg18[%42, %c0_15] : memref<64x128xbf16, #tpu.memory_space<vmem>>, vector<8x128xbf16>
    tpu.vector_store %arg18[%42, %c0_15], %41 {strides = array<i32>} : memref<64x128xbf16, #tpu.memory_space<vmem>>, vector<8x128xbf16>,
    %c1_i32 = arith.constant 1 : i32
    %c8_i32_16 = arith.constant 8 : i32
    %44 = arith.muli %c1_i32, %c8_i32_16 : i32
    %45 = tpu.assume_multiple %44, 8 : i32
    %46 = arith.index_cast %45 : i32 to index
    %c0_17 = arith.constant 0 : index
    %47 = vector.load %arg17[%46, %c0_17] : memref<64x512xf32, #tpu.memory_space<vmem>>, vector<8x512xf32>
    %48 = arith.truncf %40 : vector<8x128xf32> to vector<8x128xbf16>
    %c0_18 = arith.constant 0 : index
    %c0_19 = arith.constant 0 : index
    %49 = vector.load %arg2[%c0_18, %c0_19] : memref<128x512xbf16, #tpu.memory_space<vmem>>, vector<128x512xbf16>
    %cst_20 = arith.constant dense<0.000000e+00> : vector<8x512xf32>
    %50 = tpu.matmul %48, %49, %cst_20 {dimension_numbers = #tpu.dot_dimension_numbers<[1], [0], [0], [1], [0, 0, 1, 1], [], []>} : vector<8x128xbf16>, vector<128x512xbf16>, vector<8x512xf32> -> vector<8x512xf32>
    %51 = arith.addf %47, %50 : vector<8x512xf32>
    %52 = vector.extract_strided_slice %51 {offsets = [0, 0], sizes = [8, 128], strides = [1, 1]} : vector<8x512xf32> to vector<8x128xf32>
    %53 = arith.negf %52 : vector<8x128xf32>
    %54 = math.exp %53 : vector<8x128xf32>
    %cst_21 = arith.constant 1.000000e+00 : f32
    %55 = vector.broadcast %cst_21 : f32 to vector<8x128xf32>
    %56 = arith.addf %55, %54 : vector<8x128xf32>
    %57 = arith.divf %55, %56 : vector<8x128xf32>
    %58 = vector.extract_strided_slice %51 {offsets = [0, 128], sizes = [8, 128], strides = [1, 1]} : vector<8x512xf32> to vector<8x128xf32>
    %59 = arith.negf %58 : vector<8x128xf32>
    %60 = math.exp %59 : vector<8x128xf32>
    %cst_22 = arith.constant 1.000000e+00 : f32
    %61 = vector.broadcast %cst_22 : f32 to vector<8x128xf32>
    %62 = arith.addf %61, %60 : vector<8x128xf32>
    %63 = arith.divf %61, %62 : vector<8x128xf32>
    %64 = vector.extract_strided_slice %51 {offsets = [0, 256], sizes = [8, 128], strides = [1, 1]} : vector<8x512xf32> to vector<8x128xf32>
    %65 = math.tanh %64 : vector<8x128xf32>
    %66 = vector.extract_strided_slice %51 {offsets = [0, 384], sizes = [8, 128], strides = [1, 1]} : vector<8x512xf32> to vector<8x128xf32>
    %67 = arith.negf %66 : vector<8x128xf32>
    %68 = math.exp %67 : vector<8x128xf32>
    %cst_23 = arith.constant 1.000000e+00 : f32
    %69 = vector.broadcast %cst_23 : f32 to vector<8x128xf32>
    %70 = arith.addf %69, %68 : vector<8x128xf32>
    %71 = arith.divf %69, %70 : vector<8x128xf32>
    %72 = arith.mulf %63, %38 : vector<8x128xf32>
    %73 = arith.mulf %57, %65 : vector<8x128xf32>
    %74 = arith.addf %72, %73 : vector<8x128xf32>
    %75 = math.tanh %74 : vector<8x128xf32>
    %76 = arith.mulf %71, %75 : vector<8x128xf32>
    %77 = arith.truncf %76 : vector<8x128xf32> to vector<8x128xbf16>
    %78 = arith.index_cast %45 : i32 to index
    %c0_24 = arith.constant 0 : index
    %79 = vector.load %arg18[%78, %c0_24] : memref<64x128xbf16, #tpu.memory_space<vmem>>, vector<8x128xbf16>
    tpu.vector_store %arg18[%78, %c0_24], %77 {strides = array<i32>} : memref<64x128xbf16, #tpu.memory_space<vmem>>, vector<8x128xbf16>,
    %c2_i32 = arith.constant 2 : i32
    %c8_i32_25 = arith.constant 8 : i32
    %80 = arith.muli %c2_i32, %c8_i32_25 : i32
    %81 = tpu.assume_multiple %80, 8 : i32
    %82 = arith.index_cast %81 : i32 to index
    %c0_26 = arith.constant 0 : index
    %83 = vector.load %arg17[%82, %c0_26] : memref<64x512xf32, #tpu.memory_space<vmem>>, vector<8x512xf32>
    %84 = arith.truncf %76 : vector<8x128xf32> to vector<8x128xbf16>
    %c0_27 = arith.constant 0 : index
    %c0_28 = arith.constant 0 : index
    %85 = vector.load %arg2[%c0_27, %c0_28] : memref<128x512xbf16, #tpu.memory_space<vmem>>, vector<128x512xbf16>
    %cst_29 = arith.constant dense<0.000000e+00> : vector<8x512xf32>
    %86 = tpu.matmul %84, %85, %cst_29 {dimension_numbers = #tpu.dot_dimension_numbers<[1], [0], [0], [1], [0, 0, 1, 1], [], []>} : vector<8x128xbf16>, vector<128x512xbf16>, vector<8x512xf32> -> vector<8x512xf32>
    %87 = arith.addf %83, %86 : vector<8x512xf32>
    %88 = vector.extract_strided_slice %87 {offsets = [0, 0], sizes = [8, 128], strides = [1, 1]} : vector<8x512xf32> to vector<8x128xf32>
    %89 = arith.negf %88 : vector<8x128xf32>
    %90 = math.exp %89 : vector<8x128xf32>
    %cst_30 = arith.constant 1.000000e+00 : f32
    %91 = vector.broadcast %cst_30 : f32 to vector<8x128xf32>
    %92 = arith.addf %91, %90 : vector<8x128xf32>
    %93 = arith.divf %91, %92 : vector<8x128xf32>
    %94 = vector.extract_strided_slice %87 {offsets = [0, 128], sizes = [8, 128], strides = [1, 1]} : vector<8x512xf32> to vector<8x128xf32>
    %95 = arith.negf %94 : vector<8x128xf32>
    %96 = math.exp %95 : vector<8x128xf32>
    %cst_31 = arith.constant 1.000000e+00 : f32
    %97 = vector.broadcast %cst_31 : f32 to vector<8x128xf32>
    %98 = arith.addf %97, %96 : vector<8x128xf32>
    %99 = arith.divf %97, %98 : vector<8x128xf32>
    %100 = vector.extract_strided_slice %87 {offsets = [0, 256], sizes = [8, 128], strides = [1, 1]} : vector<8x512xf32> to vector<8x128xf32>
    %101 = math.tanh %100 : vector<8x128xf32>
    %102 = vector.extract_strided_slice %87 {offsets = [0, 384], sizes = [8, 128], strides = [1, 1]} : vector<8x512xf32> to vector<8x128xf32>
    %103 = arith.negf %102 : vector<8x128xf32>
    %104 = math.exp %103 : vector<8x128xf32>
    %cst_32 = arith.constant 1.000000e+00 : f32
    %105 = vector.broadcast %cst_32 : f32 to vector<8x128xf32>
    %106 = arith.addf %105, %104 : vector<8x128xf32>
    %107 = arith.divf %105, %106 : vector<8x128xf32>
    %108 = arith.mulf %99, %74 : vector<8x128xf32>
    %109 = arith.mulf %93, %101 : vector<8x128xf32>
    %110 = arith.addf %108, %109 : vector<8x128xf32>
    %111 = math.tanh %110 : vector<8x128xf32>
    %112 = arith.mulf %107, %111 : vector<8x128xf32>
    %113 = arith.truncf %112 : vector<8x128xf32> to vector<8x128xbf16>
    %114 = arith.index_cast %81 : i32 to index
    %c0_33 = arith.constant 0 : index
    %115 = vector.load %arg18[%114, %c0_33] : memref<64x128xbf16, #tpu.memory_space<vmem>>, vector<8x128xbf16>
    tpu.vector_store %arg18[%114, %c0_33], %113 {strides = array<i32>} : memref<64x128xbf16, #tpu.memory_space<vmem>>, vector<8x128xbf16>,
    %c3_i32 = arith.constant 3 : i32
    %c8_i32_34 = arith.constant 8 : i32
    %116 = arith.muli %c3_i32, %c8_i32_34 : i32
    %117 = tpu.assume_multiple %116, 8 : i32
    %118 = arith.index_cast %117 : i32 to index
    %c0_35 = arith.constant 0 : index
    %119 = vector.load %arg17[%118, %c0_35] : memref<64x512xf32, #tpu.memory_space<vmem>>, vector<8x512xf32>
    %120 = arith.truncf %112 : vector<8x128xf32> to vector<8x128xbf16>
    %c0_36 = arith.constant 0 : index
    %c0_37 = arith.constant 0 : index
    %121 = vector.load %arg2[%c0_36, %c0_37] : memref<128x512xbf16, #tpu.memory_space<vmem>>, vector<128x512xbf16>
    %cst_38 = arith.constant dense<0.000000e+00> : vector<8x512xf32>
    %122 = tpu.matmul %120, %121, %cst_38 {dimension_numbers = #tpu.dot_dimension_numbers<[1], [0], [0], [1], [0, 0, 1, 1], [], []>} : vector<8x128xbf16>, vector<128x512xbf16>, vector<8x512xf32> -> vector<8x512xf32>
    %123 = arith.addf %119, %122 : vector<8x512xf32>
    %124 = vector.extract_strided_slice %123 {offsets = [0, 0], sizes = [8, 128], strides = [1, 1]} : vector<8x512xf32> to vector<8x128xf32>
    %125 = arith.negf %124 : vector<8x128xf32>
    %126 = math.exp %125 : vector<8x128xf32>
    %cst_39 = arith.constant 1.000000e+00 : f32
    %127 = vector.broadcast %cst_39 : f32 to vector<8x128xf32>
    %128 = arith.addf %127, %126 : vector<8x128xf32>
    %129 = arith.divf %127, %128 : vector<8x128xf32>
    %130 = vector.extract_strided_slice %123 {offsets = [0, 128], sizes = [8, 128], strides = [1, 1]} : vector<8x512xf32> to vector<8x128xf32>
    %131 = arith.negf %130 : vector<8x128xf32>
    %132 = math.exp %131 : vector<8x128xf32>
    %cst_40 = arith.constant 1.000000e+00 : f32
    %133 = vector.broadcast %cst_40 : f32 to vector<8x128xf32>
    %134 = arith.addf %133, %132 : vector<8x128xf32>
    %135 = arith.divf %133, %134 : vector<8x128xf32>
    %136 = vector.extract_strided_slice %123 {offsets = [0, 256], sizes = [8, 128], strides = [1, 1]} : vector<8x512xf32> to vector<8x128xf32>
    %137 = math.tanh %136 : vector<8x128xf32>
    %138 = vector.extract_strided_slice %123 {offsets = [0, 384], sizes = [8, 128], strides = [1, 1]} : vector<8x512xf32> to vector<8x128xf32>
    %139 = arith.negf %138 : vector<8x128xf32>
    %140 = math.exp %139 : vector<8x128xf32>
    %cst_41 = arith.constant 1.000000e+00 : f32
    %141 = vector.broadcast %cst_41 : f32 to vector<8x128xf32>
    %142 = arith.addf %141, %140 : vector<8x128xf32>
    %143 = arith.divf %141, %142 : vector<8x128xf32>
    %144 = arith.mulf %135, %110 : vector<8x128xf32>
    %145 = arith.mulf %129, %137 : vector<8x128xf32>
    %146 = arith.addf %144, %145 : vector<8x128xf32>
    %147 = math.tanh %146 : vector<8x128xf32>
    %148 = arith.mulf %143, %147 : vector<8x128xf32>
    %149 = arith.truncf %148 : vector<8x128xf32> to vector<8x128xbf16>
    %150 = arith.index_cast %117 : i32 to index
    %c0_42 = arith.constant 0 : index
    %151 = vector.load %arg18[%150, %c0_42] : memref<64x128xbf16, #tpu.memory_space<vmem>>, vector<8x128xbf16>
    tpu.vector_store %arg18[%150, %c0_42], %149 {strides = array<i32>} : memref<64x128xbf16, #tpu.memory_space<vmem>>, vector<8x128xbf16>,
    %c4_i32 = arith.constant 4 : i32
    %c8_i32_43 = arith.constant 8 : i32
    %152 = arith.muli %c4_i32, %c8_i32_43 : i32
    %153 = tpu.assume_multiple %152, 8 : i32
    %154 = arith.index_cast %153 : i32 to index
    %c0_44 = arith.constant 0 : index
    %155 = vector.load %arg17[%154, %c0_44] : memref<64x512xf32, #tpu.memory_space<vmem>>, vector<8x512xf32>
    %156 = arith.truncf %148 : vector<8x128xf32> to vector<8x128xbf16>
    %c0_45 = arith.constant 0 : index
    %c0_46 = arith.constant 0 : index
    %157 = vector.load %arg2[%c0_45, %c0_46] : memref<128x512xbf16, #tpu.memory_space<vmem>>, vector<128x512xbf16>
    %cst_47 = arith.constant dense<0.000000e+00> : vector<8x512xf32>
    %158 = tpu.matmul %156, %157, %cst_47 {dimension_numbers = #tpu.dot_dimension_numbers<[1], [0], [0], [1], [0, 0, 1, 1], [], []>} : vector<8x128xbf16>, vector<128x512xbf16>, vector<8x512xf32> -> vector<8x512xf32>
    %159 = arith.addf %155, %158 : vector<8x512xf32>
    %160 = vector.extract_strided_slice %159 {offsets = [0, 0], sizes = [8, 128], strides = [1, 1]} : vector<8x512xf32> to vector<8x128xf32>
    %161 = arith.negf %160 : vector<8x128xf32>
    %162 = math.exp %161 : vector<8x128xf32>
    %cst_48 = arith.constant 1.000000e+00 : f32
    %163 = vector.broadcast %cst_48 : f32 to vector<8x128xf32>
    %164 = arith.addf %163, %162 : vector<8x128xf32>
    %165 = arith.divf %163, %164 : vector<8x128xf32>
    %166 = vector.extract_strided_slice %159 {offsets = [0, 128], sizes = [8, 128], strides = [1, 1]} : vector<8x512xf32> to vector<8x128xf32>
    %167 = arith.negf %166 : vector<8x128xf32>
    %168 = math.exp %167 : vector<8x128xf32>
    %cst_49 = arith.constant 1.000000e+00 : f32
    %169 = vector.broadcast %cst_49 : f32 to vector<8x128xf32>
    %170 = arith.addf %169, %168 : vector<8x128xf32>
    %171 = arith.divf %169, %170 : vector<8x128xf32>
    %172 = vector.extract_strided_slice %159 {offsets = [0, 256], sizes = [8, 128], strides = [1, 1]} : vector<8x512xf32> to vector<8x128xf32>
    %173 = math.tanh %172 : vector<8x128xf32>
    %174 = vector.extract_strided_slice %159 {offsets = [0, 384], sizes = [8, 128], strides = [1, 1]} : vector<8x512xf32> to vector<8x128xf32>
    %175 = arith.negf %174 : vector<8x128xf32>
    %176 = math.exp %175 : vector<8x128xf32>
    %cst_50 = arith.constant 1.000000e+00 : f32
    %177 = vector.broadcast %cst_50 : f32 to vector<8x128xf32>
    %178 = arith.addf %177, %176 : vector<8x128xf32>
    %179 = arith.divf %177, %178 : vector<8x128xf32>
    %180 = arith.mulf %171, %146 : vector<8x128xf32>
    %181 = arith.mulf %165, %173 : vector<8x128xf32>
    %182 = arith.addf %180, %181 : vector<8x128xf32>
    %183 = math.tanh %182 : vector<8x128xf32>
    %184 = arith.mulf %179, %183 : vector<8x128xf32>
    %185 = arith.truncf %184 : vector<8x128xf32> to vector<8x128xbf16>
    %186 = arith.index_cast %153 : i32 to index
    %c0_51 = arith.constant 0 : index
    %187 = vector.load %arg18[%186, %c0_51] : memref<64x128xbf16, #tpu.memory_space<vmem>>, vector<8x128xbf16>
    tpu.vector_store %arg18[%186, %c0_51], %185 {strides = array<i32>} : memref<64x128xbf16, #tpu.memory_space<vmem>>, vector<8x128xbf16>,
    %c5_i32 = arith.constant 5 : i32
    %c8_i32_52 = arith.constant 8 : i32
    %188 = arith.muli %c5_i32, %c8_i32_52 : i32
    %189 = tpu.assume_multiple %188, 8 : i32
    %190 = arith.index_cast %189 : i32 to index
    %c0_53 = arith.constant 0 : index
    %191 = vector.load %arg17[%190, %c0_53] : memref<64x512xf32, #tpu.memory_space<vmem>>, vector<8x512xf32>
    %192 = arith.truncf %184 : vector<8x128xf32> to vector<8x128xbf16>
    %c0_54 = arith.constant 0 : index
    %c0_55 = arith.constant 0 : index
    %193 = vector.load %arg2[%c0_54, %c0_55] : memref<128x512xbf16, #tpu.memory_space<vmem>>, vector<128x512xbf16>
    %cst_56 = arith.constant dense<0.000000e+00> : vector<8x512xf32>
    %194 = tpu.matmul %192, %193, %cst_56 {dimension_numbers = #tpu.dot_dimension_numbers<[1], [0], [0], [1], [0, 0, 1, 1], [], []>} : vector<8x128xbf16>, vector<128x512xbf16>, vector<8x512xf32> -> vector<8x512xf32>
    %195 = arith.addf %191, %194 : vector<8x512xf32>
    %196 = vector.extract_strided_slice %195 {offsets = [0, 0], sizes = [8, 128], strides = [1, 1]} : vector<8x512xf32> to vector<8x128xf32>
    %197 = arith.negf %196 : vector<8x128xf32>
    %198 = math.exp %197 : vector<8x128xf32>
    %cst_57 = arith.constant 1.000000e+00 : f32
    %199 = vector.broadcast %cst_57 : f32 to vector<8x128xf32>
    %200 = arith.addf %199, %198 : vector<8x128xf32>
    %201 = arith.divf %199, %200 : vector<8x128xf32>
    %202 = vector.extract_strided_slice %195 {offsets = [0, 128], sizes = [8, 128], strides = [1, 1]} : vector<8x512xf32> to vector<8x128xf32>
    %203 = arith.negf %202 : vector<8x128xf32>
    %204 = math.exp %203 : vector<8x128xf32>
    %cst_58 = arith.constant 1.000000e+00 : f32
    %205 = vector.broadcast %cst_58 : f32 to vector<8x128xf32>
    %206 = arith.addf %205, %204 : vector<8x128xf32>
    %207 = arith.divf %205, %206 : vector<8x128xf32>
    %208 = vector.extract_strided_slice %195 {offsets = [0, 256], sizes = [8, 128], strides = [1, 1]} : vector<8x512xf32> to vector<8x128xf32>
    %209 = math.tanh %208 : vector<8x128xf32>
    %210 = vector.extract_strided_slice %195 {offsets = [0, 384], sizes = [8, 128], strides = [1, 1]} : vector<8x512xf32> to vector<8x128xf32>
    %211 = arith.negf %210 : vector<8x128xf32>
    %212 = math.exp %211 : vector<8x128xf32>
    %cst_59 = arith.constant 1.000000e+00 : f32
    %213 = vector.broadcast %cst_59 : f32 to vector<8x128xf32>
    %214 = arith.addf %213, %212 : vector<8x128xf32>
    %215 = arith.divf %213, %214 : vector<8x128xf32>
    %216 = arith.mulf %207, %182 : vector<8x128xf32>
    %217 = arith.mulf %201, %209 : vector<8x128xf32>
    %218 = arith.addf %216, %217 : vector<8x128xf32>
    %219 = math.tanh %218 : vector<8x128xf32>
    %220 = arith.mulf %215, %219 : vector<8x128xf32>
    %221 = arith.truncf %220 : vector<8x128xf32> to vector<8x128xbf16>
    %222 = arith.index_cast %189 : i32 to index
    %c0_60 = arith.constant 0 : index
    %223 = vector.load %arg18[%222, %c0_60] : memref<64x128xbf16, #tpu.memory_space<vmem>>, vector<8x128xbf16>
    tpu.vector_store %arg18[%222, %c0_60], %221 {strides = array<i32>} : memref<64x128xbf16, #tpu.memory_space<vmem>>, vector<8x128xbf16>,
    %c6_i32 = arith.constant 6 : i32
    %c8_i32_61 = arith.constant 8 : i32
    %224 = arith.muli %c6_i32, %c8_i32_61 : i32
    %225 = tpu.assume_multiple %224, 8 : i32
    %226 = arith.index_cast %225 : i32 to index
    %c0_62 = arith.constant 0 : index
    %227 = vector.load %arg17[%226, %c0_62] : memref<64x512xf32, #tpu.memory_space<vmem>>, vector<8x512xf32>
    %228 = arith.truncf %220 : vector<8x128xf32> to vector<8x128xbf16>
    %c0_63 = arith.constant 0 : index
    %c0_64 = arith.constant 0 : index
    %229 = vector.load %arg2[%c0_63, %c0_64] : memref<128x512xbf16, #tpu.memory_space<vmem>>, vector<128x512xbf16>
    %cst_65 = arith.constant dense<0.000000e+00> : vector<8x512xf32>
    %230 = tpu.matmul %228, %229, %cst_65 {dimension_numbers = #tpu.dot_dimension_numbers<[1], [0], [0], [1], [0, 0, 1, 1], [], []>} : vector<8x128xbf16>, vector<128x512xbf16>, vector<8x512xf32> -> vector<8x512xf32>
    %231 = arith.addf %227, %230 : vector<8x512xf32>
    %232 = vector.extract_strided_slice %231 {offsets = [0, 0], sizes = [8, 128], strides = [1, 1]} : vector<8x512xf32> to vector<8x128xf32>
    %233 = arith.negf %232 : vector<8x128xf32>
    %234 = math.exp %233 : vector<8x128xf32>
    %cst_66 = arith.constant 1.000000e+00 : f32
    %235 = vector.broadcast %cst_66 : f32 to vector<8x128xf32>
    %236 = arith.addf %235, %234 : vector<8x128xf32>
    %237 = arith.divf %235, %236 : vector<8x128xf32>
    %238 = vector.extract_strided_slice %231 {offsets = [0, 128], sizes = [8, 128], strides = [1, 1]} : vector<8x512xf32> to vector<8x128xf32>
    %239 = arith.negf %238 : vector<8x128xf32>
    %240 = math.exp %239 : vector<8x128xf32>
    %cst_67 = arith.constant 1.000000e+00 : f32
    %241 = vector.broadcast %cst_67 : f32 to vector<8x128xf32>
    %242 = arith.addf %241, %240 : vector<8x128xf32>
    %243 = arith.divf %241, %242 : vector<8x128xf32>
    %244 = vector.extract_strided_slice %231 {offsets = [0, 256], sizes = [8, 128], strides = [1, 1]} : vector<8x512xf32> to vector<8x128xf32>
    %245 = math.tanh %244 : vector<8x128xf32>
    %246 = vector.extract_strided_slice %231 {offsets = [0, 384], sizes = [8, 128], strides = [1, 1]} : vector<8x512xf32> to vector<8x128xf32>
    %247 = arith.negf %246 : vector<8x128xf32>
    %248 = math.exp %247 : vector<8x128xf32>
    %cst_68 = arith.constant 1.000000e+00 : f32
    %249 = vector.broadcast %cst_68 : f32 to vector<8x128xf32>
    %250 = arith.addf %249, %248 : vector<8x128xf32>
    %251 = arith.divf %249, %250 : vector<8x128xf32>
    %252 = arith.mulf %243, %218 : vector<8x128xf32>
    %253 = arith.mulf %237, %245 : vector<8x128xf32>
    %254 = arith.addf %252, %253 : vector<8x128xf32>
    %255 = math.tanh %254 : vector<8x128xf32>
    %256 = arith.mulf %251, %255 : vector<8x128xf32>
    %257 = arith.truncf %256 : vector<8x128xf32> to vector<8x128xbf16>
    %258 = arith.index_cast %225 : i32 to index
    %c0_69 = arith.constant 0 : index
    %259 = vector.load %arg18[%258, %c0_69] : memref<64x128xbf16, #tpu.memory_space<vmem>>, vector<8x128xbf16>
    tpu.vector_store %arg18[%258, %c0_69], %257 {strides = array<i32>} : memref<64x128xbf16, #tpu.memory_space<vmem>>, vector<8x128xbf16>,
    %c7_i32 = arith.constant 7 : i32
    %c8_i32_70 = arith.constant 8 : i32
    %260 = arith.muli %c7_i32, %c8_i32_70 : i32
    %261 = tpu.assume_multiple %260, 8 : i32
    %262 = arith.index_cast %261 : i32 to index
    %c0_71 = arith.constant 0 : index
    %263 = vector.load %arg17[%262, %c0_71] : memref<64x512xf32, #tpu.memory_space<vmem>>, vector<8x512xf32>
    %264 = arith.truncf %256 : vector<8x128xf32> to vector<8x128xbf16>
    %c0_72 = arith.constant 0 : index
    %c0_73 = arith.constant 0 : index
    %265 = vector.load %arg2[%c0_72, %c0_73] : memref<128x512xbf16, #tpu.memory_space<vmem>>, vector<128x512xbf16>
    %cst_74 = arith.constant dense<0.000000e+00> : vector<8x512xf32>
    %266 = tpu.matmul %264, %265, %cst_74 {dimension_numbers = #tpu.dot_dimension_numbers<[1], [0], [0], [1], [0, 0, 1, 1], [], []>} : vector<8x128xbf16>, vector<128x512xbf16>, vector<8x512xf32> -> vector<8x512xf32>
    %267 = arith.addf %263, %266 : vector<8x512xf32>
    %268 = vector.extract_strided_slice %267 {offsets = [0, 0], sizes = [8, 128], strides = [1, 1]} : vector<8x512xf32> to vector<8x128xf32>
    %269 = arith.negf %268 : vector<8x128xf32>
    %270 = math.exp %269 : vector<8x128xf32>
    %cst_75 = arith.constant 1.000000e+00 : f32
    %271 = vector.broadcast %cst_75 : f32 to vector<8x128xf32>
    %272 = arith.addf %271, %270 : vector<8x128xf32>
    %273 = arith.divf %271, %272 : vector<8x128xf32>
    %274 = vector.extract_strided_slice %267 {offsets = [0, 128], sizes = [8, 128], strides = [1, 1]} : vector<8x512xf32> to vector<8x128xf32>
    %275 = arith.negf %274 : vector<8x128xf32>
    %276 = math.exp %275 : vector<8x128xf32>
    %cst_76 = arith.constant 1.000000e+00 : f32
    %277 = vector.broadcast %cst_76 : f32 to vector<8x128xf32>
    %278 = arith.addf %277, %276 : vector<8x128xf32>
    %279 = arith.divf %277, %278 : vector<8x128xf32>
    %280 = vector.extract_strided_slice %267 {offsets = [0, 256], sizes = [8, 128], strides = [1, 1]} : vector<8x512xf32> to vector<8x128xf32>
    %281 = math.tanh %280 : vector<8x128xf32>
    %282 = vector.extract_strided_slice %267 {offsets = [0, 384], sizes = [8, 128], strides = [1, 1]} : vector<8x512xf32> to vector<8x128xf32>
    %283 = arith.negf %282 : vector<8x128xf32>
    %284 = math.exp %283 : vector<8x128xf32>
    %cst_77 = arith.constant 1.000000e+00 : f32
    %285 = vector.broadcast %cst_77 : f32 to vector<8x128xf32>
    %286 = arith.addf %285, %284 : vector<8x128xf32>
    %287 = arith.divf %285, %286 : vector<8x128xf32>
    %288 = arith.mulf %279, %254 : vector<8x128xf32>
    %289 = arith.mulf %273, %281 : vector<8x128xf32>
    %290 = arith.addf %288, %289 : vector<8x128xf32>
    %291 = math.tanh %290 : vector<8x128xf32>
    %292 = arith.mulf %287, %291 : vector<8x128xf32>
    %293 = arith.truncf %292 : vector<8x128xf32> to vector<8x128xbf16>
    %294 = arith.index_cast %261 : i32 to index
    %c0_78 = arith.constant 0 : index
    %295 = vector.load %arg18[%294, %c0_78] : memref<64x128xbf16, #tpu.memory_space<vmem>>, vector<8x128xbf16>
    tpu.vector_store %arg18[%294, %c0_78], %293 {strides = array<i32>} : memref<64x128xbf16, #tpu.memory_space<vmem>>, vector<8x128xbf16>,
    %c8_i32_79 = arith.constant 8 : i32
    %c0_80 = arith.constant 0 : index
    %c0_81 = arith.constant 0 : index
    %296 = vector.load %arg18[%c0_80, %c0_81] : memref<64x128xbf16, #tpu.memory_space<vmem>>, vector<64x128xbf16>
    %c0_82 = arith.constant 0 : index
    %c0_83 = arith.constant 0 : index
    %297 = vector.load %arg4[%c0_82, %c0_83] : memref<128x512xbf16, #tpu.memory_space<vmem>>, vector<128x512xbf16>
    %cst_84 = arith.constant dense<0.000000e+00> : vector<64x512xf32>
    %298 = tpu.matmul %296, %297, %cst_84 {dimension_numbers = #tpu.dot_dimension_numbers<[1], [0], [0], [1], [0, 0, 1, 1], [], []>} : vector<64x128xbf16>, vector<128x512xbf16>, vector<64x512xf32> -> vector<64x512xf32>
    %c0_85 = arith.constant 0 : index
    %c0_86 = arith.constant 0 : index
    %299 = vector.load %arg6[%c0_85, %c0_86] : memref<1x512xf32, #tpu.memory_space<vmem>>, vector<1x512xf32>
    %300 = vector.broadcast %299 : vector<1x512xf32> to vector<64x512xf32>
    %301 = arith.addf %298, %300 : vector<64x512xf32>
    %c0_87 = arith.constant 0 : index
    %c0_88 = arith.constant 0 : index
    %302 = vector.load %arg17[%c0_87, %c0_88] : memref<64x512xf32, #tpu.memory_space<vmem>>, vector<64x512xf32>
    tpu.vector_store %arg17[%c0_87, %c0_88], %301 {strides = array<i32>} : memref<64x512xf32, #tpu.memory_space<vmem>>, vector<64x512xf32>,
    %cst_89 = arith.constant 0.000000e+00 : f32
    %303 = vector.broadcast %cst_89 : f32 to vector<8x128xf32>
    %c0_i32_90 = arith.constant 0 : i32
    %c8_i32_91 = arith.constant 8 : i32
    %304 = arith.muli %c0_i32_90, %c8_i32_91 : i32
    %305 = tpu.assume_multiple %304, 8 : i32
    %306 = arith.index_cast %305 : i32 to index
    %c0_92 = arith.constant 0 : index
    %307 = vector.load %arg17[%306, %c0_92] : memref<64x512xf32, #tpu.memory_space<vmem>>, vector<8x512xf32>
    %308 = arith.truncf %303 : vector<8x128xf32> to vector<8x128xbf16>
    %c0_93 = arith.constant 0 : index
    %c0_94 = arith.constant 0 : index
    %309 = vector.load %arg5[%c0_93, %c0_94] : memref<128x512xbf16, #tpu.memory_space<vmem>>, vector<128x512xbf16>
    %cst_95 = arith.constant dense<0.000000e+00> : vector<8x512xf32>
    %310 = tpu.matmul %308, %309, %cst_95 {dimension_numbers = #tpu.dot_dimension_numbers<[1], [0], [0], [1], [0, 0, 1, 1], [], []>} : vector<8x128xbf16>, vector<128x512xbf16>, vector<8x512xf32> -> vector<8x512xf32>
    %311 = arith.addf %307, %310 : vector<8x512xf32>
    %312 = vector.extract_strided_slice %311 {offsets = [0, 0], sizes = [8, 128], strides = [1, 1]} : vector<8x512xf32> to vector<8x128xf32>
    %313 = arith.negf %312 : vector<8x128xf32>
    %314 = math.exp %313 : vector<8x128xf32>
    %cst_96 = arith.constant 1.000000e+00 : f32
    %315 = vector.broadcast %cst_96 : f32 to vector<8x128xf32>
    %316 = arith.addf %315, %314 : vector<8x128xf32>
    %317 = arith.divf %315, %316 : vector<8x128xf32>
    %318 = vector.extract_strided_slice %311 {offsets = [0, 128], sizes = [8, 128], strides = [1, 1]} : vector<8x512xf32> to vector<8x128xf32>
    %319 = arith.negf %318 : vector<8x128xf32>
    %320 = math.exp %319 : vector<8x128xf32>
    %cst_97 = arith.constant 1.000000e+00 : f32
    %321 = vector.broadcast %cst_97 : f32 to vector<8x128xf32>
    %322 = arith.addf %321, %320 : vector<8x128xf32>
    %323 = arith.divf %321, %322 : vector<8x128xf32>
    %324 = vector.extract_strided_slice %311 {offsets = [0, 256], sizes = [8, 128], strides = [1, 1]} : vector<8x512xf32> to vector<8x128xf32>
    %325 = math.tanh %324 : vector<8x128xf32>
    %326 = vector.extract_strided_slice %311 {offsets = [0, 384], sizes = [8, 128], strides = [1, 1]} : vector<8x512xf32> to vector<8x128xf32>
    %327 = arith.negf %326 : vector<8x128xf32>
    %328 = math.exp %327 : vector<8x128xf32>
    %cst_98 = arith.constant 1.000000e+00 : f32
    %329 = vector.broadcast %cst_98 : f32 to vector<8x128xf32>
    %330 = arith.addf %329, %328 : vector<8x128xf32>
    %331 = arith.divf %329, %330 : vector<8x128xf32>
    %332 = arith.mulf %323, %303 : vector<8x128xf32>
    %333 = arith.mulf %317, %325 : vector<8x128xf32>
    %334 = arith.addf %332, %333 : vector<8x128xf32>
    %335 = math.tanh %334 : vector<8x128xf32>
    %336 = arith.mulf %331, %335 : vector<8x128xf32>
    %337 = arith.truncf %336 : vector<8x128xf32> to vector<8x128xbf16>
    %338 = arith.index_cast %305 : i32 to index
    %c0_99 = arith.constant 0 : index
    %339 = vector.load %arg18[%338, %c0_99] : memref<64x128xbf16, #tpu.memory_space<vmem>>, vector<8x128xbf16>
    tpu.vector_store %arg18[%338, %c0_99], %337 {strides = array<i32>} : memref<64x128xbf16, #tpu.memory_space<vmem>>, vector<8x128xbf16>,
    %c1_i32_100 = arith.constant 1 : i32
    %c8_i32_101 = arith.constant 8 : i32
    %340 = arith.muli %c1_i32_100, %c8_i32_101 : i32
    %341 = tpu.assume_multiple %340, 8 : i32
    %342 = arith.index_cast %341 : i32 to index
    %c0_102 = arith.constant 0 : index
    %343 = vector.load %arg17[%342, %c0_102] : memref<64x512xf32, #tpu.memory_space<vmem>>, vector<8x512xf32>
    %344 = arith.truncf %336 : vector<8x128xf32> to vector<8x128xbf16>
    %c0_103 = arith.constant 0 : index
    %c0_104 = arith.constant 0 : index
    %345 = vector.load %arg5[%c0_103, %c0_104] : memref<128x512xbf16, #tpu.memory_space<vmem>>, vector<128x512xbf16>
    %cst_105 = arith.constant dense<0.000000e+00> : vector<8x512xf32>
    %346 = tpu.matmul %344, %345, %cst_105 {dimension_numbers = #tpu.dot_dimension_numbers<[1], [0], [0], [1], [0, 0, 1, 1], [], []>} : vector<8x128xbf16>, vector<128x512xbf16>, vector<8x512xf32> -> vector<8x512xf32>
    %347 = arith.addf %343, %346 : vector<8x512xf32>
    %348 = vector.extract_strided_slice %347 {offsets = [0, 0], sizes = [8, 128], strides = [1, 1]} : vector<8x512xf32> to vector<8x128xf32>
    %349 = arith.negf %348 : vector<8x128xf32>
    %350 = math.exp %349 : vector<8x128xf32>
    %cst_106 = arith.constant 1.000000e+00 : f32
    %351 = vector.broadcast %cst_106 : f32 to vector<8x128xf32>
    %352 = arith.addf %351, %350 : vector<8x128xf32>
    %353 = arith.divf %351, %352 : vector<8x128xf32>
    %354 = vector.extract_strided_slice %347 {offsets = [0, 128], sizes = [8, 128], strides = [1, 1]} : vector<8x512xf32> to vector<8x128xf32>
    %355 = arith.negf %354 : vector<8x128xf32>
    %356 = math.exp %355 : vector<8x128xf32>
    %cst_107 = arith.constant 1.000000e+00 : f32
    %357 = vector.broadcast %cst_107 : f32 to vector<8x128xf32>
    %358 = arith.addf %357, %356 : vector<8x128xf32>
    %359 = arith.divf %357, %358 : vector<8x128xf32>
    %360 = vector.extract_strided_slice %347 {offsets = [0, 256], sizes = [8, 128], strides = [1, 1]} : vector<8x512xf32> to vector<8x128xf32>
    %361 = math.tanh %360 : vector<8x128xf32>
    %362 = vector.extract_strided_slice %347 {offsets = [0, 384], sizes = [8, 128], strides = [1, 1]} : vector<8x512xf32> to vector<8x128xf32>
    %363 = arith.negf %362 : vector<8x128xf32>
    %364 = math.exp %363 : vector<8x128xf32>
    %cst_108 = arith.constant 1.000000e+00 : f32
    %365 = vector.broadcast %cst_108 : f32 to vector<8x128xf32>
    %366 = arith.addf %365, %364 : vector<8x128xf32>
    %367 = arith.divf %365, %366 : vector<8x128xf32>
    %368 = arith.mulf %359, %334 : vector<8x128xf32>
    %369 = arith.mulf %353, %361 : vector<8x128xf32>
    %370 = arith.addf %368, %369 : vector<8x128xf32>
    %371 = math.tanh %370 : vector<8x128xf32>
    %372 = arith.mulf %367, %371 : vector<8x128xf32>
    %373 = arith.truncf %372 : vector<8x128xf32> to vector<8x128xbf16>
    %374 = arith.index_cast %341 : i32 to index
    %c0_109 = arith.constant 0 : index
    %375 = vector.load %arg18[%374, %c0_109] : memref<64x128xbf16, #tpu.memory_space<vmem>>, vector<8x128xbf16>
    tpu.vector_store %arg18[%374, %c0_109], %373 {strides = array<i32>} : memref<64x128xbf16, #tpu.memory_space<vmem>>, vector<8x128xbf16>,
    %c2_i32_110 = arith.constant 2 : i32
    %c8_i32_111 = arith.constant 8 : i32
    %376 = arith.muli %c2_i32_110, %c8_i32_111 : i32
    %377 = tpu.assume_multiple %376, 8 : i32
    %378 = arith.index_cast %377 : i32 to index
    %c0_112 = arith.constant 0 : index
    %379 = vector.load %arg17[%378, %c0_112] : memref<64x512xf32, #tpu.memory_space<vmem>>, vector<8x512xf32>
    %380 = arith.truncf %372 : vector<8x128xf32> to vector<8x128xbf16>
    %c0_113 = arith.constant 0 : index
    %c0_114 = arith.constant 0 : index
    %381 = vector.load %arg5[%c0_113, %c0_114] : memref<128x512xbf16, #tpu.memory_space<vmem>>, vector<128x512xbf16>
    %cst_115 = arith.constant dense<0.000000e+00> : vector<8x512xf32>
    %382 = tpu.matmul %380, %381, %cst_115 {dimension_numbers = #tpu.dot_dimension_numbers<[1], [0], [0], [1], [0, 0, 1, 1], [], []>} : vector<8x128xbf16>, vector<128x512xbf16>, vector<8x512xf32> -> vector<8x512xf32>
    %383 = arith.addf %379, %382 : vector<8x512xf32>
    %384 = vector.extract_strided_slice %383 {offsets = [0, 0], sizes = [8, 128], strides = [1, 1]} : vector<8x512xf32> to vector<8x128xf32>
    %385 = arith.negf %384 : vector<8x128xf32>
    %386 = math.exp %385 : vector<8x128xf32>
    %cst_116 = arith.constant 1.000000e+00 : f32
    %387 = vector.broadcast %cst_116 : f32 to vector<8x128xf32>
    %388 = arith.addf %387, %386 : vector<8x128xf32>
    %389 = arith.divf %387, %388 : vector<8x128xf32>
    %390 = vector.extract_strided_slice %383 {offsets = [0, 128], sizes = [8, 128], strides = [1, 1]} : vector<8x512xf32> to vector<8x128xf32>
    %391 = arith.negf %390 : vector<8x128xf32>
    %392 = math.exp %391 : vector<8x128xf32>
    %cst_117 = arith.constant 1.000000e+00 : f32
    %393 = vector.broadcast %cst_117 : f32 to vector<8x128xf32>
    %394 = arith.addf %393, %392 : vector<8x128xf32>
    %395 = arith.divf %393, %394 : vector<8x128xf32>
    %396 = vector.extract_strided_slice %383 {offsets = [0, 256], sizes = [8, 128], strides = [1, 1]} : vector<8x512xf32> to vector<8x128xf32>
    %397 = math.tanh %396 : vector<8x128xf32>
    %398 = vector.extract_strided_slice %383 {offsets = [0, 384], sizes = [8, 128], strides = [1, 1]} : vector<8x512xf32> to vector<8x128xf32>
    %399 = arith.negf %398 : vector<8x128xf32>
    %400 = math.exp %399 : vector<8x128xf32>
    %cst_118 = arith.constant 1.000000e+00 : f32
    %401 = vector.broadcast %cst_118 : f32 to vector<8x128xf32>
    %402 = arith.addf %401, %400 : vector<8x128xf32>
    %403 = arith.divf %401, %402 : vector<8x128xf32>
    %404 = arith.mulf %395, %370 : vector<8x128xf32>
    %405 = arith.mulf %389, %397 : vector<8x128xf32>
    %406 = arith.addf %404, %405 : vector<8x128xf32>
    %407 = math.tanh %406 : vector<8x128xf32>
    %408 = arith.mulf %403, %407 : vector<8x128xf32>
    %409 = arith.truncf %408 : vector<8x128xf32> to vector<8x128xbf16>
    %410 = arith.index_cast %377 : i32 to index
    %c0_119 = arith.constant 0 : index
    %411 = vector.load %arg18[%410, %c0_119] : memref<64x128xbf16, #tpu.memory_space<vmem>>, vector<8x128xbf16>
    tpu.vector_store %arg18[%410, %c0_119], %409 {strides = array<i32>} : memref<64x128xbf16, #tpu.memory_space<vmem>>, vector<8x128xbf16>,
    %c3_i32_120 = arith.constant 3 : i32
    %c8_i32_121 = arith.constant 8 : i32
    %412 = arith.muli %c3_i32_120, %c8_i32_121 : i32
    %413 = tpu.assume_multiple %412, 8 : i32
    %414 = arith.index_cast %413 : i32 to index
    %c0_122 = arith.constant 0 : index
    %415 = vector.load %arg17[%414, %c0_122] : memref<64x512xf32, #tpu.memory_space<vmem>>, vector<8x512xf32>
    %416 = arith.truncf %408 : vector<8x128xf32> to vector<8x128xbf16>
    %c0_123 = arith.constant 0 : index
    %c0_124 = arith.constant 0 : index
    %417 = vector.load %arg5[%c0_123, %c0_124] : memref<128x512xbf16, #tpu.memory_space<vmem>>, vector<128x512xbf16>
    %cst_125 = arith.constant dense<0.000000e+00> : vector<8x512xf32>
    %418 = tpu.matmul %416, %417, %cst_125 {dimension_numbers = #tpu.dot_dimension_numbers<[1], [0], [0], [1], [0, 0, 1, 1], [], []>} : vector<8x128xbf16>, vector<128x512xbf16>, vector<8x512xf32> -> vector<8x512xf32>
    %419 = arith.addf %415, %418 : vector<8x512xf32>
    %420 = vector.extract_strided_slice %419 {offsets = [0, 0], sizes = [8, 128], strides = [1, 1]} : vector<8x512xf32> to vector<8x128xf32>
    %421 = arith.negf %420 : vector<8x128xf32>
    %422 = math.exp %421 : vector<8x128xf32>
    %cst_126 = arith.constant 1.000000e+00 : f32
    %423 = vector.broadcast %cst_126 : f32 to vector<8x128xf32>
    %424 = arith.addf %423, %422 : vector<8x128xf32>
    %425 = arith.divf %423, %424 : vector<8x128xf32>
    %426 = vector.extract_strided_slice %419 {offsets = [0, 128], sizes = [8, 128], strides = [1, 1]} : vector<8x512xf32> to vector<8x128xf32>
    %427 = arith.negf %426 : vector<8x128xf32>
    %428 = math.exp %427 : vector<8x128xf32>
    %cst_127 = arith.constant 1.000000e+00 : f32
    %429 = vector.broadcast %cst_127 : f32 to vector<8x128xf32>
    %430 = arith.addf %429, %428 : vector<8x128xf32>
    %431 = arith.divf %429, %430 : vector<8x128xf32>
    %432 = vector.extract_strided_slice %419 {offsets = [0, 256], sizes = [8, 128], strides = [1, 1]} : vector<8x512xf32> to vector<8x128xf32>
    %433 = math.tanh %432 : vector<8x128xf32>
    %434 = vector.extract_strided_slice %419 {offsets = [0, 384], sizes = [8, 128], strides = [1, 1]} : vector<8x512xf32> to vector<8x128xf32>
    %435 = arith.negf %434 : vector<8x128xf32>
    %436 = math.exp %435 : vector<8x128xf32>
    %cst_128 = arith.constant 1.000000e+00 : f32
    %437 = vector.broadcast %cst_128 : f32 to vector<8x128xf32>
    %438 = arith.addf %437, %436 : vector<8x128xf32>
    %439 = arith.divf %437, %438 : vector<8x128xf32>
    %440 = arith.mulf %431, %406 : vector<8x128xf32>
    %441 = arith.mulf %425, %433 : vector<8x128xf32>
    %442 = arith.addf %440, %441 : vector<8x128xf32>
    %443 = math.tanh %442 : vector<8x128xf32>
    %444 = arith.mulf %439, %443 : vector<8x128xf32>
    %445 = arith.truncf %444 : vector<8x128xf32> to vector<8x128xbf16>
    %446 = arith.index_cast %413 : i32 to index
    %c0_129 = arith.constant 0 : index
    %447 = vector.load %arg18[%446, %c0_129] : memref<64x128xbf16, #tpu.memory_space<vmem>>, vector<8x128xbf16>
    tpu.vector_store %arg18[%446, %c0_129], %445 {strides = array<i32>} : memref<64x128xbf16, #tpu.memory_space<vmem>>, vector<8x128xbf16>,
    %c4_i32_130 = arith.constant 4 : i32
    %c8_i32_131 = arith.constant 8 : i32
    %448 = arith.muli %c4_i32_130, %c8_i32_131 : i32
    %449 = tpu.assume_multiple %448, 8 : i32
    %450 = arith.index_cast %449 : i32 to index
    %c0_132 = arith.constant 0 : index
    %451 = vector.load %arg17[%450, %c0_132] : memref<64x512xf32, #tpu.memory_space<vmem>>, vector<8x512xf32>
    %452 = arith.truncf %444 : vector<8x128xf32> to vector<8x128xbf16>
    %c0_133 = arith.constant 0 : index
    %c0_134 = arith.constant 0 : index
    %453 = vector.load %arg5[%c0_133, %c0_134] : memref<128x512xbf16, #tpu.memory_space<vmem>>, vector<128x512xbf16>
    %cst_135 = arith.constant dense<0.000000e+00> : vector<8x512xf32>
    %454 = tpu.matmul %452, %453, %cst_135 {dimension_numbers = #tpu.dot_dimension_numbers<[1], [0], [0], [1], [0, 0, 1, 1], [], []>} : vector<8x128xbf16>, vector<128x512xbf16>, vector<8x512xf32> -> vector<8x512xf32>
    %455 = arith.addf %451, %454 : vector<8x512xf32>
    %456 = vector.extract_strided_slice %455 {offsets = [0, 0], sizes = [8, 128], strides = [1, 1]} : vector<8x512xf32> to vector<8x128xf32>
    %457 = arith.negf %456 : vector<8x128xf32>
    %458 = math.exp %457 : vector<8x128xf32>
    %cst_136 = arith.constant 1.000000e+00 : f32
    %459 = vector.broadcast %cst_136 : f32 to vector<8x128xf32>
    %460 = arith.addf %459, %458 : vector<8x128xf32>
    %461 = arith.divf %459, %460 : vector<8x128xf32>
    %462 = vector.extract_strided_slice %455 {offsets = [0, 128], sizes = [8, 128], strides = [1, 1]} : vector<8x512xf32> to vector<8x128xf32>
    %463 = arith.negf %462 : vector<8x128xf32>
    %464 = math.exp %463 : vector<8x128xf32>
    %cst_137 = arith.constant 1.000000e+00 : f32
    %465 = vector.broadcast %cst_137 : f32 to vector<8x128xf32>
    %466 = arith.addf %465, %464 : vector<8x128xf32>
    %467 = arith.divf %465, %466 : vector<8x128xf32>
    %468 = vector.extract_strided_slice %455 {offsets = [0, 256], sizes = [8, 128], strides = [1, 1]} : vector<8x512xf32> to vector<8x128xf32>
    %469 = math.tanh %468 : vector<8x128xf32>
    %470 = vector.extract_strided_slice %455 {offsets = [0, 384], sizes = [8, 128], strides = [1, 1]} : vector<8x512xf32> to vector<8x128xf32>
    %471 = arith.negf %470 : vector<8x128xf32>
    %472 = math.exp %471 : vector<8x128xf32>
    %cst_138 = arith.constant 1.000000e+00 : f32
    %473 = vector.broadcast %cst_138 : f32 to vector<8x128xf32>
    %474 = arith.addf %473, %472 : vector<8x128xf32>
    %475 = arith.divf %473, %474 : vector<8x128xf32>
    %476 = arith.mulf %467, %442 : vector<8x128xf32>
    %477 = arith.mulf %461, %469 : vector<8x128xf32>
    %478 = arith.addf %476, %477 : vector<8x128xf32>
    %479 = math.tanh %478 : vector<8x128xf32>
    %480 = arith.mulf %475, %479 : vector<8x128xf32>
    %481 = arith.truncf %480 : vector<8x128xf32> to vector<8x128xbf16>
    %482 = arith.index_cast %449 : i32 to index
    %c0_139 = arith.constant 0 : index
    %483 = vector.load %arg18[%482, %c0_139] : memref<64x128xbf16, #tpu.memory_space<vmem>>, vector<8x128xbf16>
    tpu.vector_store %arg18[%482, %c0_139], %481 {strides = array<i32>} : memref<64x128xbf16, #tpu.memory_space<vmem>>, vector<8x128xbf16>,
    %c5_i32_140 = arith.constant 5 : i32
    %c8_i32_141 = arith.constant 8 : i32
    %484 = arith.muli %c5_i32_140, %c8_i32_141 : i32
    %485 = tpu.assume_multiple %484, 8 : i32
    %486 = arith.index_cast %485 : i32 to index
    %c0_142 = arith.constant 0 : index
    %487 = vector.load %arg17[%486, %c0_142] : memref<64x512xf32, #tpu.memory_space<vmem>>, vector<8x512xf32>
    %488 = arith.truncf %480 : vector<8x128xf32> to vector<8x128xbf16>
    %c0_143 = arith.constant 0 : index
    %c0_144 = arith.constant 0 : index
    %489 = vector.load %arg5[%c0_143, %c0_144] : memref<128x512xbf16, #tpu.memory_space<vmem>>, vector<128x512xbf16>
    %cst_145 = arith.constant dense<0.000000e+00> : vector<8x512xf32>
    %490 = tpu.matmul %488, %489, %cst_145 {dimension_numbers = #tpu.dot_dimension_numbers<[1], [0], [0], [1], [0, 0, 1, 1], [], []>} : vector<8x128xbf16>, vector<128x512xbf16>, vector<8x512xf32> -> vector<8x512xf32>
    %491 = arith.addf %487, %490 : vector<8x512xf32>
    %492 = vector.extract_strided_slice %491 {offsets = [0, 0], sizes = [8, 128], strides = [1, 1]} : vector<8x512xf32> to vector<8x128xf32>
    %493 = arith.negf %492 : vector<8x128xf32>
    %494 = math.exp %493 : vector<8x128xf32>
    %cst_146 = arith.constant 1.000000e+00 : f32
    %495 = vector.broadcast %cst_146 : f32 to vector<8x128xf32>
    %496 = arith.addf %495, %494 : vector<8x128xf32>
    %497 = arith.divf %495, %496 : vector<8x128xf32>
    %498 = vector.extract_strided_slice %491 {offsets = [0, 128], sizes = [8, 128], strides = [1, 1]} : vector<8x512xf32> to vector<8x128xf32>
    %499 = arith.negf %498 : vector<8x128xf32>
    %500 = math.exp %499 : vector<8x128xf32>
    %cst_147 = arith.constant 1.000000e+00 : f32
    %501 = vector.broadcast %cst_147 : f32 to vector<8x128xf32>
    %502 = arith.addf %501, %500 : vector<8x128xf32>
    %503 = arith.divf %501, %502 : vector<8x128xf32>
    %504 = vector.extract_strided_slice %491 {offsets = [0, 256], sizes = [8, 128], strides = [1, 1]} : vector<8x512xf32> to vector<8x128xf32>
    %505 = math.tanh %504 : vector<8x128xf32>
    %506 = vector.extract_strided_slice %491 {offsets = [0, 384], sizes = [8, 128], strides = [1, 1]} : vector<8x512xf32> to vector<8x128xf32>
    %507 = arith.negf %506 : vector<8x128xf32>
    %508 = math.exp %507 : vector<8x128xf32>
    %cst_148 = arith.constant 1.000000e+00 : f32
    %509 = vector.broadcast %cst_148 : f32 to vector<8x128xf32>
    %510 = arith.addf %509, %508 : vector<8x128xf32>
    %511 = arith.divf %509, %510 : vector<8x128xf32>
    %512 = arith.mulf %503, %478 : vector<8x128xf32>
    %513 = arith.mulf %497, %505 : vector<8x128xf32>
    %514 = arith.addf %512, %513 : vector<8x128xf32>
    %515 = math.tanh %514 : vector<8x128xf32>
    %516 = arith.mulf %511, %515 : vector<8x128xf32>
    %517 = arith.truncf %516 : vector<8x128xf32> to vector<8x128xbf16>
    %518 = arith.index_cast %485 : i32 to index
    %c0_149 = arith.constant 0 : index
    %519 = vector.load %arg18[%518, %c0_149] : memref<64x128xbf16, #tpu.memory_space<vmem>>, vector<8x128xbf16>
    tpu.vector_store %arg18[%518, %c0_149], %517 {strides = array<i32>} : memref<64x128xbf16, #tpu.memory_space<vmem>>, vector<8x128xbf16>,
    %c6_i32_150 = arith.constant 6 : i32
    %c8_i32_151 = arith.constant 8 : i32
    %520 = arith.muli %c6_i32_150, %c8_i32_151 : i32
    %521 = tpu.assume_multiple %520, 8 : i32
    %522 = arith.index_cast %521 : i32 to index
    %c0_152 = arith.constant 0 : index
    %523 = vector.load %arg17[%522, %c0_152] : memref<64x512xf32, #tpu.memory_space<vmem>>, vector<8x512xf32>
    %524 = arith.truncf %516 : vector<8x128xf32> to vector<8x128xbf16>
    %c0_153 = arith.constant 0 : index
    %c0_154 = arith.constant 0 : index
    %525 = vector.load %arg5[%c0_153, %c0_154] : memref<128x512xbf16, #tpu.memory_space<vmem>>, vector<128x512xbf16>
    %cst_155 = arith.constant dense<0.000000e+00> : vector<8x512xf32>
    %526 = tpu.matmul %524, %525, %cst_155 {dimension_numbers = #tpu.dot_dimension_numbers<[1], [0], [0], [1], [0, 0, 1, 1], [], []>} : vector<8x128xbf16>, vector<128x512xbf16>, vector<8x512xf32> -> vector<8x512xf32>
    %527 = arith.addf %523, %526 : vector<8x512xf32>
    %528 = vector.extract_strided_slice %527 {offsets = [0, 0], sizes = [8, 128], strides = [1, 1]} : vector<8x512xf32> to vector<8x128xf32>
    %529 = arith.negf %528 : vector<8x128xf32>
    %530 = math.exp %529 : vector<8x128xf32>
    %cst_156 = arith.constant 1.000000e+00 : f32
    %531 = vector.broadcast %cst_156 : f32 to vector<8x128xf32>
    %532 = arith.addf %531, %530 : vector<8x128xf32>
    %533 = arith.divf %531, %532 : vector<8x128xf32>
    %534 = vector.extract_strided_slice %527 {offsets = [0, 128], sizes = [8, 128], strides = [1, 1]} : vector<8x512xf32> to vector<8x128xf32>
    %535 = arith.negf %534 : vector<8x128xf32>
    %536 = math.exp %535 : vector<8x128xf32>
    %cst_157 = arith.constant 1.000000e+00 : f32
    %537 = vector.broadcast %cst_157 : f32 to vector<8x128xf32>
    %538 = arith.addf %537, %536 : vector<8x128xf32>
    %539 = arith.divf %537, %538 : vector<8x128xf32>
    %540 = vector.extract_strided_slice %527 {offsets = [0, 256], sizes = [8, 128], strides = [1, 1]} : vector<8x512xf32> to vector<8x128xf32>
    %541 = math.tanh %540 : vector<8x128xf32>
    %542 = vector.extract_strided_slice %527 {offsets = [0, 384], sizes = [8, 128], strides = [1, 1]} : vector<8x512xf32> to vector<8x128xf32>
    %543 = arith.negf %542 : vector<8x128xf32>
    %544 = math.exp %543 : vector<8x128xf32>
    %cst_158 = arith.constant 1.000000e+00 : f32
    %545 = vector.broadcast %cst_158 : f32 to vector<8x128xf32>
    %546 = arith.addf %545, %544 : vector<8x128xf32>
    %547 = arith.divf %545, %546 : vector<8x128xf32>
    %548 = arith.mulf %539, %514 : vector<8x128xf32>
    %549 = arith.mulf %533, %541 : vector<8x128xf32>
    %550 = arith.addf %548, %549 : vector<8x128xf32>
    %551 = math.tanh %550 : vector<8x128xf32>
    %552 = arith.mulf %547, %551 : vector<8x128xf32>
    %553 = arith.truncf %552 : vector<8x128xf32> to vector<8x128xbf16>
    %554 = arith.index_cast %521 : i32 to index
    %c0_159 = arith.constant 0 : index
    %555 = vector.load %arg18[%554, %c0_159] : memref<64x128xbf16, #tpu.memory_space<vmem>>, vector<8x128xbf16>
    tpu.vector_store %arg18[%554, %c0_159], %553 {strides = array<i32>} : memref<64x128xbf16, #tpu.memory_space<vmem>>, vector<8x128xbf16>,
    %c7_i32_160 = arith.constant 7 : i32
    %c8_i32_161 = arith.constant 8 : i32
    %556 = arith.muli %c7_i32_160, %c8_i32_161 : i32
    %557 = tpu.assume_multiple %556, 8 : i32
    %558 = arith.index_cast %557 : i32 to index
    %c0_162 = arith.constant 0 : index
    %559 = vector.load %arg17[%558, %c0_162] : memref<64x512xf32, #tpu.memory_space<vmem>>, vector<8x512xf32>
    %560 = arith.truncf %552 : vector<8x128xf32> to vector<8x128xbf16>
    %c0_163 = arith.constant 0 : index
    %c0_164 = arith.constant 0 : index
    %561 = vector.load %arg5[%c0_163, %c0_164] : memref<128x512xbf16, #tpu.memory_space<vmem>>, vector<128x512xbf16>
    %cst_165 = arith.constant dense<0.000000e+00> : vector<8x512xf32>
    %562 = tpu.matmul %560, %561, %cst_165 {dimension_numbers = #tpu.dot_dimension_numbers<[1], [0], [0], [1], [0, 0, 1, 1], [], []>} : vector<8x128xbf16>, vector<128x512xbf16>, vector<8x512xf32> -> vector<8x512xf32>
    %563 = arith.addf %559, %562 : vector<8x512xf32>
    %564 = vector.extract_strided_slice %563 {offsets = [0, 0], sizes = [8, 128], strides = [1, 1]} : vector<8x512xf32> to vector<8x128xf32>
    %565 = arith.negf %564 : vector<8x128xf32>
    %566 = math.exp %565 : vector<8x128xf32>
    %cst_166 = arith.constant 1.000000e+00 : f32
    %567 = vector.broadcast %cst_166 : f32 to vector<8x128xf32>
    %568 = arith.addf %567, %566 : vector<8x128xf32>
    %569 = arith.divf %567, %568 : vector<8x128xf32>
    %570 = vector.extract_strided_slice %563 {offsets = [0, 128], sizes = [8, 128], strides = [1, 1]} : vector<8x512xf32> to vector<8x128xf32>
    %571 = arith.negf %570 : vector<8x128xf32>
    %572 = math.exp %571 : vector<8x128xf32>
    %cst_167 = arith.constant 1.000000e+00 : f32
    %573 = vector.broadcast %cst_167 : f32 to vector<8x128xf32>
    %574 = arith.addf %573, %572 : vector<8x128xf32>
    %575 = arith.divf %573, %574 : vector<8x128xf32>
    %576 = vector.extract_strided_slice %563 {offsets = [0, 256], sizes = [8, 128], strides = [1, 1]} : vector<8x512xf32> to vector<8x128xf32>
    %577 = math.tanh %576 : vector<8x128xf32>
    %578 = vector.extract_strided_slice %563 {offsets = [0, 384], sizes = [8, 128], strides = [1, 1]} : vector<8x512xf32> to vector<8x128xf32>
    %579 = arith.negf %578 : vector<8x128xf32>
    %580 = math.exp %579 : vector<8x128xf32>
    %cst_168 = arith.constant 1.000000e+00 : f32
    %581 = vector.broadcast %cst_168 : f32 to vector<8x128xf32>
    %582 = arith.addf %581, %580 : vector<8x128xf32>
    %583 = arith.divf %581, %582 : vector<8x128xf32>
    %584 = arith.mulf %575, %550 : vector<8x128xf32>
    %585 = arith.mulf %569, %577 : vector<8x128xf32>
    %586 = arith.addf %584, %585 : vector<8x128xf32>
    %587 = math.tanh %586 : vector<8x128xf32>
    %588 = arith.mulf %583, %587 : vector<8x128xf32>
    %589 = arith.truncf %588 : vector<8x128xf32> to vector<8x128xbf16>
    %590 = arith.index_cast %557 : i32 to index
    %c0_169 = arith.constant 0 : index
    %591 = vector.load %arg18[%590, %c0_169] : memref<64x128xbf16, #tpu.memory_space<vmem>>, vector<8x128xbf16>
    tpu.vector_store %arg18[%590, %c0_169], %589 {strides = array<i32>} : memref<64x128xbf16, #tpu.memory_space<vmem>>, vector<8x128xbf16>,
    %c8_i32_170 = arith.constant 8 : i32
    %c0_171 = arith.constant 0 : index
    %c0_172 = arith.constant 0 : index
    %592 = vector.load %arg18[%c0_171, %c0_172] : memref<64x128xbf16, #tpu.memory_space<vmem>>, vector<64x128xbf16>
    %c0_173 = arith.constant 0 : index
    %c0_174 = arith.constant 0 : index
    %593 = vector.load %arg7[%c0_173, %c0_174] : memref<128x512xbf16, #tpu.memory_space<vmem>>, vector<128x512xbf16>
    %cst_175 = arith.constant dense<0.000000e+00> : vector<64x512xf32>
    %594 = tpu.matmul %592, %593, %cst_175 {dimension_numbers = #tpu.dot_dimension_numbers<[1], [0], [0], [1], [0, 0, 1, 1], [], []>} : vector<64x128xbf16>, vector<128x512xbf16>, vector<64x512xf32> -> vector<64x512xf32>
    %c0_176 = arith.constant 0 : index
    %c0_177 = arith.constant 0 : index
    %595 = vector.load %arg9[%c0_176, %c0_177] : memref<1x512xf32, #tpu.memory_space<vmem>>, vector<1x512xf32>
    %596 = vector.broadcast %595 : vector<1x512xf32> to vector<64x512xf32>
    %597 = arith.addf %594, %596 : vector<64x512xf32>
    %c0_178 = arith.constant 0 : index
    %c0_179 = arith.constant 0 : index
    %598 = vector.load %arg17[%c0_178, %c0_179] : memref<64x512xf32, #tpu.memory_space<vmem>>, vector<64x512xf32>
    tpu.vector_store %arg17[%c0_178, %c0_179], %597 {strides = array<i32>} : memref<64x512xf32, #tpu.memory_space<vmem>>, vector<64x512xf32>,
    %cst_180 = arith.constant 0.000000e+00 : f32
    %599 = vector.broadcast %cst_180 : f32 to vector<8x128xf32>
    %c0_i32_181 = arith.constant 0 : i32
    %c8_i32_182 = arith.constant 8 : i32
    %600 = arith.muli %c0_i32_181, %c8_i32_182 : i32
    %601 = tpu.assume_multiple %600, 8 : i32
    %602 = arith.index_cast %601 : i32 to index
    %c0_183 = arith.constant 0 : index
    %603 = vector.load %arg17[%602, %c0_183] : memref<64x512xf32, #tpu.memory_space<vmem>>, vector<8x512xf32>
    %604 = arith.truncf %599 : vector<8x128xf32> to vector<8x128xbf16>
    %c0_184 = arith.constant 0 : index
    %c0_185 = arith.constant 0 : index
    %605 = vector.load %arg8[%c0_184, %c0_185] : memref<128x512xbf16, #tpu.memory_space<vmem>>, vector<128x512xbf16>
    %cst_186 = arith.constant dense<0.000000e+00> : vector<8x512xf32>
    %606 = tpu.matmul %604, %605, %cst_186 {dimension_numbers = #tpu.dot_dimension_numbers<[1], [0], [0], [1], [0, 0, 1, 1], [], []>} : vector<8x128xbf16>, vector<128x512xbf16>, vector<8x512xf32> -> vector<8x512xf32>
    %607 = arith.addf %603, %606 : vector<8x512xf32>
    %608 = vector.extract_strided_slice %607 {offsets = [0, 0], sizes = [8, 128], strides = [1, 1]} : vector<8x512xf32> to vector<8x128xf32>
    %609 = arith.negf %608 : vector<8x128xf32>
    %610 = math.exp %609 : vector<8x128xf32>
    %cst_187 = arith.constant 1.000000e+00 : f32
    %611 = vector.broadcast %cst_187 : f32 to vector<8x128xf32>
    %612 = arith.addf %611, %610 : vector<8x128xf32>
    %613 = arith.divf %611, %612 : vector<8x128xf32>
    %614 = vector.extract_strided_slice %607 {offsets = [0, 128], sizes = [8, 128], strides = [1, 1]} : vector<8x512xf32> to vector<8x128xf32>
    %615 = arith.negf %614 : vector<8x128xf32>
    %616 = math.exp %615 : vector<8x128xf32>
    %cst_188 = arith.constant 1.000000e+00 : f32
    %617 = vector.broadcast %cst_188 : f32 to vector<8x128xf32>
    %618 = arith.addf %617, %616 : vector<8x128xf32>
    %619 = arith.divf %617, %618 : vector<8x128xf32>
    %620 = vector.extract_strided_slice %607 {offsets = [0, 256], sizes = [8, 128], strides = [1, 1]} : vector<8x512xf32> to vector<8x128xf32>
    %621 = math.tanh %620 : vector<8x128xf32>
    %622 = vector.extract_strided_slice %607 {offsets = [0, 384], sizes = [8, 128], strides = [1, 1]} : vector<8x512xf32> to vector<8x128xf32>
    %623 = arith.negf %622 : vector<8x128xf32>
    %624 = math.exp %623 : vector<8x128xf32>
    %cst_189 = arith.constant 1.000000e+00 : f32
    %625 = vector.broadcast %cst_189 : f32 to vector<8x128xf32>
    %626 = arith.addf %625, %624 : vector<8x128xf32>
    %627 = arith.divf %625, %626 : vector<8x128xf32>
    %628 = arith.mulf %619, %599 : vector<8x128xf32>
    %629 = arith.mulf %613, %621 : vector<8x128xf32>
    %630 = arith.addf %628, %629 : vector<8x128xf32>
    %631 = math.tanh %630 : vector<8x128xf32>
    %632 = arith.mulf %627, %631 : vector<8x128xf32>
    %c1_i32_190 = arith.constant 1 : i32
    %c8_i32_191 = arith.constant 8 : i32
    %633 = arith.muli %c1_i32_190, %c8_i32_191 : i32
    %634 = tpu.assume_multiple %633, 8 : i32
    %635 = arith.index_cast %634 : i32 to index
    %c0_192 = arith.constant 0 : index
    %636 = vector.load %arg17[%635, %c0_192] : memref<64x512xf32, #tpu.memory_space<vmem>>, vector<8x512xf32>
    %637 = arith.truncf %632 : vector<8x128xf32> to vector<8x128xbf16>
    %c0_193 = arith.constant 0 : index
    %c0_194 = arith.constant 0 : index
    %638 = vector.load %arg8[%c0_193, %c0_194] : memref<128x512xbf16, #tpu.memory_space<vmem>>, vector<128x512xbf16>
    %cst_195 = arith.constant dense<0.000000e+00> : vector<8x512xf32>
    %639 = tpu.matmul %637, %638, %cst_195 {dimension_numbers = #tpu.dot_dimension_numbers<[1], [0], [0], [1], [0, 0, 1, 1], [], []>} : vector<8x128xbf16>, vector<128x512xbf16>, vector<8x512xf32> -> vector<8x512xf32>
    %640 = arith.addf %636, %639 : vector<8x512xf32>
    %641 = vector.extract_strided_slice %640 {offsets = [0, 0], sizes = [8, 128], strides = [1, 1]} : vector<8x512xf32> to vector<8x128xf32>
    %642 = arith.negf %641 : vector<8x128xf32>
    %643 = math.exp %642 : vector<8x128xf32>
    %cst_196 = arith.constant 1.000000e+00 : f32
    %644 = vector.broadcast %cst_196 : f32 to vector<8x128xf32>
    %645 = arith.addf %644, %643 : vector<8x128xf32>
    %646 = arith.divf %644, %645 : vector<8x128xf32>
    %647 = vector.extract_strided_slice %640 {offsets = [0, 128], sizes = [8, 128], strides = [1, 1]} : vector<8x512xf32> to vector<8x128xf32>
    %648 = arith.negf %647 : vector<8x128xf32>
    %649 = math.exp %648 : vector<8x128xf32>
    %cst_197 = arith.constant 1.000000e+00 : f32
    %650 = vector.broadcast %cst_197 : f32 to vector<8x128xf32>
    %651 = arith.addf %650, %649 : vector<8x128xf32>
    %652 = arith.divf %650, %651 : vector<8x128xf32>
    %653 = vector.extract_strided_slice %640 {offsets = [0, 256], sizes = [8, 128], strides = [1, 1]} : vector<8x512xf32> to vector<8x128xf32>
    %654 = math.tanh %653 : vector<8x128xf32>
    %655 = vector.extract_strided_slice %640 {offsets = [0, 384], sizes = [8, 128], strides = [1, 1]} : vector<8x512xf32> to vector<8x128xf32>
    %656 = arith.negf %655 : vector<8x128xf32>
    %657 = math.exp %656 : vector<8x128xf32>
    %cst_198 = arith.constant 1.000000e+00 : f32
    %658 = vector.broadcast %cst_198 : f32 to vector<8x128xf32>
    %659 = arith.addf %658, %657 : vector<8x128xf32>
    %660 = arith.divf %658, %659 : vector<8x128xf32>
    %661 = arith.mulf %652, %630 : vector<8x128xf32>
    %662 = arith.mulf %646, %654 : vector<8x128xf32>
    %663 = arith.addf %661, %662 : vector<8x128xf32>
    %664 = math.tanh %663 : vector<8x128xf32>
    %665 = arith.mulf %660, %664 : vector<8x128xf32>
    %c2_i32_199 = arith.constant 2 : i32
    %c8_i32_200 = arith.constant 8 : i32
    %666 = arith.muli %c2_i32_199, %c8_i32_200 : i32
    %667 = tpu.assume_multiple %666, 8 : i32
    %668 = arith.index_cast %667 : i32 to index
    %c0_201 = arith.constant 0 : index
    %669 = vector.load %arg17[%668, %c0_201] : memref<64x512xf32, #tpu.memory_space<vmem>>, vector<8x512xf32>
    %670 = arith.truncf %665 : vector<8x128xf32> to vector<8x128xbf16>
    %c0_202 = arith.constant 0 : index
    %c0_203 = arith.constant 0 : index
    %671 = vector.load %arg8[%c0_202, %c0_203] : memref<128x512xbf16, #tpu.memory_space<vmem>>, vector<128x512xbf16>
    %cst_204 = arith.constant dense<0.000000e+00> : vector<8x512xf32>
    %672 = tpu.matmul %670, %671, %cst_204 {dimension_numbers = #tpu.dot_dimension_numbers<[1], [0], [0], [1], [0, 0, 1, 1], [], []>} : vector<8x128xbf16>, vector<128x512xbf16>, vector<8x512xf32> -> vector<8x512xf32>
    %673 = arith.addf %669, %672 : vector<8x512xf32>
    %674 = vector.extract_strided_slice %673 {offsets = [0, 0], sizes = [8, 128], strides = [1, 1]} : vector<8x512xf32> to vector<8x128xf32>
    %675 = arith.negf %674 : vector<8x128xf32>
    %676 = math.exp %675 : vector<8x128xf32>
    %cst_205 = arith.constant 1.000000e+00 : f32
    %677 = vector.broadcast %cst_205 : f32 to vector<8x128xf32>
    %678 = arith.addf %677, %676 : vector<8x128xf32>
    %679 = arith.divf %677, %678 : vector<8x128xf32>
    %680 = vector.extract_strided_slice %673 {offsets = [0, 128], sizes = [8, 128], strides = [1, 1]} : vector<8x512xf32> to vector<8x128xf32>
    %681 = arith.negf %680 : vector<8x128xf32>
    %682 = math.exp %681 : vector<8x128xf32>
    %cst_206 = arith.constant 1.000000e+00 : f32
    %683 = vector.broadcast %cst_206 : f32 to vector<8x128xf32>
    %684 = arith.addf %683, %682 : vector<8x128xf32>
    %685 = arith.divf %683, %684 : vector<8x128xf32>
    %686 = vector.extract_strided_slice %673 {offsets = [0, 256], sizes = [8, 128], strides = [1, 1]} : vector<8x512xf32> to vector<8x128xf32>
    %687 = math.tanh %686 : vector<8x128xf32>
    %688 = vector.extract_strided_slice %673 {offsets = [0, 384], sizes = [8, 128], strides = [1, 1]} : vector<8x512xf32> to vector<8x128xf32>
    %689 = arith.negf %688 : vector<8x128xf32>
    %690 = math.exp %689 : vector<8x128xf32>
    %cst_207 = arith.constant 1.000000e+00 : f32
    %691 = vector.broadcast %cst_207 : f32 to vector<8x128xf32>
    %692 = arith.addf %691, %690 : vector<8x128xf32>
    %693 = arith.divf %691, %692 : vector<8x128xf32>
    %694 = arith.mulf %685, %663 : vector<8x128xf32>
    %695 = arith.mulf %679, %687 : vector<8x128xf32>
    %696 = arith.addf %694, %695 : vector<8x128xf32>
    %697 = math.tanh %696 : vector<8x128xf32>
    %698 = arith.mulf %693, %697 : vector<8x128xf32>
    %c3_i32_208 = arith.constant 3 : i32
    %c8_i32_209 = arith.constant 8 : i32
    %699 = arith.muli %c3_i32_208, %c8_i32_209 : i32
    %700 = tpu.assume_multiple %699, 8 : i32
    %701 = arith.index_cast %700 : i32 to index
    %c0_210 = arith.constant 0 : index
    %702 = vector.load %arg17[%701, %c0_210] : memref<64x512xf32, #tpu.memory_space<vmem>>, vector<8x512xf32>
    %703 = arith.truncf %698 : vector<8x128xf32> to vector<8x128xbf16>
    %c0_211 = arith.constant 0 : index
    %c0_212 = arith.constant 0 : index
    %704 = vector.load %arg8[%c0_211, %c0_212] : memref<128x512xbf16, #tpu.memory_space<vmem>>, vector<128x512xbf16>
    %cst_213 = arith.constant dense<0.000000e+00> : vector<8x512xf32>
    %705 = tpu.matmul %703, %704, %cst_213 {dimension_numbers = #tpu.dot_dimension_numbers<[1], [0], [0], [1], [0, 0, 1, 1], [], []>} : vector<8x128xbf16>, vector<128x512xbf16>, vector<8x512xf32> -> vector<8x512xf32>
    %706 = arith.addf %702, %705 : vector<8x512xf32>
    %707 = vector.extract_strided_slice %706 {offsets = [0, 0], sizes = [8, 128], strides = [1, 1]} : vector<8x512xf32> to vector<8x128xf32>
    %708 = arith.negf %707 : vector<8x128xf32>
    %709 = math.exp %708 : vector<8x128xf32>
    %cst_214 = arith.constant 1.000000e+00 : f32
    %710 = vector.broadcast %cst_214 : f32 to vector<8x128xf32>
    %711 = arith.addf %710, %709 : vector<8x128xf32>
    %712 = arith.divf %710, %711 : vector<8x128xf32>
    %713 = vector.extract_strided_slice %706 {offsets = [0, 128], sizes = [8, 128], strides = [1, 1]} : vector<8x512xf32> to vector<8x128xf32>
    %714 = arith.negf %713 : vector<8x128xf32>
    %715 = math.exp %714 : vector<8x128xf32>
    %cst_215 = arith.constant 1.000000e+00 : f32
    %716 = vector.broadcast %cst_215 : f32 to vector<8x128xf32>
    %717 = arith.addf %716, %715 : vector<8x128xf32>
    %718 = arith.divf %716, %717 : vector<8x128xf32>
    %719 = vector.extract_strided_slice %706 {offsets = [0, 256], sizes = [8, 128], strides = [1, 1]} : vector<8x512xf32> to vector<8x128xf32>
    %720 = math.tanh %719 : vector<8x128xf32>
    %721 = vector.extract_strided_slice %706 {offsets = [0, 384], sizes = [8, 128], strides = [1, 1]} : vector<8x512xf32> to vector<8x128xf32>
    %722 = arith.negf %721 : vector<8x128xf32>
    %723 = math.exp %722 : vector<8x128xf32>
    %cst_216 = arith.constant 1.000000e+00 : f32
    %724 = vector.broadcast %cst_216 : f32 to vector<8x128xf32>
    %725 = arith.addf %724, %723 : vector<8x128xf32>
    %726 = arith.divf %724, %725 : vector<8x128xf32>
    %727 = arith.mulf %718, %696 : vector<8x128xf32>
    %728 = arith.mulf %712, %720 : vector<8x128xf32>
    %729 = arith.addf %727, %728 : vector<8x128xf32>
    %730 = math.tanh %729 : vector<8x128xf32>
    %731 = arith.mulf %726, %730 : vector<8x128xf32>
    %c4_i32_217 = arith.constant 4 : i32
    %c8_i32_218 = arith.constant 8 : i32
    %732 = arith.muli %c4_i32_217, %c8_i32_218 : i32
    %733 = tpu.assume_multiple %732, 8 : i32
    %734 = arith.index_cast %733 : i32 to index
    %c0_219 = arith.constant 0 : index
    %735 = vector.load %arg17[%734, %c0_219] : memref<64x512xf32, #tpu.memory_space<vmem>>, vector<8x512xf32>
    %736 = arith.truncf %731 : vector<8x128xf32> to vector<8x128xbf16>
    %c0_220 = arith.constant 0 : index
    %c0_221 = arith.constant 0 : index
    %737 = vector.load %arg8[%c0_220, %c0_221] : memref<128x512xbf16, #tpu.memory_space<vmem>>, vector<128x512xbf16>
    %cst_222 = arith.constant dense<0.000000e+00> : vector<8x512xf32>
    %738 = tpu.matmul %736, %737, %cst_222 {dimension_numbers = #tpu.dot_dimension_numbers<[1], [0], [0], [1], [0, 0, 1, 1], [], []>} : vector<8x128xbf16>, vector<128x512xbf16>, vector<8x512xf32> -> vector<8x512xf32>
    %739 = arith.addf %735, %738 : vector<8x512xf32>
    %740 = vector.extract_strided_slice %739 {offsets = [0, 0], sizes = [8, 128], strides = [1, 1]} : vector<8x512xf32> to vector<8x128xf32>
    %741 = arith.negf %740 : vector<8x128xf32>
    %742 = math.exp %741 : vector<8x128xf32>
    %cst_223 = arith.constant 1.000000e+00 : f32
    %743 = vector.broadcast %cst_223 : f32 to vector<8x128xf32>
    %744 = arith.addf %743, %742 : vector<8x128xf32>
    %745 = arith.divf %743, %744 : vector<8x128xf32>
    %746 = vector.extract_strided_slice %739 {offsets = [0, 128], sizes = [8, 128], strides = [1, 1]} : vector<8x512xf32> to vector<8x128xf32>
    %747 = arith.negf %746 : vector<8x128xf32>
    %748 = math.exp %747 : vector<8x128xf32>
    %cst_224 = arith.constant 1.000000e+00 : f32
    %749 = vector.broadcast %cst_224 : f32 to vector<8x128xf32>
    %750 = arith.addf %749, %748 : vector<8x128xf32>
    %751 = arith.divf %749, %750 : vector<8x128xf32>
    %752 = vector.extract_strided_slice %739 {offsets = [0, 256], sizes = [8, 128], strides = [1, 1]} : vector<8x512xf32> to vector<8x128xf32>
    %753 = math.tanh %752 : vector<8x128xf32>
    %754 = vector.extract_strided_slice %739 {offsets = [0, 384], sizes = [8, 128], strides = [1, 1]} : vector<8x512xf32> to vector<8x128xf32>
    %755 = arith.negf %754 : vector<8x128xf32>
    %756 = math.exp %755 : vector<8x128xf32>
    %cst_225 = arith.constant 1.000000e+00 : f32
    %757 = vector.broadcast %cst_225 : f32 to vector<8x128xf32>
    %758 = arith.addf %757, %756 : vector<8x128xf32>
    %759 = arith.divf %757, %758 : vector<8x128xf32>
    %760 = arith.mulf %751, %729 : vector<8x128xf32>
    %761 = arith.mulf %745, %753 : vector<8x128xf32>
    %762 = arith.addf %760, %761 : vector<8x128xf32>
    %763 = math.tanh %762 : vector<8x128xf32>
    %764 = arith.mulf %759, %763 : vector<8x128xf32>
    %c5_i32_226 = arith.constant 5 : i32
    %c8_i32_227 = arith.constant 8 : i32
    %765 = arith.muli %c5_i32_226, %c8_i32_227 : i32
    %766 = tpu.assume_multiple %765, 8 : i32
    %767 = arith.index_cast %766 : i32 to index
    %c0_228 = arith.constant 0 : index
    %768 = vector.load %arg17[%767, %c0_228] : memref<64x512xf32, #tpu.memory_space<vmem>>, vector<8x512xf32>
    %769 = arith.truncf %764 : vector<8x128xf32> to vector<8x128xbf16>
    %c0_229 = arith.constant 0 : index
    %c0_230 = arith.constant 0 : index
    %770 = vector.load %arg8[%c0_229, %c0_230] : memref<128x512xbf16, #tpu.memory_space<vmem>>, vector<128x512xbf16>
    %cst_231 = arith.constant dense<0.000000e+00> : vector<8x512xf32>
    %771 = tpu.matmul %769, %770, %cst_231 {dimension_numbers = #tpu.dot_dimension_numbers<[1], [0], [0], [1], [0, 0, 1, 1], [], []>} : vector<8x128xbf16>, vector<128x512xbf16>, vector<8x512xf32> -> vector<8x512xf32>
    %772 = arith.addf %768, %771 : vector<8x512xf32>
    %773 = vector.extract_strided_slice %772 {offsets = [0, 0], sizes = [8, 128], strides = [1, 1]} : vector<8x512xf32> to vector<8x128xf32>
    %774 = arith.negf %773 : vector<8x128xf32>
    %775 = math.exp %774 : vector<8x128xf32>
    %cst_232 = arith.constant 1.000000e+00 : f32
    %776 = vector.broadcast %cst_232 : f32 to vector<8x128xf32>
    %777 = arith.addf %776, %775 : vector<8x128xf32>
    %778 = arith.divf %776, %777 : vector<8x128xf32>
    %779 = vector.extract_strided_slice %772 {offsets = [0, 128], sizes = [8, 128], strides = [1, 1]} : vector<8x512xf32> to vector<8x128xf32>
    %780 = arith.negf %779 : vector<8x128xf32>
    %781 = math.exp %780 : vector<8x128xf32>
    %cst_233 = arith.constant 1.000000e+00 : f32
    %782 = vector.broadcast %cst_233 : f32 to vector<8x128xf32>
    %783 = arith.addf %782, %781 : vector<8x128xf32>
    %784 = arith.divf %782, %783 : vector<8x128xf32>
    %785 = vector.extract_strided_slice %772 {offsets = [0, 256], sizes = [8, 128], strides = [1, 1]} : vector<8x512xf32> to vector<8x128xf32>
    %786 = math.tanh %785 : vector<8x128xf32>
    %787 = vector.extract_strided_slice %772 {offsets = [0, 384], sizes = [8, 128], strides = [1, 1]} : vector<8x512xf32> to vector<8x128xf32>
    %788 = arith.negf %787 : vector<8x128xf32>
    %789 = math.exp %788 : vector<8x128xf32>
    %cst_234 = arith.constant 1.000000e+00 : f32
    %790 = vector.broadcast %cst_234 : f32 to vector<8x128xf32>
    %791 = arith.addf %790, %789 : vector<8x128xf32>
    %792 = arith.divf %790, %791 : vector<8x128xf32>
    %793 = arith.mulf %784, %762 : vector<8x128xf32>
    %794 = arith.mulf %778, %786 : vector<8x128xf32>
    %795 = arith.addf %793, %794 : vector<8x128xf32>
    %796 = math.tanh %795 : vector<8x128xf32>
    %797 = arith.mulf %792, %796 : vector<8x128xf32>
    %c6_i32_235 = arith.constant 6 : i32
    %c8_i32_236 = arith.constant 8 : i32
    %798 = arith.muli %c6_i32_235, %c8_i32_236 : i32
    %799 = tpu.assume_multiple %798, 8 : i32
    %800 = arith.index_cast %799 : i32 to index
    %c0_237 = arith.constant 0 : index
    %801 = vector.load %arg17[%800, %c0_237] : memref<64x512xf32, #tpu.memory_space<vmem>>, vector<8x512xf32>
    %802 = arith.truncf %797 : vector<8x128xf32> to vector<8x128xbf16>
    %c0_238 = arith.constant 0 : index
    %c0_239 = arith.constant 0 : index
    %803 = vector.load %arg8[%c0_238, %c0_239] : memref<128x512xbf16, #tpu.memory_space<vmem>>, vector<128x512xbf16>
    %cst_240 = arith.constant dense<0.000000e+00> : vector<8x512xf32>
    %804 = tpu.matmul %802, %803, %cst_240 {dimension_numbers = #tpu.dot_dimension_numbers<[1], [0], [0], [1], [0, 0, 1, 1], [], []>} : vector<8x128xbf16>, vector<128x512xbf16>, vector<8x512xf32> -> vector<8x512xf32>
    %805 = arith.addf %801, %804 : vector<8x512xf32>
    %806 = vector.extract_strided_slice %805 {offsets = [0, 0], sizes = [8, 128], strides = [1, 1]} : vector<8x512xf32> to vector<8x128xf32>
    %807 = arith.negf %806 : vector<8x128xf32>
    %808 = math.exp %807 : vector<8x128xf32>
    %cst_241 = arith.constant 1.000000e+00 : f32
    %809 = vector.broadcast %cst_241 : f32 to vector<8x128xf32>
    %810 = arith.addf %809, %808 : vector<8x128xf32>
    %811 = arith.divf %809, %810 : vector<8x128xf32>
    %812 = vector.extract_strided_slice %805 {offsets = [0, 128], sizes = [8, 128], strides = [1, 1]} : vector<8x512xf32> to vector<8x128xf32>
    %813 = arith.negf %812 : vector<8x128xf32>
    %814 = math.exp %813 : vector<8x128xf32>
    %cst_242 = arith.constant 1.000000e+00 : f32
    %815 = vector.broadcast %cst_242 : f32 to vector<8x128xf32>
    %816 = arith.addf %815, %814 : vector<8x128xf32>
    %817 = arith.divf %815, %816 : vector<8x128xf32>
    %818 = vector.extract_strided_slice %805 {offsets = [0, 256], sizes = [8, 128], strides = [1, 1]} : vector<8x512xf32> to vector<8x128xf32>
    %819 = math.tanh %818 : vector<8x128xf32>
    %820 = vector.extract_strided_slice %805 {offsets = [0, 384], sizes = [8, 128], strides = [1, 1]} : vector<8x512xf32> to vector<8x128xf32>
    %821 = arith.negf %820 : vector<8x128xf32>
    %822 = math.exp %821 : vector<8x128xf32>
    %cst_243 = arith.constant 1.000000e+00 : f32
    %823 = vector.broadcast %cst_243 : f32 to vector<8x128xf32>
    %824 = arith.addf %823, %822 : vector<8x128xf32>
    %825 = arith.divf %823, %824 : vector<8x128xf32>
    %826 = arith.mulf %817, %795 : vector<8x128xf32>
    %827 = arith.mulf %811, %819 : vector<8x128xf32>
    %828 = arith.addf %826, %827 : vector<8x128xf32>
    %829 = math.tanh %828 : vector<8x128xf32>
    %830 = arith.mulf %825, %829 : vector<8x128xf32>
    %c7_i32_244 = arith.constant 7 : i32
    %c8_i32_245 = arith.constant 8 : i32
    %831 = arith.muli %c7_i32_244, %c8_i32_245 : i32
    %832 = tpu.assume_multiple %831, 8 : i32
    %833 = arith.index_cast %832 : i32 to index
    %c0_246 = arith.constant 0 : index
    %834 = vector.load %arg17[%833, %c0_246] : memref<64x512xf32, #tpu.memory_space<vmem>>, vector<8x512xf32>
    %835 = arith.truncf %830 : vector<8x128xf32> to vector<8x128xbf16>
    %c0_247 = arith.constant 0 : index
    %c0_248 = arith.constant 0 : index
    %836 = vector.load %arg8[%c0_247, %c0_248] : memref<128x512xbf16, #tpu.memory_space<vmem>>, vector<128x512xbf16>
    %cst_249 = arith.constant dense<0.000000e+00> : vector<8x512xf32>
    %837 = tpu.matmul %835, %836, %cst_249 {dimension_numbers = #tpu.dot_dimension_numbers<[1], [0], [0], [1], [0, 0, 1, 1], [], []>} : vector<8x128xbf16>, vector<128x512xbf16>, vector<8x512xf32> -> vector<8x512xf32>
    %838 = arith.addf %834, %837 : vector<8x512xf32>
    %839 = vector.extract_strided_slice %838 {offsets = [0, 0], sizes = [8, 128], strides = [1, 1]} : vector<8x512xf32> to vector<8x128xf32>
    %840 = arith.negf %839 : vector<8x128xf32>
    %841 = math.exp %840 : vector<8x128xf32>
    %cst_250 = arith.constant 1.000000e+00 : f32
    %842 = vector.broadcast %cst_250 : f32 to vector<8x128xf32>
    %843 = arith.addf %842, %841 : vector<8x128xf32>
    %844 = arith.divf %842, %843 : vector<8x128xf32>
    %845 = vector.extract_strided_slice %838 {offsets = [0, 128], sizes = [8, 128], strides = [1, 1]} : vector<8x512xf32> to vector<8x128xf32>
    %846 = arith.negf %845 : vector<8x128xf32>
    %847 = math.exp %846 : vector<8x128xf32>
    %cst_251 = arith.constant 1.000000e+00 : f32
    %848 = vector.broadcast %cst_251 : f32 to vector<8x128xf32>
    %849 = arith.addf %848, %847 : vector<8x128xf32>
    %850 = arith.divf %848, %849 : vector<8x128xf32>
    %851 = vector.extract_strided_slice %838 {offsets = [0, 256], sizes = [8, 128], strides = [1, 1]} : vector<8x512xf32> to vector<8x128xf32>
    %852 = math.tanh %851 : vector<8x128xf32>
    %853 = vector.extract_strided_slice %838 {offsets = [0, 384], sizes = [8, 128], strides = [1, 1]} : vector<8x512xf32> to vector<8x128xf32>
    %854 = arith.negf %853 : vector<8x128xf32>
    %855 = math.exp %854 : vector<8x128xf32>
    %cst_252 = arith.constant 1.000000e+00 : f32
    %856 = vector.broadcast %cst_252 : f32 to vector<8x128xf32>
    %857 = arith.addf %856, %855 : vector<8x128xf32>
    %858 = arith.divf %856, %857 : vector<8x128xf32>
    %859 = arith.mulf %850, %828 : vector<8x128xf32>
    %860 = arith.mulf %844, %852 : vector<8x128xf32>
    %861 = arith.addf %859, %860 : vector<8x128xf32>
    %862 = math.tanh %861 : vector<8x128xf32>
    %863 = arith.mulf %858, %862 : vector<8x128xf32>
    %c8_i32_253 = arith.constant 8 : i32
    %864 = arith.truncf %863 : vector<8x128xf32> to vector<8x128xbf16>
    %c0_254 = arith.constant 0 : index
    %c0_255 = arith.constant 0 : index
    %865 = vector.load %arg10[%c0_254, %c0_255] : memref<128x256xbf16, #tpu.memory_space<vmem>>, vector<128x256xbf16>
    %cst_256 = arith.constant dense<0.000000e+00> : vector<8x256xf32>
    %866 = tpu.matmul %864, %865, %cst_256 {dimension_numbers = #tpu.dot_dimension_numbers<[1], [0], [0], [1], [0, 0, 1, 1], [], []>} : vector<8x128xbf16>, vector<128x256xbf16>, vector<8x256xf32> -> vector<8x256xf32>
    %c0_257 = arith.constant 0 : index
    %c0_258 = arith.constant 0 : index
    %867 = vector.load %arg11[%c0_257, %c0_258] : memref<1x256xf32, #tpu.memory_space<vmem>>, vector<1x256xf32>
    %868 = vector.broadcast %867 : vector<1x256xf32> to vector<8x256xf32>
    %869 = arith.addf %866, %868 : vector<8x256xf32>
    %870 = math.tanh %869 : vector<8x256xf32>
    %871 = arith.truncf %870 : vector<8x256xf32> to vector<8x256xbf16>
    %c0_259 = arith.constant 0 : index
    %c0_260 = arith.constant 0 : index
    %872 = vector.load %arg12[%c0_259, %c0_260] : memref<256x128xbf16, #tpu.memory_space<vmem>>, vector<256x128xbf16>
    %cst_261 = arith.constant dense<0.000000e+00> : vector<8x128xf32>
    %873 = tpu.matmul %871, %872, %cst_261 {dimension_numbers = #tpu.dot_dimension_numbers<[1], [0], [0], [1], [0, 0, 1, 1], [], []>} : vector<8x256xbf16>, vector<256x128xbf16>, vector<8x128xf32> -> vector<8x128xf32>
    %c0_262 = arith.constant 0 : index
    %c0_263 = arith.constant 0 : index
    %874 = vector.load %arg13[%c0_262, %c0_263] : memref<1x128xf32, #tpu.memory_space<vmem>>, vector<1x128xf32>
    %875 = vector.broadcast %874 : vector<1x128xf32> to vector<8x128xf32>
    %876 = arith.addf %873, %875 : vector<8x128xf32>
    %877 = math.tanh %876 : vector<8x128xf32>
    %878 = arith.truncf %877 : vector<8x128xf32> to vector<8x128xbf16>
    %c0_264 = arith.constant 0 : index
    %c0_265 = arith.constant 0 : index
    %879 = vector.load %arg14[%c0_264, %c0_265] : memref<128x128xbf16, #tpu.memory_space<vmem>>, vector<128x128xbf16>
    %cst_266 = arith.constant dense<0.000000e+00> : vector<8x128xf32>
    %880 = tpu.matmul %878, %879, %cst_266 {dimension_numbers = #tpu.dot_dimension_numbers<[1], [0], [0], [1], [0, 0, 1, 1], [], []>} : vector<8x128xbf16>, vector<128x128xbf16>, vector<8x128xf32> -> vector<8x128xf32>
    %c0_267 = arith.constant 0 : index
    %c0_268 = arith.constant 0 : index
    %881 = vector.load %arg15[%c0_267, %c0_268] : memref<1x128xf32, #tpu.memory_space<vmem>>, vector<1x128xf32>
    %882 = vector.broadcast %881 : vector<1x128xf32> to vector<8x128xf32>
    %883 = arith.addf %880, %882 : vector<8x128xf32>
    %884 = arith.negf %883 : vector<8x128xf32>
    %885 = math.exp %884 : vector<8x128xf32>
    %cst_269 = arith.constant 1.000000e+00 : f32
    %886 = vector.broadcast %cst_269 : f32 to vector<8x128xf32>
    %887 = arith.addf %886, %885 : vector<8x128xf32>
    %888 = arith.divf %886, %887 : vector<8x128xf32>
    %c0_270 = arith.constant 0 : index
    %c0_271 = arith.constant 0 : index
    %889 = vector.load %arg16[%c0_270, %c0_271] : memref<8x128xf32, #tpu.memory_space<vmem>>, vector<8x128xf32>
    tpu.vector_store %arg16[%c0_270, %c0_271], %888 {strides = array<i32>} : memref<8x128xf32, #tpu.memory_space<vmem>>, vector<8x128xf32>,
    return
  }
}

</mosaic_0001>

<bundles_post_ra>
// kernel: model_forward.1
= control target key start
LH: loop header
LB: loop body
LE: loop exit
PB: predicated region body
PF: predicated region fallthrough
CT: control target
= control target key end

     0   :  { %s11765_s0 = inlined_call_operand.vmem [shape: bf16[64,128], index: 0, kind: input, shape index: {}]   ;;  %s11766_s1 = inlined_call_operand.hbm [shape: bf16[128,512], index: 1, kind: input, shape index: {}]   ;;  %s11767_s2 = inlined_call_operand.hbm [shape: bf16[128,512], index: 2, kind: input, shape index: {}]   ;;  %s11768_s3 = inlined_call_operand.vmem [shape: f32[1,512], index: 3, kind: input, shape index: {}]   ;;  %s11769_s4 = inlined_call_operand.hbm [shape: bf16[128,512], index: 4, kind: input, shape index: {}]   ;;  %s11770_s5 = inlined_call_operand.hbm [shape: bf16[128,512], index: 5, kind: input, shape index: {}]   ;;  %s11771_s6 = inlined_call_operand.vmem [shape: f32[1,512], index: 6, kind: input, shape index: {}]   ;;  %s11772_s7 = inlined_call_operand.hbm [shape: bf16[128,512], index: 7, kind: input, shape index: {}]   ;;  %s11773_s8 = inlined_call_operand.hbm [shape: bf16[128,512], index: 8, kind: input, shape index: {}]   ;;  %s11774_s9 = inlined_call_operand.vmem [shape: f32[1,512], index: 9, kind: input, shape index: {}]   ;;  %s11775_s10 = inlined_call_operand.vmem [shape: bf16[128,256], index: 10, kind: input, shape index: {}]   ;;  %s11776_s11 = inlined_call_operand.vmem [shape: f32[1,256], index: 11, kind: input, shape index: {}]   ;;  %s11777_s12 = inlined_call_operand.hbm [shape: bf16[256,128], index: 12, kind: input, shape index: {}]   ;;  %s11778_s13 = inlined_call_operand.vmem [shape: f32[1,128], index: 13, kind: input, shape index: {}]   ;;  %s11779_s14 = inlined_call_operand.hbm [shape: bf16[128,128], index: 14, kind: input, shape index: {}]   ;;  %s11780_s15 = inlined_call_operand.vmem [shape: f32[1,128], index: 15, kind: input, shape index: {}]   ;;  %s11781_s16 = inlined_call_operand.vmem [shape: f32[8,128], index: 16, kind: output, shape index: {}]  }
   0x1   :  { %11793 = sst [smem:[#allocation48_spill]] %s11765_s0 }
   0x2   :  { %21 = vsyncpa [#allocation5], 0 }
   0x3   :  { %22 = vsyncpa [#allocation7], 0 }
   0x4   :  { %23 = vsyncpa [#allocation10], 0 }
   0x5   :  { %24 = vsyncpa [#allocation13], 0 }
   0x6   :  { %25 = vsyncpa [#allocation16], 0  ;;  %s9869_s21 = smov [#allocation6]   ;;  %s9870_s23 = smov [#allocation9]  }
   0x7   :  { %s45_s22 = sshll.u32 %s9869_s21, 4  ;;  %s71_s24 = sshll.u32 %s9870_s23, 4  ;;  %s46_s22 = int_to_ptr.vmem [resolvable:$true] %s45_s22  ;;  %s72_s24 = int_to_ptr.vmem [resolvable:$true] %s71_s24 }
   0x8   :  { %s9707_s25 = scalar_lea.vmem %s46_s22, 4096  ;;  %p9712_p1 = scmp.lt.s32.totalorder %s46_s22, %s46_s22 }
   0x9   :  { %p9708_p0 = scmp.ne.s32.totalorder %s46_s22, %s9707_s25  ;;  %p9713_p2 = scmp.lt.s32.totalorder %s9707_s25, %s9707_s25 }
   0xb   :  { %p9714_p3 = por %p9713_p2, %p9712_p1 }
   0xd   :  { %p9715_p4 = pnand %p9714_p3, %p9708_p0 }
   0xf   :  { %9718 = shalt.err (!%p9715_p4)
}
  0x10   :  { %s9871_s26 = smov 256   ;;  %s9872_s27 = smov 16  }
  0x11   :  { %51 = dma.hbm_to_vmem [thread:$0]  %s11767_s2, 4096, %s46_s22, [#allocation7], %s9871_s26, %s9871_s26, %s9872_s27  }
  0x12   :  { %s9727_s30 = scalar_lea.vmem %s72_s24, 4096  ;;  %p9732_p6 = scmp.lt.s32.totalorder %s72_s24, %s72_s24 }
  0x13   :  { %p9728_p5 = scmp.ne.s32.totalorder %s72_s24, %s9727_s30  ;;  %p9733_p7 = scmp.lt.s32.totalorder %s9727_s30, %s9727_s30 }
  0x15   :  { %p9734_p8 = por %p9733_p7, %p9732_p6 }
  0x17   :  { %p9735_p9 = pnand %p9734_p8, %p9728_p5 }
  0x19   :  { %9738 = shalt.err (!%p9735_p9)
}
  0x1a   :  { %77 = dma.hbm_to_vmem [thread:$0]  %s11770_s5, 4096, %s72_s24, [#allocation10], %s9871_s26, %s9871_s26, %s9872_s27  }
  0x1b   :  { %s9873_s18 = smov [#allocation12]   ;;  %s9874_s20 = smov [#allocation4]  }
  0x1c   :  { %s97_s19 = sshll.u32 %s9873_s18, 4  ;;  %s33_s21 = sshll.u32 %s9874_s20, 4  ;;  %s98_s19 = int_to_ptr.vmem [resolvable:$true] %s97_s19  ;;  %s34_s21 = int_to_ptr.vmem [resolvable:$true] %s33_s21 }
  0x1d   :  { %s9747_s2 = scalar_lea.vmem %s98_s19, 4096  ;;  %p9752_p11 = scmp.lt.s32.totalorder %s98_s19, %s98_s19 }
  0x1e   :  { %p9748_p10 = scmp.ne.s32.totalorder %s98_s19, %s9747_s2  ;;  %p9753_p12 = scmp.lt.s32.totalorder %s9747_s2, %s9747_s2 }
  0x20   :  { %p9754_p13 = por %p9753_p12, %p9752_p11 }
  0x22   :  { %p9755_p0 = pnand %p9754_p13, %p9748_p10 }
  0x24   :  { %9758 = shalt.err (!%p9755_p0)
}
  0x25   :  { %103 = dma.hbm_to_vmem [thread:$0]  %s11773_s8, 4096, %s98_s19, [#allocation13], %s9871_s26, %s9871_s26, %s9872_s27  }
  0x26   :  { %s9767_s5 = scalar_lea.vmem %s34_s21, 4096  ;;  %p9772_p2 = scmp.lt.s32.totalorder %s34_s21, %s34_s21 }
  0x27   :  { %p9768_p1 = scmp.ne.s32.totalorder %s34_s21, %s9767_s5  ;;  %p9773_p3 = scmp.lt.s32.totalorder %s9767_s5, %s9767_s5 }
  0x29   :  { %p9774_p4 = por %p9773_p3, %p9772_p2 }
  0x2b   :  { %p9775_p5 = pnand %p9774_p4, %p9768_p1 }
  0x2d   :  { %9778 = shalt.err (!%p9775_p5)
}
  0x2e   :  { %39 = dma.hbm_to_vmem [thread:$0]  %s11766_s1, 4096, %s34_s21, [#allocation5], %s9871_s26, %s9871_s26, %s9872_s27  }
  0x2f   :  { %s9875_s28 = smov [#allocation8]   ;;  %s9876_s30 = smov [#allocation11]  }
  0x30   :  { %s59_s29 = sshll.u32 %s9875_s28, 4  ;;  %s85_s0 = sshll.u32 %s9876_s30, 4  ;;  %s60_s29 = int_to_ptr.vmem [resolvable:$true] %s59_s29  ;;  %s86_s0 = int_to_ptr.vmem [resolvable:$true] %s85_s0 }
  0x31   :  { %s9787_s8 = scalar_lea.vmem %s60_s29, 4096  ;;  %p9792_p7 = scmp.lt.s32.totalorder %s60_s29, %s60_s29 }
  0x32   :  { %p9788_p6 = scmp.ne.s32.totalorder %s60_s29, %s9787_s8  ;;  %p9793_p8 = scmp.lt.s32.totalorder %s9787_s8, %s9787_s8 }
  0x34   :  { %p9794_p9 = por %p9793_p8, %p9792_p7 }
  0x36   :  { %p9795_p10 = pnand %p9794_p9, %p9788_p6 }
  0x38   :  { %9798 = shalt.err (!%p9795_p10)
}
  0x39   :  { %65 = dma.hbm_to_vmem [thread:$0]  %s11769_s4, 4096, %s60_s29, [#allocation7], %s9871_s26, %s9871_s26, %s9872_s27  }
  0x3a   :  { %s9807_s1 = scalar_lea.vmem %s86_s0, 4096  ;;  %p9812_p12 = scmp.lt.s32.totalorder %s86_s0, %s86_s0 }
  0x3b   :  { %p9808_p11 = scmp.ne.s32.totalorder %s86_s0, %s9807_s1  ;;  %p9813_p13 = scmp.lt.s32.totalorder %s9807_s1, %s9807_s1 }
  0x3d   :  { %p9814_p0 = por %p9813_p13, %p9812_p12 }
  0x3f   :  { %p9815_p1 = pnand %p9814_p0, %p9808_p11 }
  0x41   :  { %9818 = shalt.err (!%p9815_p1)
}
  0x42   :  { %91 = dma.hbm_to_vmem [thread:$0]  %s11772_s7, 4096, %s86_s0, [#allocation10], %s9871_s26, %s9871_s26, %s9872_s27  }
  0x43   :  { %s9877_s21 = smov [#allocation14]  }
  0x44   :  { %s115_s2 = sshll.u32 %s9877_s21, 4  ;;  %s116_s2 = int_to_ptr.vmem [resolvable:$true] %s115_s2 }
  0x45   :  { %s9827_s22 = scalar_lea.vmem %s116_s2, 2048  ;;  %p9832_p3 = scmp.lt.s32.totalorder %s116_s2, %s116_s2 }
  0x46   :  { %p9828_p2 = scmp.ne.s32.totalorder %s116_s2, %s9827_s22  ;;  %p9833_p4 = scmp.lt.s32.totalorder %s9827_s22, %s9827_s22 }
  0x48   :  { %p9834_p5 = por %p9833_p4, %p9832_p3 }
  0x4a   :  { %p9835_p6 = pnand %p9834_p5, %p9828_p2 }
  0x4c   :  { %9838 = shalt.err (!%p9835_p6)
}
  0x4d   :  { %s9878_s4 = smov 64   ;;  %s9879_s23 = smov 4  }
  0x4e   :  { %121 = dma.hbm_to_vmem [thread:$0]  %s11777_s12, 2048, %s116_s2, [#allocation13], %s9878_s4, %s9878_s4, %s9879_s23  }
  0x4f   :  { %s9880_s25 = smov [#allocation15]  }
  0x50   :  { %s129_s28 = sshll.u32 %s9880_s25, 4  ;;  %s130_s28 = int_to_ptr.vmem [resolvable:$true] %s129_s28 }
  0x51   :  { %s9847_s7 = scalar_lea.vmem %s130_s28, 1024  ;;  %p9852_p8 = scmp.lt.s32.totalorder %s130_s28, %s130_s28 }
  0x52   :  { %p9848_p7 = scmp.ne.s32.totalorder %s130_s28, %s9847_s7  ;;  %p9853_p9 = scmp.lt.s32.totalorder %s9847_s7, %s9847_s7 }
  0x54   :  { %p9854_p10 = por %p9853_p9, %p9852_p8 }
  0x56   :  { %p9855_p11 = pnand %p9854_p10, %p9848_p7 }
  0x58   :  { %9858 = shalt.err (!%p9855_p11)
}
  0x59   :  { %135 = dma.hbm_to_vmem [thread:$0]  %s11779_s14, 1024, %s130_s28, [#allocation16], %s9878_s4, %s9878_s4, %s9879_s23  }
  0x5a   :  { %9859 = dma.done.wait [#allocation5], 4096  }
  0x5b   :  { %9860 = vsyncadd [#allocation5], 4294963200 }
  0x5c   :  { %9861 = dma.done.wait [#allocation7], 8192  }
  0x5d   :  { %9862 = vsyncadd [#allocation7], 4294959104 }
  0x5e   :  { %9863 = dma.done.wait [#allocation10], 8192  }
  0x5f   :  { %9864 = vsyncadd [#allocation10], 4294959104 }
  0x60   :  { %9865 = dma.done.wait [#allocation13], 6144  }
  0x61   :  { %9866 = vsyncadd [#allocation13], 4294961152 }
  0x62   :  { %9867 = dma.done.wait [#allocation16], 1024  }
  0x63   :  { %9868 = vsyncadd [#allocation16], 4294966272  ;;  %v11783_v0 = vmov 0   ;;  %v8803_v1 = vld [vmem:[#allocation4 + $0xe4] ss:$16 sps:$4 sm:$0xff]   ;;  %s11794_s29 = sld [smem:[#allocation48_spill]] }
  0x64   :  { %441 = vmatprep.mubr.bf16.mxu0 %v11783_v0  ;;  %514 = vmatprep.mubr.bf16.mxu1 %v11783_v0  ;;  %v8805_v2 = vld [vmem:[#allocation4 + $0xec] ss:$16 sps:$4 sm:$0xff]   ;;  %v8807_v3 = vld [vmem:[#allocation4 + $0xe0] ss:$16 sps:$4 sm:$0xff]   ;;  %v8808_v4 = vld [vmem:[#allocation4 + $0xe8] ss:$16 sps:$4 sm:$0xff]  }
  0x65   :  { %409 = vmatprep.subr.bf16.mxu0 %v8803_v1  ;;  %482 = vmatprep.subr.bf16.mxu1 %v8805_v2  ;;  %v8809_v5 = vld [vmem:[#allocation4 + $0xc4] ss:$16 sps:$4 sm:$0xff]   ;;  %v8811_v6 = vld [vmem:[#allocation4 + $0xcc] ss:$16 sps:$4 sm:$0xff]   ;;  %v8813_v7 = vld [vmem:[#allocation4 + $0xc0] ss:$16 sps:$4 sm:$0xff]  }
  0x66   :  { %410 = vmatpush1.bf16.msra.mxu0 %v8807_v3  ;;  %483 = vmatpush1.bf16.msra.mxu1 %v8808_v4  ;;  %v8814_v8 = vld [vmem:[#allocation4 + $0xc8] ss:$16 sps:$4 sm:$0xff]   ;;  %v8815_v9 = vld [vmem:[#allocation4 + $0xa4] ss:$16 sps:$4 sm:$0xff]   ;;  %v8817_v10 = vld [vmem:[#allocation4 + $0xac] ss:$16 sps:$4 sm:$0xff]  }
  0x67   :  { %411 = vmatprep.subr.bf16.mxu0 %v8809_v5  ;;  %484 = vmatprep.subr.bf16.mxu1 %v8811_v6  ;;  %v8819_v11 = vld [vmem:[#allocation4 + $0xa0] ss:$16 sps:$4 sm:$0xff]   ;;  %v8820_v12 = vld [vmem:[#allocation4 + $0xa8] ss:$16 sps:$4 sm:$0xff]   ;;  %v8821_v13 = vld [vmem:[#allocation4 + $0x84] ss:$16 sps:$4 sm:$0xff]   ;;  %v205_v6 = vlaneseq }
  0x68   :  { %v8823_v14 = vld [vmem:[#allocation4 + $0x8c] ss:$16 sps:$4 sm:$0xff]   ;;  %v8825_v15 = vld [vmem:[#allocation4 + $0x80] ss:$16 sps:$4 sm:$0xff]   ;;  %v8826_v16 = vld [vmem:[#allocation4 + $0x88] ss:$16 sps:$4 sm:$0xff]  }
  0x69   :  { %v8827_v17 = vld [vmem:[#allocation4 + $0x64] ss:$16 sps:$4 sm:$0xff]   ;;  %v8829_v18 = vld [vmem:[#allocation4 + $0x6c] ss:$16 sps:$4 sm:$0xff]   ;;  %v8831_v19 = vld [vmem:[#allocation4 + $0x60] ss:$16 sps:$4 sm:$0xff]  }
  0x6a   :  { %412 = vmatpush1.bf16.msra.mxu0 %v8813_v7  ;;  %485 = vmatpush1.bf16.msra.mxu1 %v8814_v8  ;;  %v8832_v20 = vld [vmem:[#allocation4 + $0x68] ss:$16 sps:$4 sm:$0xff]   ;;  %v8833_v21 = vld [vmem:[#allocation4 + $0x44] ss:$16 sps:$4 sm:$0xff]   ;;  %v8835_v22 = vld [vmem:[#allocation4 + $0x4c] ss:$16 sps:$4 sm:$0xff]  }
  0x6b   :  { %413 = vmatprep.subr.bf16.mxu0 %v8815_v9  ;;  %486 = vmatprep.subr.bf16.mxu1 %v8817_v10  ;;  %v8837_v23 = vld [vmem:[#allocation4 + $0x40] ss:$16 sps:$4 sm:$0xff]   ;;  %v8838_v24 = vld [vmem:[#allocation4 + $0x48] ss:$16 sps:$4 sm:$0xff]   ;;  %v8839_v25 = vld [vmem:[#allocation4 + $0x24] ss:$16 sps:$4 sm:$0xff]  }
  0x6c   :  { %v8841_v26 = vld [vmem:[#allocation4 + $0x2c] ss:$16 sps:$4 sm:$0xff]   ;;  %v8843_v27 = vld [vmem:[#allocation4 + $0x20] ss:$16 sps:$4 sm:$0xff]   ;;  %v8844_v28 = vld [vmem:[#allocation4 + $0x28] ss:$16 sps:$4 sm:$0xff]  }
  0x6d   :  { %v8845_v29 = vld [vmem:[#allocation4 + $0x4] ss:$16 sps:$4 sm:$0xff]   ;;  %v8847_v30 = vld [vmem:[#allocation4 + $0xc] ss:$16 sps:$4 sm:$0xff]   ;;  %v8849_v31 = vld [vmem:[#allocation4] ss:$16 sps:$4 sm:$0xff]  }
  0x6e   :  { %414 = vmatpush1.bf16.msra.mxu0 %v8819_v11  ;;  %487 = vmatpush1.bf16.msra.mxu1 %v8820_v12  ;;  %v8850_v32 = vld [vmem:[#allocation4 + $0x8] ss:$16 sps:$4 sm:$0xff]   ;;  %v10013_v33 = vld [vmem:[#allocation6 + $0xe4] ss:$16 sps:$4 sm:$0xff]   ;;  %v10015_v34 = vld [vmem:[#allocation6 + $0xec] ss:$16 sps:$4 sm:$0xff]  }
  0x6f   :  { %415 = vmatprep.subr.bf16.mxu0 %v8821_v13  ;;  %488 = vmatprep.subr.bf16.mxu1 %v8823_v14  ;;  %v8851_v35 = vld [vmem:[%s11794_s29] sm:$0xff]   ;;  %v10022_v37 = vld [vmem:[#allocation6 + $0xe8] ss:$16 sps:$4 sm:$0xff]   ;;  %v10028_v39 = vld [vmem:[#allocation6 + $0xcc] ss:$16 sps:$4 sm:$0xff]   ;;  %v206_v7 = vshrl.u32 %v205_v6, 7 }
  0x70   :  { %v10020_v36 = vld [vmem:[#allocation6 + $0xe0] ss:$16 sps:$4 sm:$0xff]   ;;  %v10026_v38 = vld [vmem:[#allocation6 + $0xc4] ss:$16 sps:$4 sm:$0xff]   ;;  %v10034_v41 = vld [vmem:[#allocation6 + $0xc8] ss:$16 sps:$4 sm:$0xff]  }
  0x71   :  { %v10030_v40 = vld [vmem:[#allocation6 + $0xc0] ss:$16 sps:$4 sm:$0xff]   ;;  %v10038_v42 = vld [vmem:[#allocation6 + $0xa4] ss:$16 sps:$4 sm:$0xff]   ;;  %v10040_v43 = vld [vmem:[#allocation6 + $0xac] ss:$16 sps:$4 sm:$0xff]  }
  0x72   :  { %416 = vmatpush1.bf16.msra.mxu0 %v8825_v15  ;;  %489 = vmatpush1.bf16.msra.mxu1 %v8826_v16  ;;  %v8864_v44 = vld [vmem:[%s11794_s29 + $0x8] sm:$0xff]   ;;  %v10047_v45 = vld [vmem:[#allocation6 + $0xa0] ss:$16 sps:$4 sm:$0xff]   ;;  %v10053_v47 = vld [vmem:[#allocation6 + $0x84] ss:$16 sps:$4 sm:$0xff]   ;;  %v10167_v8 = vsub.s32 2, %v206_v7 }
  0x73   :  { %417 = vmatprep.subr.bf16.mxu0 %v8827_v17  ;;  %490 = vmatprep.subr.bf16.mxu1 %v8829_v18  ;;  %v10049_v46 = vld [vmem:[#allocation6 + $0xa8] ss:$16 sps:$4 sm:$0xff]   ;;  %v10057_v48 = vld [vmem:[#allocation6 + $0x8c] ss:$16 sps:$4 sm:$0xff]   ;;  %v10059_v49 = vld [vmem:[#allocation6 + $0x80] ss:$16 sps:$4 sm:$0xff]  }
  0x74   :  { %v10061_v50 = vld [vmem:[#allocation6 + $0x88] ss:$16 sps:$4 sm:$0xff]   ;;  %v10065_v51 = vld [vmem:[#allocation6 + $0x64] ss:$16 sps:$4 sm:$0xff]   ;;  %v10069_v52 = vld [vmem:[#allocation6 + $0x6c] ss:$16 sps:$4 sm:$0xff]  }
  0x75   :  { %v8877_v53 = vld [vmem:[%s11794_s29 + $0x10] sm:$0xff]   ;;  %v10078_v55 = vld [vmem:[#allocation6 + $0x68] ss:$16 sps:$4 sm:$0xff]   ;;  %v10082_v57 = vld [vmem:[#allocation6 + $0x4c] ss:$16 sps:$4 sm:$0xff]   ;;  %11795 = vst [vmem:[#allocation22_spill] sm:$0xff] %v10167_v8 }
  0x76   :  { %418 = vmatpush1.bf16.msra.mxu0 %v8831_v19  ;;  %491 = vmatpush1.bf16.msra.mxu1 %v8832_v20  ;;  %v10076_v54 = vld [vmem:[#allocation6 + $0x60] ss:$16 sps:$4 sm:$0xff]   ;;  %v10080_v56 = vld [vmem:[#allocation6 + $0x44] ss:$16 sps:$4 sm:$0xff]   ;;  %v10090_v59 = vld [vmem:[#allocation6 + $0x48] ss:$16 sps:$4 sm:$0xff]  }
  0x77   :  { %419 = vmatprep.subr.bf16.mxu0 %v8833_v21  ;;  %492 = vmatprep.subr.bf16.mxu1 %v8835_v22  ;;  %v10088_v58 = vld [vmem:[#allocation6 + $0x40] ss:$16 sps:$4 sm:$0xff]   ;;  %v10092_v60 = vld [vmem:[#allocation6 + $0x24] ss:$16 sps:$4 sm:$0xff]   ;;  %v10094_v61 = vld [vmem:[#allocation6 + $0x2c] ss:$16 sps:$4 sm:$0xff]  }
  0x78   :  { %v8890_v62 = vld [vmem:[%s11794_s29 + $0x18] sm:$0xff]   ;;  %v10105_v63 = vld [vmem:[#allocation6 + $0x20] ss:$16 sps:$4 sm:$0xff]   ;;  %v10109_v2 = vld [vmem:[#allocation6 + $0x4] ss:$16 sps:$4 sm:$0xff]   ;;  %v10169_v9 = vsub.s32 0, %v206_v7 }
  0x79   :  { %v10107_v1 = vld [vmem:[#allocation6 + $0x28] ss:$16 sps:$4 sm:$0xff]   ;;  %v10111_v3 = vld [vmem:[#allocation6 + $0xc] ss:$16 sps:$4 sm:$0xff]   ;;  %v10117_v4 = vld [vmem:[#allocation6] ss:$16 sps:$4 sm:$0xff]  }
  0x7a   :  { %420 = vmatpush1.bf16.msra.mxu0 %v8837_v23  ;;  %493 = vmatpush1.bf16.msra.mxu1 %v8838_v24  ;;  %v10119_v5 = vld [vmem:[#allocation6 + $0x8] ss:$16 sps:$4 sm:$0xff]   ;;  %11796 = vst [vmem:[#allocation23_spill] sm:$0xff] %v10169_v9  ;;  %v203_v10 = vld [vmem:[%s11768_s3] sm:$0xf]  ;;  %v10182_v19 = vsub.s32 1, %v206_v7 }
  0x7b   :  { %421 = vmatprep.subr.bf16.mxu0 %v8839_v25  ;;  %494 = vmatprep.subr.bf16.mxu1 %v8841_v26  ;;  %v10177_v13 = vrot.slane %v203_v10, %v10167_v8  ;;  %v208_v16 = vrot.slane %v203_v10, %v10169_v9  ;;  %v10184_v20 = vsub.s32 3, %v206_v7  ;;  %vm9883_vm0 = vmmov 0  }
  0x7c   :  { %11797 = vst [vmem:[#allocation24_spill] sm:$0xff] %v10182_v19 }
  0x7d   :  { %11798 = vst [vmem:[#allocation25_spill] sm:$0xff] %v10184_v20 }
  0x7e   :  { %422 = vmatpush1.bf16.msra.mxu0 %v8843_v27  ;;  %495 = vmatpush1.bf16.msra.mxu1 %v8844_v28  ;;  %v10196_v27 = vrot.slane %v203_v10, %v10182_v19  ;;  %v10199_v28 = vrot.slane %v203_v10, %v10184_v20 }
  0x7f   :  { %423 = vmatprep.subr.bf16.mxu0 %v8845_v29  ;;  %496 = vmatprep.subr.bf16.mxu1 %v8847_v30 }
  0x82   :  { %424 = vmatpush1.bf16.msra.mxu0 %v8849_v31  ;;  %497 = vmatpush1.bf16.msra.mxu1 %v8850_v32 }
  0x83   :  { %786 = vmatprep.subr.bf16.mxu0 %v10013_v33  ;;  %827 = vmatprep.subr.bf16.mxu1 %v10015_v34 }
  0x85   :  { %442 = vmatmul.mubr.bf16.vlgmr.msra.gmra.mxu0 %v8851_v35  ;;  %515 = vmatmul.mubr.bf16.vlgmr.msra.gmra.mxu1 %v8851_v35 }
  0x86   :  { %787 = vmatpush1.bf16.msra.mxu0 %v10020_v36  ;;  %828 = vmatpush1.bf16.msra.mxu1 %v10022_v37 }
  0x87   :  { %788 = vmatprep.subr.bf16.mxu0 %v10026_v38  ;;  %829 = vmatprep.subr.bf16.mxu1 %v10028_v39 }
  0x88   :  { %451 = vmatprep.mubr.bf16.mxu0 %v11783_v0  ;;  %524 = vmatprep.mubr.bf16.mxu1 %v11783_v0 }
  0x8a   :  { %789 = vmatpush1.bf16.msra.mxu0 %v10030_v40  ;;  %830 = vmatpush1.bf16.msra.mxu1 %v10034_v41 }
  0x8b   :  { %790 = vmatprep.subr.bf16.mxu0 %v10038_v42  ;;  %831 = vmatprep.subr.bf16.mxu1 %v10040_v43 }
  0x8d   :  { %452 = vmatmul.mubr.bf16.gmra.mxu0 %v8864_v44  ;;  %525 = vmatmul.mubr.bf16.gmra.mxu1 %v8864_v44 }
  0x8e   :  { %791 = vmatpush1.bf16.msra.mxu0 %v10047_v45  ;;  %832 = vmatpush1.bf16.msra.mxu1 %v10049_v46 }
  0x8f   :  { %792 = vmatprep.subr.bf16.mxu0 %v10053_v47  ;;  %833 = vmatprep.subr.bf16.mxu1 %v10057_v48 }
  0x90   :  { %461 = vmatprep.mubr.bf16.mxu0 %v11783_v0  ;;  %534 = vmatprep.mubr.bf16.mxu1 %v11783_v0 }
  0x92   :  { %793 = vmatpush1.bf16.msra.mxu0 %v10059_v49  ;;  %834 = vmatpush1.bf16.msra.mxu1 %v10061_v50 }
  0x93   :  { %794 = vmatprep.subr.bf16.mxu0 %v10065_v51  ;;  %835 = vmatprep.subr.bf16.mxu1 %v10069_v52 }
  0x95   :  { %462 = vmatmul.mubr.bf16.gmra.mxu0 %v8877_v53  ;;  %535 = vmatmul.mubr.bf16.gmra.mxu1 %v8877_v53 }
  0x96   :  { %795 = vmatpush1.bf16.msra.mxu0 %v10076_v54  ;;  %836 = vmatpush1.bf16.msra.mxu1 %v10078_v55 }
  0x97   :  { %796 = vmatprep.subr.bf16.mxu0 %v10080_v56  ;;  %837 = vmatprep.subr.bf16.mxu1 %v10082_v57 }
  0x98   :  { %471 = vmatprep.mubr.bf16.mxu0 %v11783_v0  ;;  %544 = vmatprep.mubr.bf16.mxu1 %v11783_v0 }
  0x9a   :  { %797 = vmatpush1.bf16.msra.mxu0 %v10088_v58  ;;  %838 = vmatpush1.bf16.msra.mxu1 %v10090_v59 }
  0x9b   :  { %798 = vmatprep.subr.bf16.mxu0 %v10092_v60  ;;  %839 = vmatprep.subr.bf16.mxu1 %v10094_v61 }
  0x9d   :  { %472 = vmatmul.mubr.bf16.gmra.mxu0 %v8890_v62  ;;  %545 = vmatmul.mubr.bf16.gmra.mxu1 %v8890_v62 }
  0x9e   :  { %799 = vmatpush1.bf16.msra.mxu0 %v10105_v63  ;;  %840 = vmatpush1.bf16.msra.mxu1 %v10107_v1 }
  0x9f   :  { %800 = vmatprep.subr.bf16.mxu0 %v10109_v2  ;;  %841 = vmatprep.subr.bf16.mxu1 %v10111_v3 }
  0xa0   :  { %818 = vmatprep.mubr.bf16.mxu0 %v11783_v0  ;;  %859 = vmatprep.mubr.bf16.mxu1 %v11783_v0 }
  0xa2   :  { %801 = vmatpush1.bf16.msra.mxu0 %v10117_v4  ;;  %842 = vmatpush1.bf16.msra.mxu1 %v10119_v5 }
  0xa3   :  { %1097 = vmatprep.subr.bf16.mxu0 %v10013_v33  ;;  %1138 = vmatprep.subr.bf16.mxu1 %v10015_v34 }
  0xa5   :  { %819 = vmatmul.mubr.bf16.vlgmr.msra.gmra.mxu0 %v11783_v0  ;;  %860 = vmatmul.mubr.bf16.vlgmr.msra.gmra.mxu1 %v11783_v0 }
  0xa6   :  { %1098 = vmatpush1.bf16.msra.mxu0 %v10020_v36  ;;  %1139 = vmatpush1.bf16.msra.mxu1 %v10022_v37 }
  0xa7   :  { %1099 = vmatprep.subr.bf16.mxu0 %v10026_v38  ;;  %1140 = vmatprep.subr.bf16.mxu1 %v10028_v39 }
  0xa8   :  { %1129 = vmatprep.mubr.bf16.mxu0 %v11783_v0  ;;  %1170 = vmatprep.mubr.bf16.mxu1 %v11783_v0 }
  0xaa   :  { %1100 = vmatpush1.bf16.msra.mxu0 %v10030_v40  ;;  %1141 = vmatpush1.bf16.msra.mxu1 %v10034_v41 }
  0xab   :  { %1101 = vmatprep.subr.bf16.mxu0 %v10038_v42  ;;  %1142 = vmatprep.subr.bf16.mxu1 %v10040_v43 }
  0xae   :  { %1102 = vmatpush1.bf16.msra.mxu0 %v10047_v45  ;;  %1143 = vmatpush1.bf16.msra.mxu1 %v10049_v46 }
  0xaf   :  { %1103 = vmatprep.subr.bf16.mxu0 %v10053_v47  ;;  %1144 = vmatprep.subr.bf16.mxu1 %v10057_v48 }
  0xb2   :  { %1104 = vmatpush1.bf16.msra.mxu0 %v10059_v49  ;;  %1145 = vmatpush1.bf16.msra.mxu1 %v10061_v50 }
  0xb3   :  { %1105 = vmatprep.subr.bf16.mxu0 %v10065_v51  ;;  %1146 = vmatprep.subr.bf16.mxu1 %v10069_v52 }
  0xb6   :  { %1106 = vmatpush1.bf16.msra.mxu0 %v10076_v54  ;;  %1147 = vmatpush1.bf16.msra.mxu1 %v10078_v55 }
  0xb7   :  { %1107 = vmatprep.subr.bf16.mxu0 %v10080_v56  ;;  %1148 = vmatprep.subr.bf16.mxu1 %v10082_v57 }
  0xba   :  { %1108 = vmatpush1.bf16.msra.mxu0 %v10088_v58  ;;  %1149 = vmatpush1.bf16.msra.mxu1 %v10090_v59 }
  0xbb   :  { %1109 = vmatprep.subr.bf16.mxu0 %v10092_v60  ;;  %1150 = vmatprep.subr.bf16.mxu1 %v10094_v61 }
  0xbe   :  { %1110 = vmatpush1.bf16.msra.mxu0 %v10105_v63  ;;  %1151 = vmatpush1.bf16.msra.mxu1 %v10107_v1 }
  0xbf   :  { %1111 = vmatprep.subr.bf16.mxu0 %v10109_v2  ;;  %1152 = vmatprep.subr.bf16.mxu1 %v10111_v3 }
  0xc2   :  { %1112 = vmatpush1.bf16.msra.mxu0 %v10117_v4  ;;  %1153 = vmatpush1.bf16.msra.mxu1 %v10119_v5 }
  0xc3   :  { %1409 = vmatprep.subr.bf16.mxu0 %v10013_v33  ;;  %1450 = vmatprep.subr.bf16.mxu1 %v10015_v34 }
 0x145   :  { %v443_v11 = vpop.f32.mrf.mxu0  ;;  %v10174_v12 = vpop.f32.mrf.mxu1 }
 0x147   :  { %v445_v14 = vpop.f32.mrf.mxu0  ;;  %v10179_v15 = vpop.f32.mrf.mxu1 }
 0x149   :  { %v447_v17 = vpop.f32.mrf.mxu0  ;;  %v520_v18 = vpop.f32.mrf.mxu1 }
 0x14a   :  { %v10186_v21 = vadd.f32 %v447_v17, %v208_v16  ;;  %v10189_v22 = vadd.f32 %v520_v18, %v10177_v13 }
 0x14b   :  { %v10191_v23 = vpop.f32.mrf.mxu0  ;;  %v10193_v24 = vpop.f32.mrf.mxu1 }
 0x14d   :  { %v453_v25 = vpop.f32.mrf.mxu0  ;;  %v526_v26 = vpop.f32.mrf.mxu1 }
 0x14e   :  { %v10201_v29 = vadd.f32 %v453_v25, %v208_v16  ;;  %v10204_v30 = vadd.f32 %v526_v26, %v10177_v13 }
 0x14f   :  { %v455_v31 = vpop.f32.mrf.mxu0  ;;  %v528_v32 = vpop.f32.mrf.mxu1 }
 0x150   :  { %v10207_v33 = vadd.f32 %v455_v31, %v10196_v27  ;;  %v10210_v34 = vadd.f32 %v528_v32, %v10199_v28 }
 0x151   :  { %v457_v35 = vpop.f32.mrf.mxu0  ;;  %v530_v44 = vpop.f32.mrf.mxu1 }
 0x152   :  { %v10212_v53 = vadd.f32 %v457_v35, %v208_v16  ;;  %v10215_v62 = vadd.f32 %v530_v44, %v10177_v13 }
 0x153   :  { %v10217_v6 = vpop.f32.mrf.mxu0  ;;  %v10219_v7 = vpop.f32.mrf.mxu1 }
 0x154   :  { %11799 = vst [vmem:[#allocation26_spill] sm:$0xff] %v10215_v62  ;;  %11800 = vst [vmem:[#allocation27_spill] sm:$0xff] %v10219_v7 }
 0x155   :  { %v463_v10 = vpop.f32.mrf.mxu0  ;;  %v536_v17 = vpop.f32.mrf.mxu1 }
 0x156   :  { %v10221_v18 = vadd.f32 %v463_v10, %v208_v16  ;;  %v10224_v25 = vadd.f32 %v536_v17, %v10177_v13 }
 0x157   :  { %v465_v26 = vpop.f32.mrf.mxu0  ;;  %v538_v31 = vpop.f32.mrf.mxu1 }
 0x158   :  { %11801 = vst [vmem:[#allocation28_spill] sm:$0xff] %v10221_v18  ;;  %11802 = vst [vmem:[#allocation29_spill] sm:$0xff] %v10224_v25  ;;  %v10227_v32 = vadd.f32 %v465_v26, %v10196_v27  ;;  %v10230_v35 = vadd.f32 %v538_v31, %v10199_v28 }
 0x159   :  { %v467_v44 = vpop.f32.mrf.mxu0  ;;  %v540_v0 = vpop.f32.mrf.mxu1 }
 0x15a   :  { %11803 = vst [vmem:[#allocation30_spill] sm:$0xff] %v10227_v32  ;;  %11804 = vst [vmem:[#allocation31_spill] sm:$0xff] %v10230_v35  ;;  %v10232_v8 = vadd.f32 %v467_v44, %v208_v16  ;;  %v10235_v20 = vadd.f32 %v540_v0, %v10177_v13 }
 0x15b   :  { %v10237_v10 = vpop.f32.mrf.mxu0  ;;  %v10239_v19 = vpop.f32.mrf.mxu1 }
 0x15c   :  { %11805 = vst [vmem:[#allocation32_spill] sm:$0xff] %v10232_v8  ;;  %11806 = vst [vmem:[#allocation33_spill] sm:$0xff] %v10235_v20 }
 0x15d   :  { %11807 = vst [vmem:[#allocation34_spill] sm:$0xff] %v10237_v10  ;;  %11808 = vst [vmem:[#allocation35_spill] sm:$0xff] %v10239_v19  ;;  %v473_v17 = vpop.f32.mrf.mxu0  ;;  %v546_v9 = vpop.f32.mrf.mxu1 }
 0x15e   :  { %v10241_v25 = vadd.f32 %v473_v17, %v208_v16  ;;  %v10244_v26 = vadd.f32 %v546_v9, %v10177_v13  ;;  %v444_v9 = vadd.f32 %v443_v11, %v208_v16 }
 0x15f   :  { %v475_v31 = vpop.f32.mrf.mxu0  ;;  %v548_v35 = vpop.f32.mrf.mxu1 }
 0x160   :  { %11809 = vst [vmem:[#allocation36_spill] sm:$0xff] %v10241_v25  ;;  %11810 = vst [vmem:[#allocation37_spill] sm:$0xff] %v10244_v26  ;;  %v10247_v32 = vadd.f32 %v475_v31, %v10196_v27  ;;  %v10250_v44 = vadd.f32 %v548_v35, %v10199_v28  ;;  %v446_v31 = vadd.f32 %v445_v14, %v10196_v27 }
 0x161   :  { %v477_v0 = vpop.f32.mrf.mxu0  ;;  %v550_v20 = vpop.f32.mrf.mxu1 }
 0x162   :  { %11811 = vst [vmem:[#allocation38_spill] sm:$0xff] %v10247_v32  ;;  %11812 = vst [vmem:[#allocation39_spill] sm:$0xff] %v10250_v44  ;;  %v10252_v8 = vadd.f32 %v477_v0, %v208_v16  ;;  %v10255_v19 = vadd.f32 %v550_v20, %v10177_v13  ;;  %v517_v16 = vadd.f32 %v10174_v12, %v10177_v13 }
 0x163   :  { %v10257_v17 = vpop.f32.mrf.mxu0  ;;  %v10259_v25 = vpop.f32.mrf.mxu1 }
 0x164   :  { %11813 = vst [vmem:[#allocation40_spill] sm:$0xff] %v10252_v8  ;;  %11814 = vst [vmem:[#allocation41_spill] sm:$0xff] %v10255_v19 }
 0x165   :  { %11815 = vst [vmem:[#allocation42_spill] sm:$0xff] %v10257_v17  ;;  %11816 = vst [vmem:[#allocation43_spill] sm:$0xff] %v10259_v25  ;;  %v820_v26 = vpop.f32.mrf.mxu0  ;;  %v861_v10 = vpop.f32.mrf.mxu1  ;;  %v519_v25 = vadd.f32 %v10179_v15, %v10199_v28 }
 0x166   :  { %v868_v32 = vadd.f32 %v820_v26, %v444_v9  ;;  %v870_v9 = vadd.f32 %v861_v10, %v517_v16 }
 0x167   :  { %v822_v18 = vpop.f32.mrf.mxu0  ;;  %v863_v35 = vpop.f32.mrf.mxu1 }
 0x168   :  { %v8038_v44 = vmul.f32 -1.442695, %v868_v32  ;;  %v869_v62 = vadd.f32 %v822_v18, %v446_v31  ;;  %v871_v11 = vadd.f32 %v863_v35, %v519_v25 }
 0x169   :  { %v824_v7 = vpop.f32.mrf.mxu0  ;;  %v865_v0 = vpop.f32.mrf.mxu1 }
 0x16a   :  { %9247 = vpow2.f32 %v8038_v44  ;;  %v8039_v8 = vmul.f32 -1.442695, %v869_v62  ;;  %v8040_v14 = vmul.f32 -1.442695, %v871_v11 }
 0x16b   :  { %v825_v20 = vpop.f32.mrf.mxu0  ;;  %v866_v19 = vpop.f32.mrf.mxu1 }
 0x16c   :  { %9249 = vpow2.f32 %v8039_v8 }
 0x16d   :  { %9251 = vpow2.f32 %v8040_v14 }
 0x177   :  { %v9248_v26 = vpop.eup %9247 }
 0x178   :  { %v875_v17 = vadd.f32 1.0, %v9248_v26 }
 0x179   :  { %v9250_v32 = vpop.eup %9249 }
 0x17a   :  { %9253 = vrcp.f32 %v875_v17  ;;  %v881_v7 = vadd.f32 1.0, %v9250_v32  ;;  %v9252_v62 = vpop.eup %9251  ;;  %v11817_v17 = vmov 0   ;;  %v9643_v32 = vld [vmem:[#allocation6 + $0xe0] ss:$16 sps:$4 sm:$0xff]  }
 0x17b   :  { %9255 = vtanh.f32 %v870_v9  ;;  %v888_v44 = vadd.f32 1.0, %v9252_v62  ;;  %v9645_v62 = vld [vmem:[#allocation6 + $0xc4] ss:$16 sps:$4 sm:$0xff]  }
 0x17c   :  { %9257 = vrcp.f32 %v881_v7  ;;  %v9644_v7 = vld [vmem:[#allocation6 + $0xe8] ss:$16 sps:$4 sm:$0xff]  }
 0x17d   :  { %9259 = vrcp.f32 %v888_v44  ;;  %v9649_v44 = vld [vmem:[#allocation6 + $0xa4] ss:$16 sps:$4 sm:$0xff]  }
 0x187   :  { %v9254_v19 = vpop.eup %9253 }
 0x188   :  { %v9256_v8 = vpop.eup %9255 }
 0x189   :  { %v9258_v18 = vpop.eup %9257  ;;  %v892_v25 = vmul.f32 %v9256_v8, %v9254_v19  ;;  %v9646_v19 = vld [vmem:[#allocation6 + $0xcc] ss:$16 sps:$4 sm:$0xff]   ;;  %v9647_v8 = vld [vmem:[#allocation6 + $0xc0] ss:$16 sps:$4 sm:$0xff]  }
 0x18a   :  { %v891_v15 = vmul.f32 0.0, %v9258_v18  ;;  %v9260_v12 = vpop.eup %9259  ;;  %v9648_v18 = vld [vmem:[#allocation6 + $0xc8] ss:$16 sps:$4 sm:$0xff]  }
 0x18c   :  { %v10266_v31 = vadd.f32 %v892_v25, %v891_v15  ;;  %v9650_v15 = vld [vmem:[#allocation6 + $0xac] ss:$16 sps:$4 sm:$0xff]   ;;  %v9651_v25 = vld [vmem:[#allocation6 + $0xa0] ss:$16 sps:$4 sm:$0xff]  }
 0x18e   :  { %9261 = vtanh.f32 %v10266_v31 }
 0x19b   :  { %v9262_v13 = vpop.eup %9261 }
 0x19c   :  { %v895_v10 = vmul.f32 %v9262_v13, %v9260_v12  ;;  %v9653_v12 = vld [vmem:[#allocation6 + $0x84] ss:$16 sps:$4 sm:$0xff]   ;;  %v9654_v13 = vld [vmem:[#allocation6 + $0x8c] ss:$16 sps:$4 sm:$0xff]  }
 0x19e   :  { %v896_v35 = vpack.c.bf16 %v895_v10, %v895_v10  ;;  %v9655_v10 = vld [vmem:[#allocation6 + $0x80] ss:$16 sps:$4 sm:$0xff]  }
 0x1a0   :  { %897 = vst [vmem:[#allocation3] sm:$0xf] %v896_v35  ;;  %1130 = vmatmul.mubr.bf16.vlgmr.msra.gmra.mxu0 %v896_v35  ;;  %1171 = vmatmul.mubr.bf16.vlgmr.msra.gmra.mxu1 %v896_v35  ;;  %v9656_v35 = vld [vmem:[#allocation6 + $0x88] ss:$16 sps:$4 sm:$0xff]  }
 0x1a1   :  { %1410 = vmatpush1.bf16.msra.mxu0 %v10020_v36  ;;  %1451 = vmatpush1.bf16.msra.mxu1 %v10022_v37  ;;  %v9641_v36 = vld [vmem:[#allocation6 + $0xe4] ss:$16 sps:$4 sm:$0xff]   ;;  %v9642_v37 = vld [vmem:[#allocation6 + $0xec] ss:$16 sps:$4 sm:$0xff]  }
 0x1a2   :  { %1411 = vmatprep.subr.bf16.mxu0 %v10026_v38  ;;  %1452 = vmatprep.subr.bf16.mxu1 %v10028_v39 }
 0x1a3   :  { %1441 = vmatprep.mubr.bf16.mxu0 %v11817_v17  ;;  %1482 = vmatprep.mubr.bf16.mxu1 %v11817_v17 }
 0x1a5   :  { %1412 = vmatpush1.bf16.msra.mxu0 %v10030_v40  ;;  %1453 = vmatpush1.bf16.msra.mxu1 %v10034_v41  ;;  %v450_v40 = vadd.f32 %v10191_v23, %v10196_v27 }
 0x1a6   :  { %1413 = vmatprep.subr.bf16.mxu0 %v10038_v42  ;;  %1454 = vmatprep.subr.bf16.mxu1 %v10040_v43 }
 0x1a9   :  { %1414 = vmatpush1.bf16.msra.mxu0 %v10047_v45  ;;  %1455 = vmatpush1.bf16.msra.mxu1 %v10049_v46 }
 0x1aa   :  { %1415 = vmatprep.subr.bf16.mxu0 %v10053_v47  ;;  %1456 = vmatprep.subr.bf16.mxu1 %v10057_v48 }
 0x1ad   :  { %1416 = vmatpush1.bf16.msra.mxu0 %v10059_v49  ;;  %1457 = vmatpush1.bf16.msra.mxu1 %v10061_v50 }
 0x1ae   :  { %1417 = vmatprep.subr.bf16.mxu0 %v10065_v51  ;;  %1458 = vmatprep.subr.bf16.mxu1 %v10069_v52  ;;  %v523_v52 = vadd.f32 %v10193_v24, %v10199_v28 }
 0x1b1   :  { %1418 = vmatpush1.bf16.msra.mxu0 %v10076_v54  ;;  %1459 = vmatpush1.bf16.msra.mxu1 %v10078_v55 }
 0x1b2   :  { %1419 = vmatprep.subr.bf16.mxu0 %v10080_v56  ;;  %1460 = vmatprep.subr.bf16.mxu1 %v10082_v57 }
 0x1b5   :  { %1420 = vmatpush1.bf16.msra.mxu0 %v10088_v58  ;;  %1461 = vmatpush1.bf16.msra.mxu1 %v10090_v59 }
 0x1b6   :  { %1421 = vmatprep.subr.bf16.mxu0 %v10092_v60  ;;  %1462 = vmatprep.subr.bf16.mxu1 %v10094_v61 }
 0x1b9   :  { %1422 = vmatpush1.bf16.msra.mxu0 %v10105_v63  ;;  %1463 = vmatpush1.bf16.msra.mxu1 %v10107_v1 }
 0x1ba   :  { %1423 = vmatprep.subr.bf16.mxu0 %v10109_v2  ;;  %1464 = vmatprep.subr.bf16.mxu1 %v10111_v3 }
 0x1bd   :  { %1424 = vmatpush1.bf16.msra.mxu0 %v10117_v4  ;;  %1465 = vmatpush1.bf16.msra.mxu1 %v10119_v5 }
 0x1be   :  { %1721 = vmatprep.subr.bf16.mxu0 %v9641_v36  ;;  %1762 = vmatprep.subr.bf16.mxu1 %v9642_v37  ;;  %v9657_v36 = vld [vmem:[#allocation6 + $0x64] ss:$16 sps:$4 sm:$0xff]   ;;  %v9658_v37 = vld [vmem:[#allocation6 + $0x6c] ss:$16 sps:$4 sm:$0xff]  }
 0x260   :  { %v1131_v38 = vpop.f32.mrf.mxu0  ;;  %v1172_v39 = vpop.f32.mrf.mxu1 }
 0x261   :  { %v1179_v41 = vadd.f32 %v1131_v38, %v10186_v21  ;;  %v1181_v55 = vadd.f32 %v1172_v39, %v10189_v22  ;;  %v9659_v38 = vld [vmem:[#allocation6 + $0x60] ss:$16 sps:$4 sm:$0xff]   ;;  %v9660_v39 = vld [vmem:[#allocation6 + $0x68] ss:$16 sps:$4 sm:$0xff]  }
 0x262   :  { %v1133_v42 = vpop.f32.mrf.mxu0  ;;  %v1174_v43 = vpop.f32.mrf.mxu1 }
 0x263   :  { %v8073_v45 = vmul.f32 -1.442695, %v1179_v41  ;;  %v1180_v46 = vadd.f32 %v1133_v42, %v450_v40  ;;  %v1182_v54 = vadd.f32 %v1174_v43, %v523_v52  ;;  %v9661_v40 = vld [vmem:[#allocation6 + $0x44] ss:$16 sps:$4 sm:$0xff]   ;;  %v9662_v41 = vld [vmem:[#allocation6 + $0x4c] ss:$16 sps:$4 sm:$0xff]  }
 0x264   :  { %v1135_v47 = vpop.f32.mrf.mxu0  ;;  %v1176_v48 = vpop.f32.mrf.mxu1  ;;  %v9663_v42 = vld [vmem:[#allocation6 + $0x40] ss:$16 sps:$4 sm:$0xff]   ;;  %v9664_v43 = vld [vmem:[#allocation6 + $0x48] ss:$16 sps:$4 sm:$0xff]  }
 0x265   :  { %9263 = vpow2.f32 %v8073_v45  ;;  %v8074_v49 = vmul.f32 -1.442695, %v1180_v46  ;;  %v8075_v56 = vmul.f32 -1.442695, %v1182_v54  ;;  %v9665_v45 = vld [vmem:[#allocation6 + $0x24] ss:$16 sps:$4 sm:$0xff]  }
 0x266   :  { %v1136_v50 = vpop.f32.mrf.mxu0  ;;  %v1177_v51 = vpop.f32.mrf.mxu1  ;;  %v9666_v46 = vld [vmem:[#allocation6 + $0x2c] ss:$16 sps:$4 sm:$0xff]  }
 0x267   :  { %9265 = vpow2.f32 %v8074_v49 }
 0x268   :  { %9267 = vtanh.f32 %v1181_v55 }
 0x269   :  { %9269 = vpow2.f32 %v8075_v56 }
 0x272   :  { %v9264_v57 = vpop.eup %9263 }
 0x273   :  { %v1186_v58 = vadd.f32 1.0, %v9264_v57 }
 0x274   :  { %v9266_v59 = vpop.eup %9265 }
 0x275   :  { %9271 = vrcp.f32 %v1186_v58  ;;  %v1192_v60 = vadd.f32 1.0, %v9266_v59  ;;  %v9268_v61 = vpop.eup %9267 }
 0x276   :  { %v9270_v21 = vpop.eup %9269 }
 0x277   :  { %9273 = vrcp.f32 %v1192_v60  ;;  %v1199_v11 = vadd.f32 1.0, %v9270_v21 }
 0x279   :  { %9275 = vrcp.f32 %v1199_v11 }
 0x282   :  { %v9272_v23 = vpop.eup %9271 }
 0x283   :  { %v1203_v0 = vmul.f32 %v9272_v23, %v9268_v61 }
 0x284   :  { %v9274_v20 = vpop.eup %9273 }
 0x285   :  { %v1202_v24 = vmul.f32 %v9274_v20, %v10266_v31  ;;  %v9652_v31 = vld [vmem:[#allocation6 + $0xa8] ss:$16 sps:$4 sm:$0xff]  }
 0x286   :  { %v9276_v22 = vpop.eup %9275 }
 0x287   :  { %v10308_v16 = vadd.f32 %v1203_v0, %v1202_v24 }
 0x289   :  { %9277 = vtanh.f32 %v10308_v16 }
 0x296   :  { %v9278_v14 = vpop.eup %9277 }
 0x297   :  { %v1206_v26 = vmul.f32 %v9278_v14, %v9276_v22  ;;  %v10329_v14 = vld [vmem:[#allocation6 + $0xe4] ss:$16 sps:$4 sm:$0xff]  }
 0x299   :  { %v1207_v9 = vpack.c.bf16 %v1206_v26, %v1206_v26  ;;  %v10331_v26 = vld [vmem:[#allocation6 + $0xec] ss:$16 sps:$4 sm:$0xff]  }
 0x29b   :  { %1209 = vst [vmem:[#allocation3 + $0x4] sm:$0xf] %v1207_v9  ;;  %1442 = vmatmul.mubr.bf16.vlgmr.msra.gmra.mxu0 %v1207_v9  ;;  %1483 = vmatmul.mubr.bf16.vlgmr.msra.gmra.mxu1 %v1207_v9  ;;  %v10335_v9 = vld [vmem:[#allocation6 + $0xe8] ss:$16 sps:$4 sm:$0xff]  }
 0x29c   :  { %1722 = vmatpush1.bf16.msra.mxu0 %v9643_v32  ;;  %1763 = vmatpush1.bf16.msra.mxu1 %v9644_v7  ;;  %v10341_v32 = vld [vmem:[#allocation6 + $0xc4] ss:$16 sps:$4 sm:$0xff]   ;;  %v10343_v7 = vld [vmem:[#allocation6 + $0xcc] ss:$16 sps:$4 sm:$0xff]  }
 0x29d   :  { %1723 = vmatprep.subr.bf16.mxu0 %v9645_v62  ;;  %1764 = vmatprep.subr.bf16.mxu1 %v9646_v19  ;;  %v10345_v62 = vld [vmem:[#allocation6 + $0xc0] ss:$16 sps:$4 sm:$0xff]   ;;  %v10347_v19 = vld [vmem:[#allocation6 + $0xc8] ss:$16 sps:$4 sm:$0xff]  }
 0x29e   :  { %1753 = vmatprep.mubr.bf16.mxu0 %v11817_v17  ;;  %1794 = vmatprep.mubr.bf16.mxu1 %v11817_v17 }
 0x2a0   :  { %1724 = vmatpush1.bf16.msra.mxu0 %v9647_v8  ;;  %1765 = vmatpush1.bf16.msra.mxu1 %v9648_v18  ;;  %v10353_v8 = vld [vmem:[#allocation6 + $0xa4] ss:$16 sps:$4 sm:$0xff]   ;;  %v10355_v18 = vld [vmem:[#allocation6 + $0xac] ss:$16 sps:$4 sm:$0xff]  }
 0x2a1   :  { %1725 = vmatprep.subr.bf16.mxu0 %v9649_v44  ;;  %1766 = vmatprep.subr.bf16.mxu1 %v9650_v15  ;;  %v10357_v44 = vld [vmem:[#allocation6 + $0xa0] ss:$16 sps:$4 sm:$0xff]   ;;  %v10359_v15 = vld [vmem:[#allocation6 + $0xa8] ss:$16 sps:$4 sm:$0xff]  }
 0x2a4   :  { %1726 = vmatpush1.bf16.msra.mxu0 %v9651_v25  ;;  %1767 = vmatpush1.bf16.msra.mxu1 %v9652_v31  ;;  %v10365_v25 = vld [vmem:[#allocation6 + $0x84] ss:$16 sps:$4 sm:$0xff]   ;;  %v10367_v31 = vld [vmem:[#allocation6 + $0x8c] ss:$16 sps:$4 sm:$0xff]  }
 0x2a5   :  { %1727 = vmatprep.subr.bf16.mxu0 %v9653_v12  ;;  %1768 = vmatprep.subr.bf16.mxu1 %v9654_v13  ;;  %v10369_v12 = vld [vmem:[#allocation6 + $0x80] ss:$16 sps:$4 sm:$0xff]   ;;  %v10371_v13 = vld [vmem:[#allocation6 + $0x88] ss:$16 sps:$4 sm:$0xff]  }
 0x2a8   :  { %1728 = vmatpush1.bf16.msra.mxu0 %v9655_v10  ;;  %1769 = vmatpush1.bf16.msra.mxu1 %v9656_v35  ;;  %v10375_v10 = vld [vmem:[#allocation6 + $0x64] ss:$16 sps:$4 sm:$0xff]   ;;  %v10377_v35 = vld [vmem:[#allocation6 + $0x6c] ss:$16 sps:$4 sm:$0xff]  }
 0x2a9   :  { %1729 = vmatprep.subr.bf16.mxu0 %v9657_v36  ;;  %1770 = vmatprep.subr.bf16.mxu1 %v9658_v37  ;;  %v10381_v36 = vld [vmem:[#allocation6 + $0x60] ss:$16 sps:$4 sm:$0xff]   ;;  %v10383_v37 = vld [vmem:[#allocation6 + $0x68] ss:$16 sps:$4 sm:$0xff]  }
 0x2ac   :  { %1730 = vmatpush1.bf16.msra.mxu0 %v9659_v38  ;;  %1771 = vmatpush1.bf16.msra.mxu1 %v9660_v39  ;;  %v10387_v38 = vld [vmem:[#allocation6 + $0x44] ss:$16 sps:$4 sm:$0xff]   ;;  %v10389_v39 = vld [vmem:[#allocation6 + $0x4c] ss:$16 sps:$4 sm:$0xff]  }
 0x2ad   :  { %1731 = vmatprep.subr.bf16.mxu0 %v9661_v40  ;;  %1772 = vmatprep.subr.bf16.mxu1 %v9662_v41  ;;  %v10393_v40 = vld [vmem:[#allocation6 + $0x40] ss:$16 sps:$4 sm:$0xff]   ;;  %v10395_v41 = vld [vmem:[#allocation6 + $0x48] ss:$16 sps:$4 sm:$0xff]  }
 0x2b0   :  { %1732 = vmatpush1.bf16.msra.mxu0 %v9663_v42  ;;  %1773 = vmatpush1.bf16.msra.mxu1 %v9664_v43  ;;  %v10399_v42 = vld [vmem:[#allocation6 + $0x24] ss:$16 sps:$4 sm:$0xff]   ;;  %v10401_v43 = vld [vmem:[#allocation6 + $0x2c] ss:$16 sps:$4 sm:$0xff]  }
 0x2b1   :  { %1733 = vmatprep.subr.bf16.mxu0 %v9665_v45  ;;  %1774 = vmatprep.subr.bf16.mxu1 %v9666_v46  ;;  %v10405_v45 = vld [vmem:[#allocation6 + $0x20] ss:$16 sps:$4 sm:$0xff]   ;;  %v10407_v46 = vld [vmem:[#allocation6 + $0x28] ss:$16 sps:$4 sm:$0xff]  }
 0x2b4   :  { %1734 = vmatpush1.bf16.msra.mxu0 %v10105_v63  ;;  %1775 = vmatpush1.bf16.msra.mxu1 %v10107_v1 }
 0x2b5   :  { %1735 = vmatprep.subr.bf16.mxu0 %v10109_v2  ;;  %1776 = vmatprep.subr.bf16.mxu1 %v10111_v3 }
 0x2b8   :  { %1736 = vmatpush1.bf16.msra.mxu0 %v10117_v4  ;;  %1777 = vmatpush1.bf16.msra.mxu1 %v10119_v5 }
 0x2b9   :  { %2033 = vmatprep.subr.bf16.mxu0 %v10329_v14  ;;  %2074 = vmatprep.subr.bf16.mxu1 %v10331_v26 }
 0x35b   :  { %v1443_v47 = vpop.f32.mrf.mxu0  ;;  %v1484_v48 = vpop.f32.mrf.mxu1 }
 0x35c   :  { %v1491_v49 = vadd.f32 %v1443_v47, %v10201_v29  ;;  %v1493_v4 = vadd.f32 %v1484_v48, %v10204_v30  ;;  %v10411_v47 = vld [vmem:[#allocation6 + $0x4] ss:$16 sps:$4 sm:$0xff]   ;;  %v10413_v48 = vld [vmem:[#allocation6 + $0xc] ss:$16 sps:$4 sm:$0xff]  }
 0x35d   :  { %v1445_v50 = vpop.f32.mrf.mxu0  ;;  %v1486_v51 = vpop.f32.mrf.mxu1 }
 0x35e   :  { %v8108_v52 = vmul.f32 -1.442695, %v1491_v49  ;;  %v1492_v54 = vadd.f32 %v1445_v50, %v10207_v33  ;;  %v1494_v3 = vadd.f32 %v1486_v51, %v10210_v34  ;;  %v10417_v49 = vld [vmem:[#allocation6] ss:$16 sps:$4 sm:$0xff]   ;;  %v10419_v50 = vld [vmem:[#allocation6 + $0x8] ss:$16 sps:$4 sm:$0xff]  }
 0x35f   :  { %v1447_v63 = vpop.f32.mrf.mxu0  ;;  %v1488_v55 = vpop.f32.mrf.mxu1 }
 0x360   :  { %9279 = vpow2.f32 %v8108_v52  ;;  %v8109_v1 = vmul.f32 -1.442695, %v1492_v54  ;;  %v8110_v5 = vmul.f32 -1.442695, %v1494_v3  ;;  %v460_v54 = vadd.f32 %v10217_v6, %v10196_v27 }
 0x361   :  { %v1448_v2 = vpop.f32.mrf.mxu0  ;;  %v1489_v56 = vpop.f32.mrf.mxu1 }
 0x362   :  { %9281 = vpow2.f32 %v8109_v1 }
 0x363   :  { %9283 = vtanh.f32 %v1493_v4 }
 0x364   :  { %9285 = vpow2.f32 %v8110_v5 }
 0x36d   :  { %v9280_v57 = vpop.eup %9279 }
 0x36e   :  { %v1498_v58 = vadd.f32 1.0, %v9280_v57 }
 0x36f   :  { %v9282_v29 = vpop.eup %9281 }
 0x370   :  { %9287 = vrcp.f32 %v1498_v58  ;;  %v1504_v59 = vadd.f32 1.0, %v9282_v29  ;;  %v9284_v33 = vpop.eup %9283  ;;  %v11818_v29 = vld [vmem:[#allocation27_spill] sm:$0xff] }
 0x371   :  { %v9286_v60 = vpop.eup %9285 }
 0x372   :  { %9289 = vrcp.f32 %v1504_v59  ;;  %v1511_v0 = vadd.f32 1.0, %v9286_v60  ;;  %v533_v59 = vadd.f32 %v11818_v29, %v10199_v28  ;;  %v11819_v60 = vld [vmem:[#allocation26_spill] sm:$0xff] }
 0x373   :  { %v11821_v29 = vld [vmem:[#allocation30_spill] sm:$0xff] }
 0x374   :  { %9291 = vrcp.f32 %v1511_v0 }
 0x37d   :  { %v9288_v61 = vpop.eup %9287 }
 0x37e   :  { %v1515_v21 = vmul.f32 %v9288_v61, %v9284_v33 }
 0x37f   :  { %v9290_v23 = vpop.eup %9289 }
 0x380   :  { %v1514_v20 = vmul.f32 %v9290_v23, %v10308_v16  ;;  %v10333_v16 = vld [vmem:[#allocation6 + $0xe0] ss:$16 sps:$4 sm:$0xff]  }
 0x381   :  { %v9292_v30 = vpop.eup %9291 }
 0x382   :  { %v10324_v34 = vadd.f32 %v1515_v21, %v1514_v20 }
 0x384   :  { %9293 = vtanh.f32 %v10324_v34 }
 0x391   :  { %v9294_v11 = vpop.eup %9293 }
 0x392   :  { %v1518_v24 = vmul.f32 %v9294_v11, %v9292_v30 }
 0x394   :  { %v1519_v22 = vpack.c.bf16 %v1518_v24, %v1518_v24 }
 0x396   :  { %1521 = vst [vmem:[#allocation3 + $0x8] sm:$0xf] %v1519_v22  ;;  %1754 = vmatmul.mubr.bf16.vlgmr.msra.gmra.mxu0 %v1519_v22  ;;  %1795 = vmatmul.mubr.bf16.vlgmr.msra.gmra.mxu1 %v1519_v22 }
 0x397   :  { %2065 = vmatprep.mubr.bf16.mxu0 %v11817_v17  ;;  %2106 = vmatprep.mubr.bf16.mxu1 %v11817_v17 }
 0x398   :  { %2034 = vmatpush1.bf16.msra.mxu0 %v10333_v16  ;;  %2075 = vmatpush1.bf16.msra.mxu1 %v10335_v9 }
 0x399   :  { %2035 = vmatprep.subr.bf16.mxu0 %v10341_v32  ;;  %2076 = vmatprep.subr.bf16.mxu1 %v10343_v7 }
 0x39c   :  { %2036 = vmatpush1.bf16.msra.mxu0 %v10345_v62  ;;  %2077 = vmatpush1.bf16.msra.mxu1 %v10347_v19 }
 0x39d   :  { %2037 = vmatprep.subr.bf16.mxu0 %v10353_v8  ;;  %2078 = vmatprep.subr.bf16.mxu1 %v10355_v18 }
 0x3a0   :  { %2038 = vmatpush1.bf16.msra.mxu0 %v10357_v44  ;;  %2079 = vmatpush1.bf16.msra.mxu1 %v10359_v15 }
 0x3a1   :  { %2039 = vmatprep.subr.bf16.mxu0 %v10365_v25  ;;  %2080 = vmatprep.subr.bf16.mxu1 %v10367_v31 }
 0x3a4   :  { %2040 = vmatpush1.bf16.msra.mxu0 %v10369_v12  ;;  %2081 = vmatpush1.bf16.msra.mxu1 %v10371_v13 }
 0x3a5   :  { %2041 = vmatprep.subr.bf16.mxu0 %v10375_v10  ;;  %2082 = vmatprep.subr.bf16.mxu1 %v10377_v35 }
 0x3a8   :  { %2042 = vmatpush1.bf16.msra.mxu0 %v10381_v36  ;;  %2083 = vmatpush1.bf16.msra.mxu1 %v10383_v37 }
 0x3a9   :  { %2043 = vmatprep.subr.bf16.mxu0 %v10387_v38  ;;  %2084 = vmatprep.subr.bf16.mxu1 %v10389_v39 }
 0x3ac   :  { %2044 = vmatpush1.bf16.msra.mxu0 %v10393_v40  ;;  %2085 = vmatpush1.bf16.msra.mxu1 %v10395_v41 }
 0x3ad   :  { %2045 = vmatprep.subr.bf16.mxu0 %v10399_v42  ;;  %2086 = vmatprep.subr.bf16.mxu1 %v10401_v43 }
 0x3b0   :  { %2046 = vmatpush1.bf16.msra.mxu0 %v10405_v45  ;;  %2087 = vmatpush1.bf16.msra.mxu1 %v10407_v46 }
 0x3b1   :  { %2047 = vmatprep.subr.bf16.mxu0 %v10411_v47  ;;  %2088 = vmatprep.subr.bf16.mxu1 %v10413_v48 }
 0x3b4   :  { %2048 = vmatpush1.bf16.msra.mxu0 %v10417_v49  ;;  %2089 = vmatpush1.bf16.msra.mxu1 %v10419_v50 }
 0x3b5   :  { %2345 = vmatprep.subr.bf16.mxu0 %v10329_v14  ;;  %2386 = vmatprep.subr.bf16.mxu1 %v10331_v26 }
 0x456   :  { %v1755_v51 = vpop.f32.mrf.mxu0  ;;  %v1796_v52 = vpop.f32.mrf.mxu1 }
 0x457   :  { %v1803_v63 = vadd.f32 %v1755_v51, %v10212_v53  ;;  %v1805_v61 = vadd.f32 %v1796_v52, %v11819_v60 }
 0x458   :  { %v1757_v55 = vpop.f32.mrf.mxu0  ;;  %v1798_v1 = vpop.f32.mrf.mxu1 }
 0x459   :  { %v8143_v2 = vmul.f32 -1.442695, %v1803_v63  ;;  %v1804_v56 = vadd.f32 %v1757_v55, %v460_v54  ;;  %v1806_v33 = vadd.f32 %v1798_v1, %v533_v59 }
 0x45a   :  { %v1759_v3 = vpop.f32.mrf.mxu0  ;;  %v1800_v4 = vpop.f32.mrf.mxu1 }
 0x45b   :  { %9295 = vpow2.f32 %v8143_v2  ;;  %v8144_v5 = vmul.f32 -1.442695, %v1804_v56  ;;  %v8145_v6 = vmul.f32 -1.442695, %v1806_v33  ;;  %v11820_v3 = vld [vmem:[#allocation28_spill] sm:$0xff] }
 0x45c   :  { %v1760_v57 = vpop.f32.mrf.mxu0  ;;  %v1801_v58 = vpop.f32.mrf.mxu1 }
 0x45d   :  { %9297 = vpow2.f32 %v8144_v5 }
 0x45e   :  { %9299 = vtanh.f32 %v1805_v61 }
 0x45f   :  { %9301 = vpow2.f32 %v8145_v6 }
 0x468   :  { %v9296_v21 = vpop.eup %9295 }
 0x469   :  { %v1810_v53 = vadd.f32 1.0, %v9296_v21 }
 0x46a   :  { %v9298_v23 = vpop.eup %9297 }
 0x46b   :  { %9303 = vrcp.f32 %v1810_v53  ;;  %v1816_v0 = vadd.f32 1.0, %v9298_v23  ;;  %v9300_v20 = vpop.eup %9299  ;;  %v11822_v53 = vld [vmem:[#allocation31_spill] sm:$0xff] }
 0x46c   :  { %v9302_v30 = vpop.eup %9301 }
 0x46d   :  { %9305 = vrcp.f32 %v1816_v0  ;;  %v1823_v51 = vadd.f32 1.0, %v9302_v30  ;;  %v11823_v0 = vld [vmem:[#allocation29_spill] sm:$0xff] }
 0x46f   :  { %9307 = vrcp.f32 %v1823_v51 }
 0x478   :  { %v9304_v11 = vpop.eup %9303 }
 0x479   :  { %v1827_v24 = vmul.f32 %v9304_v11, %v9300_v20 }
 0x47a   :  { %v9306_v22 = vpop.eup %9305 }
 0x47b   :  { %v1826_v54 = vmul.f32 %v9306_v22, %v10324_v34 }
 0x47c   :  { %v9308_v52 = vpop.eup %9307 }
 0x47d   :  { %v10434_v63 = vadd.f32 %v1827_v24, %v1826_v54 }
 0x47f   :  { %9309 = vtanh.f32 %v10434_v63 }
 0x48c   :  { %v9310_v55 = vpop.eup %9309 }
 0x48d   :  { %v1830_v1 = vmul.f32 %v9310_v55, %v9308_v52 }
 0x48f   :  { %v1831_v2 = vpack.c.bf16 %v1830_v1, %v1830_v1 }
 0x491   :  { %1833 = vst [vmem:[#allocation3 + $0xc] sm:$0xf] %v1831_v2  ;;  %2066 = vmatmul.mubr.bf16.vlgmr.msra.gmra.mxu0 %v1831_v2  ;;  %2107 = vmatmul.mubr.bf16.vlgmr.msra.gmra.mxu1 %v1831_v2 }
 0x492   :  { %2346 = vmatpush1.bf16.msra.mxu0 %v10333_v16  ;;  %2387 = vmatpush1.bf16.msra.mxu1 %v10335_v9 }
 0x493   :  { %2347 = vmatprep.subr.bf16.mxu0 %v10341_v32  ;;  %2388 = vmatprep.subr.bf16.mxu1 %v10343_v7 }
 0x494   :  { %2377 = vmatprep.mubr.bf16.mxu0 %v11817_v17  ;;  %2418 = vmatprep.mubr.bf16.mxu1 %v11817_v17 }
 0x496   :  { %2348 = vmatpush1.bf16.msra.mxu0 %v10345_v62  ;;  %2389 = vmatpush1.bf16.msra.mxu1 %v10347_v19 }
 0x497   :  { %2349 = vmatprep.subr.bf16.mxu0 %v10353_v8  ;;  %2390 = vmatprep.subr.bf16.mxu1 %v10355_v18 }
 0x49a   :  { %2350 = vmatpush1.bf16.msra.mxu0 %v10357_v44  ;;  %2391 = vmatpush1.bf16.msra.mxu1 %v10359_v15 }
 0x49b   :  { %2351 = vmatprep.subr.bf16.mxu0 %v10365_v25  ;;  %2392 = vmatprep.subr.bf16.mxu1 %v10367_v31 }
 0x49e   :  { %2352 = vmatpush1.bf16.msra.mxu0 %v10369_v12  ;;  %2393 = vmatpush1.bf16.msra.mxu1 %v10371_v13 }
 0x49f   :  { %2353 = vmatprep.subr.bf16.mxu0 %v10375_v10  ;;  %2394 = vmatprep.subr.bf16.mxu1 %v10377_v35 }
 0x4a2   :  { %2354 = vmatpush1.bf16.msra.mxu0 %v10381_v36  ;;  %2395 = vmatpush1.bf16.msra.mxu1 %v10383_v37 }
 0x4a3   :  { %2355 = vmatprep.subr.bf16.mxu0 %v10387_v38  ;;  %2396 = vmatprep.subr.bf16.mxu1 %v10389_v39 }
 0x4a6   :  { %2356 = vmatpush1.bf16.msra.mxu0 %v10393_v40  ;;  %2397 = vmatpush1.bf16.msra.mxu1 %v10395_v41 }
 0x4a7   :  { %2357 = vmatprep.subr.bf16.mxu0 %v10399_v42  ;;  %2398 = vmatprep.subr.bf16.mxu1 %v10401_v43 }
 0x4aa   :  { %2358 = vmatpush1.bf16.msra.mxu0 %v10405_v45  ;;  %2399 = vmatpush1.bf16.msra.mxu1 %v10407_v46 }
 0x4ab   :  { %2359 = vmatprep.subr.bf16.mxu0 %v10411_v47  ;;  %2400 = vmatprep.subr.bf16.mxu1 %v10413_v48 }
 0x4ae   :  { %2360 = vmatpush1.bf16.msra.mxu0 %v10417_v49  ;;  %2401 = vmatpush1.bf16.msra.mxu1 %v10419_v50 }
 0x4af   :  { %2657 = vmatprep.subr.bf16.mxu0 %v10329_v14  ;;  %2698 = vmatprep.subr.bf16.mxu1 %v10331_v26 }
 0x551   :  { %v2067_v34 = vpop.f32.mrf.mxu0  ;;  %v2108_v56 = vpop.f32.mrf.mxu1 }
 0x552   :  { %v2115_v4 = vadd.f32 %v2067_v34, %v11820_v3  ;;  %v2117_v20 = vadd.f32 %v2108_v56, %v11823_v0 }
 0x553   :  { %v2069_v5 = vpop.f32.mrf.mxu0  ;;  %v2110_v57 = vpop.f32.mrf.mxu1 }
 0x554   :  { %v8178_v58 = vmul.f32 -1.442695, %v2115_v4  ;;  %v2116_v59 = vadd.f32 %v2069_v5, %v11821_v29  ;;  %v2118_v23 = vadd.f32 %v2110_v57, %v11822_v53 }
 0x555   :  { %v2071_v33 = vpop.f32.mrf.mxu0  ;;  %v2112_v60 = vpop.f32.mrf.mxu1 }
 0x556   :  { %9311 = vpow2.f32 %v8178_v58  ;;  %v8179_v61 = vmul.f32 -1.442695, %v2116_v59  ;;  %v8180_v30 = vmul.f32 -1.442695, %v2118_v23  ;;  %v11824_v59 = vld [vmem:[#allocation34_spill] sm:$0xff]  ;;  %v11825_v60 = vld [vmem:[#allocation32_spill] sm:$0xff] }
 0x557   :  { %v2072_v6 = vpop.f32.mrf.mxu0  ;;  %v2113_v21 = vpop.f32.mrf.mxu1  ;;  %v470_v33 = vadd.f32 %v11824_v59, %v10196_v27 }
 0x558   :  { %9313 = vpow2.f32 %v8179_v61 }
 0x559   :  { %9315 = vtanh.f32 %v2117_v20 }
 0x55a   :  { %9317 = vpow2.f32 %v8180_v30 }
 0x563   :  { %v9312_v11 = vpop.eup %9311 }
 0x564   :  { %v2122_v24 = vadd.f32 1.0, %v9312_v11 }
 0x565   :  { %v9314_v22 = vpop.eup %9313 }
 0x566   :  { %9319 = vrcp.f32 %v2122_v24  ;;  %v2128_v51 = vadd.f32 1.0, %v9314_v22  ;;  %v9316_v54 = vpop.eup %9315 }
 0x567   :  { %v9318_v52 = vpop.eup %9317 }
 0x568   :  { %9321 = vrcp.f32 %v2128_v51  ;;  %v2135_v34 = vadd.f32 1.0, %v9318_v52  ;;  %v11827_v51 = vld [vmem:[#allocation33_spill] sm:$0xff] }
 0x56a   :  { %9323 = vrcp.f32 %v2135_v34 }
 0x573   :  { %v9320_v55 = vpop.eup %9319 }
 0x574   :  { %v2139_v1 = vmul.f32 %v9320_v55, %v9316_v54 }
 0x575   :  { %v9322_v2 = vpop.eup %9321 }
 0x576   :  { %v2138_v3 = vmul.f32 %v9322_v2, %v10434_v63 }
 0x577   :  { %v9324_v56 = vpop.eup %9323 }
 0x578   :  { %v10476_v4 = vadd.f32 %v2139_v1, %v2138_v3 }
 0x57a   :  { %9325 = vtanh.f32 %v10476_v4 }
 0x587   :  { %v9326_v5 = vpop.eup %9325 }
 0x588   :  { %v2142_v57 = vmul.f32 %v9326_v5, %v9324_v56 }
 0x58a   :  { %v2143_v58 = vpack.c.bf16 %v2142_v57, %v2142_v57 }
 0x58c   :  { %2145 = vst [vmem:[#allocation3 + $0x10] sm:$0xf] %v2143_v58  ;;  %2378 = vmatmul.mubr.bf16.vlgmr.msra.gmra.mxu0 %v2143_v58  ;;  %2419 = vmatmul.mubr.bf16.vlgmr.msra.gmra.mxu1 %v2143_v58 }
 0x58d   :  { %2658 = vmatpush1.bf16.msra.mxu0 %v10333_v16  ;;  %2699 = vmatpush1.bf16.msra.mxu1 %v10335_v9 }
 0x58e   :  { %2659 = vmatprep.subr.bf16.mxu0 %v10341_v32  ;;  %2700 = vmatprep.subr.bf16.mxu1 %v10343_v7 }
 0x58f   :  { %2689 = vmatprep.mubr.bf16.mxu0 %v11817_v17  ;;  %2730 = vmatprep.mubr.bf16.mxu1 %v11817_v17 }
 0x591   :  { %2660 = vmatpush1.bf16.msra.mxu0 %v10345_v62  ;;  %2701 = vmatpush1.bf16.msra.mxu1 %v10347_v19 }
 0x592   :  { %2661 = vmatprep.subr.bf16.mxu0 %v10353_v8  ;;  %2702 = vmatprep.subr.bf16.mxu1 %v10355_v18 }
 0x595   :  { %2662 = vmatpush1.bf16.msra.mxu0 %v10357_v44  ;;  %2703 = vmatpush1.bf16.msra.mxu1 %v10359_v15 }
 0x596   :  { %2663 = vmatprep.subr.bf16.mxu0 %v10365_v25  ;;  %2704 = vmatprep.subr.bf16.mxu1 %v10367_v31 }
 0x599   :  { %2664 = vmatpush1.bf16.msra.mxu0 %v10369_v12  ;;  %2705 = vmatpush1.bf16.msra.mxu1 %v10371_v13 }
 0x59a   :  { %2665 = vmatprep.subr.bf16.mxu0 %v10375_v10  ;;  %2706 = vmatprep.subr.bf16.mxu1 %v10377_v35 }
 0x59d   :  { %2666 = vmatpush1.bf16.msra.mxu0 %v10381_v36  ;;  %2707 = vmatpush1.bf16.msra.mxu1 %v10383_v37 }
 0x59e   :  { %2667 = vmatprep.subr.bf16.mxu0 %v10387_v38  ;;  %2708 = vmatprep.subr.bf16.mxu1 %v10389_v39 }
 0x5a1   :  { %2668 = vmatpush1.bf16.msra.mxu0 %v10393_v40  ;;  %2709 = vmatpush1.bf16.msra.mxu1 %v10395_v41 }
 0x5a2   :  { %2669 = vmatprep.subr.bf16.mxu0 %v10399_v42  ;;  %2710 = vmatprep.subr.bf16.mxu1 %v10401_v43 }
 0x5a5   :  { %2670 = vmatpush1.bf16.msra.mxu0 %v10405_v45  ;;  %2711 = vmatpush1.bf16.msra.mxu1 %v10407_v46 }
 0x5a6   :  { %2671 = vmatprep.subr.bf16.mxu0 %v10411_v47  ;;  %2712 = vmatprep.subr.bf16.mxu1 %v10413_v48 }
 0x5a9   :  { %2672 = vmatpush1.bf16.msra.mxu0 %v10417_v49  ;;  %2713 = vmatpush1.bf16.msra.mxu1 %v10419_v50 }
 0x5aa   :  { %2969 = vmatprep.subr.bf16.mxu0 %v10329_v14  ;;  %3010 = vmatprep.subr.bf16.mxu1 %v10331_v26  ;;  %v11826_v14 = vld [vmem:[#allocation35_spill] sm:$0xff] }
 0x5ab   :  { %v543_v26 = vadd.f32 %v11826_v14, %v10199_v28  ;;  %v8959_v14 = vld [vmem:[#allocation8 + $0xc4] ss:$16 sps:$4 sm:$0xff]  }
 0x64c   :  { %v2379_v63 = vpop.f32.mrf.mxu0  ;;  %v2420_v29 = vpop.f32.mrf.mxu1 }
 0x64d   :  { %v2427_v61 = vadd.f32 %v2379_v63, %v11825_v60  ;;  %v2429_v54 = vadd.f32 %v2420_v29, %v11827_v51  ;;  %v8960_v51 = vld [vmem:[#allocation8 + $0xc8] ss:$16 sps:$4 sm:$0xff]  }
 0x64e   :  { %v2381_v6 = vpop.f32.mrf.mxu0  ;;  %v2422_v21 = vpop.f32.mrf.mxu1 }
 0x64f   :  { %v8213_v53 = vmul.f32 -1.442695, %v2427_v61  ;;  %v2428_v23 = vadd.f32 %v2381_v6, %v470_v33  ;;  %v2430_v22 = vadd.f32 %v2422_v21, %v543_v26  ;;  %v8962_v26 = vld [vmem:[#allocation8 + $0xcc] ss:$16 sps:$4 sm:$0xff]  }
 0x650   :  { %v2383_v0 = vpop.f32.mrf.mxu0  ;;  %v2424_v20 = vpop.f32.mrf.mxu1 }
 0x651   :  { %9327 = vpow2.f32 %v8213_v53  ;;  %v8214_v30 = vmul.f32 -1.442695, %v2428_v23  ;;  %v8215_v52 = vmul.f32 -1.442695, %v2430_v22  ;;  %v8957_v22 = vld [vmem:[#allocation8 + $0xc0] ss:$16 sps:$4 sm:$0xff]  }
 0x652   :  { %v2384_v11 = vpop.f32.mrf.mxu0  ;;  %v2425_v24 = vpop.f32.mrf.mxu1 }
 0x653   :  { %9329 = vpow2.f32 %v8214_v30  ;;  %v8951_v30 = vld [vmem:[#allocation8 + $0xe0] ss:$16 sps:$4 sm:$0xff]   ;;  %v8954_v11 = vld [vmem:[#allocation8 + $0xe8] ss:$16 sps:$4 sm:$0xff]  }
 0x654   :  { %9331 = vtanh.f32 %v2429_v54  ;;  %v8965_v54 = vld [vmem:[#allocation8 + $0xa4] ss:$16 sps:$4 sm:$0xff]  }
 0x655   :  { %9333 = vpow2.f32 %v8215_v52  ;;  %v8968_v52 = vld [vmem:[#allocation8 + $0xac] ss:$16 sps:$4 sm:$0xff]  }
 0x65e   :  { %v9328_v55 = vpop.eup %9327 }
 0x65f   :  { %v2434_v1 = vadd.f32 1.0, %v9328_v55  ;;  %v8963_v55 = vld [vmem:[#allocation8 + $0xa0] ss:$16 sps:$4 sm:$0xff]  }
 0x660   :  { %v9330_v2 = vpop.eup %9329 }
 0x661   :  { %9335 = vrcp.f32 %v2434_v1  ;;  %v2440_v34 = vadd.f32 1.0, %v9330_v2  ;;  %v9332_v3 = vpop.eup %9331  ;;  %v8966_v1 = vld [vmem:[#allocation8 + $0xa8] ss:$16 sps:$4 sm:$0xff]   ;;  %v8971_v2 = vld [vmem:[#allocation8 + $0x84] ss:$16 sps:$4 sm:$0xff]  }
 0x662   :  { %v9334_v56 = vpop.eup %9333 }
 0x663   :  { %9337 = vrcp.f32 %v2440_v34  ;;  %v2447_v63 = vadd.f32 1.0, %v9334_v56  ;;  %v8974_v34 = vld [vmem:[#allocation8 + $0x8c] ss:$16 sps:$4 sm:$0xff]   ;;  %v8972_v56 = vld [vmem:[#allocation8 + $0x88] ss:$16 sps:$4 sm:$0xff]  }
 0x665   :  { %9339 = vrcp.f32 %v2447_v63  ;;  %v8978_v63 = vld [vmem:[#allocation8 + $0x68] ss:$16 sps:$4 sm:$0xff]  }
 0x66e   :  { %v9336_v5 = vpop.eup %9335 }
 0x66f   :  { %v2451_v57 = vmul.f32 %v9336_v5, %v9332_v3  ;;  %v8969_v3 = vld [vmem:[#allocation8 + $0x80] ss:$16 sps:$4 sm:$0xff]   ;;  %v8977_v5 = vld [vmem:[#allocation8 + $0x64] ss:$16 sps:$4 sm:$0xff]  }
 0x670   :  { %v9338_v58 = vpop.eup %9337 }
 0x671   :  { %v2450_v59 = vmul.f32 %v9338_v58, %v10476_v4  ;;  %v8975_v58 = vld [vmem:[#allocation8 + $0x60] ss:$16 sps:$4 sm:$0xff]  }
 0x672   :  { %v9340_v29 = vpop.eup %9339 }
 0x673   :  { %v10520_v33 = vadd.f32 %v2451_v57, %v2450_v59  ;;  %v8980_v57 = vld [vmem:[#allocation8 + $0x6c] ss:$16 sps:$4 sm:$0xff]   ;;  %v8983_v59 = vld [vmem:[#allocation8 + $0x44] ss:$16 sps:$4 sm:$0xff]  }
 0x675   :  { %9341 = vtanh.f32 %v10520_v33 }
 0x682   :  { %v9342_v60 = vpop.eup %9341 }
 0x683   :  { %v2454_v61 = vmul.f32 %v9342_v60, %v9340_v29  ;;  %v8981_v29 = vld [vmem:[#allocation8 + $0x40] ss:$16 sps:$4 sm:$0xff]   ;;  %v8984_v60 = vld [vmem:[#allocation8 + $0x48] ss:$16 sps:$4 sm:$0xff]  }
 0x685   :  { %v2455_v6 = vpack.c.bf16 %v2454_v61, %v2454_v61  ;;  %v8989_v61 = vld [vmem:[#allocation8 + $0x24] ss:$16 sps:$4 sm:$0xff]  }
 0x687   :  { %2457 = vst [vmem:[#allocation3 + $0x14] sm:$0xf] %v2455_v6  ;;  %2690 = vmatmul.mubr.bf16.vlgmr.msra.gmra.mxu0 %v2455_v6  ;;  %2731 = vmatmul.mubr.bf16.vlgmr.msra.gmra.mxu1 %v2455_v6  ;;  %v8992_v6 = vld [vmem:[#allocation8 + $0x2c] ss:$16 sps:$4 sm:$0xff]  }
 0x688   :  { %2970 = vmatpush1.bf16.msra.mxu0 %v10333_v16  ;;  %3011 = vmatpush1.bf16.msra.mxu1 %v10335_v9  ;;  %v8953_v16 = vld [vmem:[#allocation8 + $0xe4] ss:$16 sps:$4 sm:$0xff]   ;;  %v8956_v9 = vld [vmem:[#allocation8 + $0xec] ss:$16 sps:$4 sm:$0xff]  }
 0x689   :  { %2971 = vmatprep.subr.bf16.mxu0 %v10341_v32  ;;  %3012 = vmatprep.subr.bf16.mxu1 %v10343_v7 }
 0x68a   :  { %3001 = vmatprep.mubr.bf16.mxu0 %v11817_v17  ;;  %3042 = vmatprep.mubr.bf16.mxu1 %v11817_v17 }
 0x68c   :  { %2972 = vmatpush1.bf16.msra.mxu0 %v10345_v62  ;;  %3013 = vmatpush1.bf16.msra.mxu1 %v10347_v19  ;;  %v11828_v62 = vld [vmem:[#allocation36_spill] sm:$0xff] }
 0x68d   :  { %2973 = vmatprep.subr.bf16.mxu0 %v10353_v8  ;;  %3014 = vmatprep.subr.bf16.mxu1 %v10355_v18 }
 0x690   :  { %2974 = vmatpush1.bf16.msra.mxu0 %v10357_v44  ;;  %3015 = vmatpush1.bf16.msra.mxu1 %v10359_v15  ;;  %v11829_v15 = vld [vmem:[#allocation38_spill] sm:$0xff] }
 0x691   :  { %2975 = vmatprep.subr.bf16.mxu0 %v10365_v25  ;;  %3016 = vmatprep.subr.bf16.mxu1 %v10367_v31 }
 0x694   :  { %2976 = vmatpush1.bf16.msra.mxu0 %v10369_v12  ;;  %3017 = vmatpush1.bf16.msra.mxu1 %v10371_v13 }
 0x695   :  { %2977 = vmatprep.subr.bf16.mxu0 %v10375_v10  ;;  %3018 = vmatprep.subr.bf16.mxu1 %v10377_v35 }
 0x698   :  { %2978 = vmatpush1.bf16.msra.mxu0 %v10381_v36  ;;  %3019 = vmatpush1.bf16.msra.mxu1 %v10383_v37  ;;  %v11830_v36 = vld [vmem:[#allocation39_spill] sm:$0xff] }
 0x699   :  { %2979 = vmatprep.subr.bf16.mxu0 %v10387_v38  ;;  %3020 = vmatprep.subr.bf16.mxu1 %v10389_v39  ;;  %v11831_v38 = vld [vmem:[#allocation37_spill] sm:$0xff] }
 0x69c   :  { %2980 = vmatpush1.bf16.msra.mxu0 %v10393_v40  ;;  %3021 = vmatpush1.bf16.msra.mxu1 %v10395_v41 }
 0x69d   :  { %2981 = vmatprep.subr.bf16.mxu0 %v10399_v42  ;;  %3022 = vmatprep.subr.bf16.mxu1 %v10401_v43 }
 0x6a0   :  { %2982 = vmatpush1.bf16.msra.mxu0 %v10405_v45  ;;  %3023 = vmatpush1.bf16.msra.mxu1 %v10407_v46 }
 0x6a1   :  { %2983 = vmatprep.subr.bf16.mxu0 %v10411_v47  ;;  %3024 = vmatprep.subr.bf16.mxu1 %v10413_v48 }
 0x6a4   :  { %2984 = vmatpush1.bf16.msra.mxu0 %v10417_v49  ;;  %3025 = vmatpush1.bf16.msra.mxu1 %v10419_v50 }
 0x6a5   :  { %3328 = vmatprep.subr.bf16.mxu0 %v8953_v16  ;;  %3401 = vmatprep.subr.bf16.mxu1 %v8956_v9  ;;  %v8987_v16 = vld [vmem:[#allocation8 + $0x20] ss:$16 sps:$4 sm:$0xff]   ;;  %v8990_v9 = vld [vmem:[#allocation8 + $0x28] ss:$16 sps:$4 sm:$0xff]  }
 0x747   :  { %v2691_v32 = vpop.f32.mrf.mxu0  ;;  %v2732_v7 = vpop.f32.mrf.mxu1 }
 0x748   :  { %v2739_v19 = vadd.f32 %v2691_v32, %v11828_v62  ;;  %v2741_v39 = vadd.f32 %v2732_v7, %v11831_v38  ;;  %v8995_v32 = vld [vmem:[#allocation8 + $0x4] ss:$16 sps:$4 sm:$0xff]   ;;  %v8998_v7 = vld [vmem:[#allocation8 + $0xc] ss:$16 sps:$4 sm:$0xff]   ;;  %v8993_v62 = vld [vmem:[#allocation8] ss:$16 sps:$4 sm:$0xff]  }
 0x749   :  { %v2693_v8 = vpop.f32.mrf.mxu0  ;;  %v2734_v18 = vpop.f32.mrf.mxu1  ;;  %v10597_v38 = vld [vmem:[#allocation9 + $0xac] ss:$16 sps:$4 sm:$0xff]  }
 0x74a   :  { %v8248_v44 = vmul.f32 -1.442695, %v2739_v19  ;;  %v2740_v25 = vadd.f32 %v2693_v8, %v11829_v15  ;;  %v2742_v37 = vadd.f32 %v2734_v18, %v11830_v36  ;;  %v8996_v19 = vld [vmem:[#allocation8 + $0x8] ss:$16 sps:$4 sm:$0xff]   ;;  %v8999_v8 = vld [vmem:[#allocation3] sm:$0xff]  }
 0x74b   :  { %v2695_v31 = vpop.f32.mrf.mxu0  ;;  %v2736_v12 = vpop.f32.mrf.mxu1  ;;  %v9000_v18 = vld [vmem:[#allocation3 + $0x8] sm:$0xff]   ;;  %v10571_v15 = vld [vmem:[#allocation9 + $0xe4] ss:$16 sps:$4 sm:$0xff]  }
 0x74c   :  { %9343 = vpow2.f32 %v8248_v44  ;;  %v8249_v13 = vmul.f32 -1.442695, %v2740_v25  ;;  %v8250_v40 = vmul.f32 -1.442695, %v2742_v37  ;;  %v9001_v44 = vld [vmem:[#allocation3 + $0x10] sm:$0xff]  }
 0x74d   :  { %v2696_v10 = vpop.f32.mrf.mxu0  ;;  %v2737_v35 = vpop.f32.mrf.mxu1  ;;  %v10573_v25 = vld [vmem:[#allocation9 + $0xec] ss:$16 sps:$4 sm:$0xff]   ;;  %v10575_v31 = vld [vmem:[#allocation9 + $0xe0] ss:$16 sps:$4 sm:$0xff]   ;;  %v10577_v12 = vld [vmem:[#allocation9 + $0xe8] ss:$16 sps:$4 sm:$0xff]  }
 0x74e   :  { %9345 = vpow2.f32 %v8249_v13  ;;  %v10583_v13 = vld [vmem:[#allocation9 + $0xc4] ss:$16 sps:$4 sm:$0xff]   ;;  %v10585_v10 = vld [vmem:[#allocation9 + $0xcc] ss:$16 sps:$4 sm:$0xff]   ;;  %v10587_v35 = vld [vmem:[#allocation9 + $0xc0] ss:$16 sps:$4 sm:$0xff]  }
 0x74f   :  { %9347 = vtanh.f32 %v2741_v39  ;;  %v10589_v36 = vld [vmem:[#allocation9 + $0xc8] ss:$16 sps:$4 sm:$0xff]   ;;  %v10595_v37 = vld [vmem:[#allocation9 + $0xa4] ss:$16 sps:$4 sm:$0xff]   ;;  %v10599_v39 = vld [vmem:[#allocation9 + $0xa0] ss:$16 sps:$4 sm:$0xff]  }
 0x750   :  { %9349 = vpow2.f32 %v8250_v40  ;;  %v10601_v40 = vld [vmem:[#allocation9 + $0xa8] ss:$16 sps:$4 sm:$0xff]  }
 0x759   :  { %v9344_v41 = vpop.eup %9343 }
 0x75a   :  { %v2746_v42 = vadd.f32 1.0, %v9344_v41  ;;  %v10607_v41 = vld [vmem:[#allocation9 + $0x84] ss:$16 sps:$4 sm:$0xff]  }
 0x75b   :  { %v9346_v43 = vpop.eup %9345 }
 0x75c   :  { %9351 = vrcp.f32 %v2746_v42  ;;  %v2752_v45 = vadd.f32 1.0, %v9346_v43  ;;  %v9348_v46 = vpop.eup %9347  ;;  %v10609_v42 = vld [vmem:[#allocation9 + $0x8c] ss:$16 sps:$4 sm:$0xff]   ;;  %v10611_v43 = vld [vmem:[#allocation9 + $0x80] ss:$16 sps:$4 sm:$0xff]  }
 0x75d   :  { %v9350_v47 = vpop.eup %9349 }
 0x75e   :  { %9353 = vrcp.f32 %v2752_v45  ;;  %v2759_v4 = vadd.f32 1.0, %v9350_v47  ;;  %v10613_v45 = vld [vmem:[#allocation9 + $0x88] ss:$16 sps:$4 sm:$0xff]   ;;  %v10621_v47 = vld [vmem:[#allocation9 + $0x64] ss:$16 sps:$4 sm:$0xff]  }
 0x760   :  { %9355 = vrcp.f32 %v2759_v4  ;;  %v10630_v4 = vld [vmem:[#allocation9 + $0x4c] ss:$16 sps:$4 sm:$0xff]  }
 0x769   :  { %v9352_v48 = vpop.eup %9351 }
 0x76a   :  { %v2763_v49 = vmul.f32 %v9352_v48, %v9348_v46  ;;  %v10619_v46 = vld [vmem:[#allocation9 + $0x60] ss:$16 sps:$4 sm:$0xff]   ;;  %v10623_v48 = vld [vmem:[#allocation9 + $0x68] ss:$16 sps:$4 sm:$0xff]  }
 0x76b   :  { %v9354_v50 = vpop.eup %9353 }
 0x76c   :  { %v2762_v21 = vmul.f32 %v9354_v50, %v10520_v33  ;;  %v8986_v33 = vld [vmem:[#allocation8 + $0x4c] ss:$16 sps:$4 sm:$0xff]   ;;  %v10627_v50 = vld [vmem:[#allocation9 + $0x44] ss:$16 sps:$4 sm:$0xff]  }
 0x76d   :  { %v9356_v23 = vpop.eup %9355 }
 0x76e   :  { %v10560_v53 = vadd.f32 %v2763_v49, %v2762_v21  ;;  %v10625_v49 = vld [vmem:[#allocation9 + $0x6c] ss:$16 sps:$4 sm:$0xff]   ;;  %v10634_v21 = vld [vmem:[#allocation9 + $0x40] ss:$16 sps:$4 sm:$0xff]  }
 0x770   :  { %9357 = vtanh.f32 %v10560_v53 }
 0x77d   :  { %v9358_v0 = vpop.eup %9357 }
 0x77e   :  { %v2766_v20 = vmul.f32 %v9358_v0, %v9356_v23  ;;  %v10638_v23 = vld [vmem:[#allocation9 + $0x48] ss:$16 sps:$4 sm:$0xff]   ;;  %v10643_v0 = vld [vmem:[#allocation9 + $0x24] ss:$16 sps:$4 sm:$0xff]  }
 0x780   :  { %v2767_v24 = vpack.c.bf16 %v2766_v20, %v2766_v20  ;;  %v10645_v20 = vld [vmem:[#allocation9 + $0x2c] ss:$16 sps:$4 sm:$0xff]  }
 0x782   :  { %2769 = vst [vmem:[#allocation3 + $0x18] sm:$0xf] %v2767_v24  ;;  %3002 = vmatmul.mubr.bf16.vlgmr.msra.gmra.mxu0 %v2767_v24  ;;  %3043 = vmatmul.mubr.bf16.vlgmr.msra.gmra.mxu1 %v2767_v24  ;;  %v10653_v24 = vld [vmem:[#allocation9 + $0x4] ss:$16 sps:$4 sm:$0xff]  }
 0x783   :  { %3329 = vmatpush1.bf16.msra.mxu0 %v8951_v30  ;;  %3402 = vmatpush1.bf16.msra.mxu1 %v8954_v11  ;;  %v10647_v30 = vld [vmem:[#allocation9 + $0x20] ss:$16 sps:$4 sm:$0xff]   ;;  %v10649_v11 = vld [vmem:[#allocation9 + $0x28] ss:$16 sps:$4 sm:$0xff]  }
 0x784   :  { %3330 = vmatprep.subr.bf16.mxu0 %v8959_v14  ;;  %3403 = vmatprep.subr.bf16.mxu1 %v8962_v26  ;;  %v10655_v14 = vld [vmem:[#allocation9 + $0xc] ss:$16 sps:$4 sm:$0xff]   ;;  %v10658_v26 = vld [vmem:[#allocation9] ss:$16 sps:$4 sm:$0xff]  }
 0x785   :  { %3360 = vmatprep.mubr.bf16.mxu0 %v11817_v17  ;;  %3433 = vmatprep.mubr.bf16.mxu1 %v11817_v17 }
 0x787   :  { %3331 = vmatpush1.bf16.msra.mxu0 %v8957_v22  ;;  %3404 = vmatpush1.bf16.msra.mxu1 %v8960_v51  ;;  %v10662_v22 = vld [vmem:[#allocation9 + $0x8] ss:$16 sps:$4 sm:$0xff]  }
 0x788   :  { %3332 = vmatprep.subr.bf16.mxu0 %v8965_v54  ;;  %3405 = vmatprep.subr.bf16.mxu1 %v8968_v52  ;;  %v11832_v52 = vld [vmem:[#allocation42_spill] sm:$0xff] }
 0x78b   :  { %3333 = vmatpush1.bf16.msra.mxu0 %v8963_v55  ;;  %3406 = vmatpush1.bf16.msra.mxu1 %v8966_v1  ;;  %v480_v55 = vadd.f32 %v11832_v52, %v10196_v27  ;;  %v11833_v1 = vld [vmem:[#allocation40_spill] sm:$0xff] }
 0x78c   :  { %3334 = vmatprep.subr.bf16.mxu0 %v8971_v2  ;;  %3407 = vmatprep.subr.bf16.mxu1 %v8974_v34 }
 0x78f   :  { %3335 = vmatpush1.bf16.msra.mxu0 %v8969_v3  ;;  %3408 = vmatpush1.bf16.msra.mxu1 %v8972_v56 }
 0x790   :  { %3336 = vmatprep.subr.bf16.mxu0 %v8977_v5  ;;  %3409 = vmatprep.subr.bf16.mxu1 %v8980_v57 }
 0x793   :  { %3337 = vmatpush1.bf16.msra.mxu0 %v8975_v58  ;;  %3410 = vmatpush1.bf16.msra.mxu1 %v8978_v63 }
 0x794   :  { %3338 = vmatprep.subr.bf16.mxu0 %v8983_v59  ;;  %3411 = vmatprep.subr.bf16.mxu1 %v8986_v33 }
 0x797   :  { %3339 = vmatpush1.bf16.msra.mxu0 %v8981_v29  ;;  %3412 = vmatpush1.bf16.msra.mxu1 %v8984_v60  ;;  %v11834_v29 = vld [vmem:[#allocation43_spill] sm:$0xff] }
 0x798   :  { %3340 = vmatprep.subr.bf16.mxu0 %v8989_v61  ;;  %3413 = vmatprep.subr.bf16.mxu1 %v8992_v6  ;;  %v553_v60 = vadd.f32 %v11834_v29, %v10199_v28  ;;  %v11835_v6 = vld [vmem:[#allocation41_spill] sm:$0xff] }
 0x79b   :  { %3341 = vmatpush1.bf16.msra.mxu0 %v8987_v16  ;;  %3414 = vmatpush1.bf16.msra.mxu1 %v8990_v9 }
 0x79c   :  { %3342 = vmatprep.subr.bf16.mxu0 %v8995_v32  ;;  %3415 = vmatprep.subr.bf16.mxu1 %v8998_v7 }
 0x79f   :  { %3343 = vmatpush1.bf16.msra.mxu0 %v8993_v62  ;;  %3416 = vmatpush1.bf16.msra.mxu1 %v8996_v19 }
 0x7a0   :  { %3702 = vmatprep.subr.bf16.mxu0 %v10571_v15  ;;  %3743 = vmatprep.subr.bf16.mxu1 %v10573_v25 }
 0x7a2   :  { %3361 = vmatmul.mubr.bf16.vlgmr.msra.gmra.mxu0 %v8999_v8  ;;  %3434 = vmatmul.mubr.bf16.vlgmr.msra.gmra.mxu1 %v8999_v8 }
 0x7a3   :  { %3370 = vmatprep.mubr.bf16.mxu0 %v11817_v17  ;;  %3443 = vmatprep.mubr.bf16.mxu1 %v11817_v17 }
 0x7a4   :  { %3703 = vmatpush1.bf16.msra.mxu0 %v10575_v31  ;;  %3744 = vmatpush1.bf16.msra.mxu1 %v10577_v12 }
 0x7a5   :  { %3704 = vmatprep.subr.bf16.mxu0 %v10583_v13  ;;  %3745 = vmatprep.subr.bf16.mxu1 %v10585_v10 }
 0x7a8   :  { %3705 = vmatpush1.bf16.msra.mxu0 %v10587_v35  ;;  %3746 = vmatpush1.bf16.msra.mxu1 %v10589_v36 }
 0x7a9   :  { %3706 = vmatprep.subr.bf16.mxu0 %v10595_v37  ;;  %3747 = vmatprep.subr.bf16.mxu1 %v10597_v38 }
 0x7aa   :  { %3371 = vmatmul.mubr.bf16.gmra.mxu0 %v9000_v18  ;;  %3444 = vmatmul.mubr.bf16.gmra.mxu1 %v9000_v18 }
 0x7ab   :  { %3380 = vmatprep.mubr.bf16.mxu0 %v11817_v17  ;;  %3453 = vmatprep.mubr.bf16.mxu1 %v11817_v17 }
 0x7ac   :  { %3707 = vmatpush1.bf16.msra.mxu0 %v10599_v39  ;;  %3748 = vmatpush1.bf16.msra.mxu1 %v10601_v40 }
 0x7ad   :  { %3708 = vmatprep.subr.bf16.mxu0 %v10607_v41  ;;  %3749 = vmatprep.subr.bf16.mxu1 %v10609_v42 }
 0x7b0   :  { %3709 = vmatpush1.bf16.msra.mxu0 %v10611_v43  ;;  %3750 = vmatpush1.bf16.msra.mxu1 %v10613_v45 }
 0x7b1   :  { %3710 = vmatprep.subr.bf16.mxu0 %v10621_v47  ;;  %3751 = vmatprep.subr.bf16.mxu1 %v10625_v49 }
 0x7b2   :  { %3381 = vmatmul.mubr.bf16.gmra.mxu0 %v9001_v44  ;;  %3454 = vmatmul.mubr.bf16.gmra.mxu1 %v9001_v44 }
 0x7b3   :  { %3390 = vmatprep.mubr.bf16.mxu0 %v11817_v17  ;;  %3463 = vmatprep.mubr.bf16.mxu1 %v11817_v17 }
 0x7b4   :  { %3711 = vmatpush1.bf16.msra.mxu0 %v10619_v46  ;;  %3752 = vmatpush1.bf16.msra.mxu1 %v10623_v48 }
 0x7b5   :  { %3712 = vmatprep.subr.bf16.mxu0 %v10627_v50  ;;  %3753 = vmatprep.subr.bf16.mxu1 %v10630_v4 }
 0x7b8   :  { %3713 = vmatpush1.bf16.msra.mxu0 %v10634_v21  ;;  %3754 = vmatpush1.bf16.msra.mxu1 %v10638_v23 }
 0x7b9   :  { %3714 = vmatprep.subr.bf16.mxu0 %v10643_v0  ;;  %3755 = vmatprep.subr.bf16.mxu1 %v10645_v20 }
 0x7bc   :  { %3715 = vmatpush1.bf16.msra.mxu0 %v10647_v30  ;;  %3756 = vmatpush1.bf16.msra.mxu1 %v10649_v11 }
 0x7bd   :  { %3716 = vmatprep.subr.bf16.mxu0 %v10653_v24  ;;  %3757 = vmatprep.subr.bf16.mxu1 %v10655_v14 }
 0x7c0   :  { %3717 = vmatpush1.bf16.msra.mxu0 %v10658_v26  ;;  %3758 = vmatpush1.bf16.msra.mxu1 %v10662_v22 }
 0x7c1   :  { %4010 = vmatprep.subr.bf16.mxu0 %v10571_v15  ;;  %4051 = vmatprep.subr.bf16.mxu1 %v10573_v25 }
 0x842   :  { %v3003_v51 = vpop.f32.mrf.mxu0  ;;  %v3044_v54 = vpop.f32.mrf.mxu1 }
 0x843   :  { %v3051_v2 = vadd.f32 %v3003_v51, %v11833_v1  ;;  %v3053_v16 = vadd.f32 %v3044_v54, %v11835_v6 }
 0x844   :  { %v3005_v34 = vpop.f32.mrf.mxu0  ;;  %v3046_v3 = vpop.f32.mrf.mxu1 }
 0x845   :  { %v8283_v56 = vmul.f32 -1.442695, %v3051_v2  ;;  %v3052_v5 = vadd.f32 %v3005_v34, %v480_v55  ;;  %v3054_v61 = vadd.f32 %v3046_v3, %v553_v60 }
 0x846   :  { %v3007_v57 = vpop.f32.mrf.mxu0  ;;  %v3048_v58 = vpop.f32.mrf.mxu1 }
 0x847   :  { %9359 = vpow2.f32 %v8283_v56  ;;  %v8284_v63 = vmul.f32 -1.442695, %v3052_v5  ;;  %v8285_v27 = vmul.f32 -1.442695, %v3054_v61 }
 0x848   :  { %v3008_v59 = vpop.f32.mrf.mxu0  ;;  %v3049_v33 = vpop.f32.mrf.mxu1 }
 0x849   :  { %9361 = vpow2.f32 %v8284_v63 }
 0x84a   :  { %9363 = vtanh.f32 %v3053_v16 }
 0x84b   :  { %9365 = vpow2.f32 %v8285_v27 }
 0x854   :  { %v9360_v9 = vpop.eup %9359 }
 0x855   :  { %v3058_v32 = vadd.f32 1.0, %v9360_v9 }
 0x856   :  { %v9362_v7 = vpop.eup %9361 }
 0x857   :  { %9367 = vrcp.f32 %v3058_v32  ;;  %v3064_v62 = vadd.f32 1.0, %v9362_v7  ;;  %v9364_v19 = vpop.eup %9363 }
 0x858   :  { %v9366_v8 = vpop.eup %9365 }
 0x859   :  { %9369 = vrcp.f32 %v3064_v62  ;;  %v3071_v52 = vadd.f32 1.0, %v9366_v8 }
 0x85b   :  { %9371 = vrcp.f32 %v3071_v52 }
 0x862   :  { %v3435_v56 = vpop.f32.mrf.mxu1 }
 0x864   :  { %v9368_v18 = vpop.eup %9367  ;;  %v3437_v57 = vpop.f32.mrf.mxu1 }
 0x865   :  { %v3075_v44 = vmul.f32 %v9368_v18, %v9364_v19 }
 0x866   :  { %v9370_v51 = vpop.eup %9369  ;;  %v10716_v63 = vpop.f32.mrf.mxu1 }
 0x867   :  { %v3074_v28 = vmul.f32 %v9370_v51, %v10560_v53  ;;  %v3362_v53 = vpop.f32.mrf.mxu0 }
 0x868   :  { %v9372_v54 = vpop.eup %9371  ;;  %v10720_v33 = vpop.f32.mrf.mxu1 }
 0x869   :  { %v3076_v55 = vadd.f32 %v3075_v44, %v3074_v28  ;;  %v3364_v5 = vpop.f32.mrf.mxu0  ;;  %v3122_v28 = vld [vmem:[%s11771_s6] sm:$0xf] }
 0x86a   :  { %v10724_v60 = vpop.f32.mrf.mxu1 }
 0x86b   :  { %9373 = vtanh.f32 %v3076_v55  ;;  %v10714_v58 = vpop.f32.mrf.mxu0  ;;  %11836 = vst [vmem:[#allocation27_spill] sm:$0xff] %v10724_v60  ;;  %v11861_v60 = vld [vmem:[#allocation22_spill] sm:$0xff] }
 0x86c   :  { %v10728_v6 = vpop.f32.mrf.mxu1 }
 0x86d   :  { %v10718_v59 = vpop.f32.mrf.mxu0  ;;  %11837 = vst [vmem:[#allocation26_spill] sm:$0xff] %v10728_v6  ;;  %v10786_v6 = vrot.slane %v3122_v28, %v11861_v60 }
 0x86e   :  { %v10732_v27 = vpop.f32.mrf.mxu1 }
 0x86f   :  { %v10722_v29 = vpop.f32.mrf.mxu0  ;;  %11839 = vst [vmem:[#allocation30_spill] sm:$0xff] %v10732_v27 }
 0x870   :  { %v10736_v32 = vpop.f32.mrf.mxu1 }
 0x871   :  { %v10726_v61 = vpop.f32.mrf.mxu0  ;;  %11841 = vst [vmem:[#allocation29_spill] sm:$0xff] %v10736_v32 }
 0x872   :  { %v10740_v62 = vpop.f32.mrf.mxu1 }
 0x873   :  { %v10730_v16 = vpop.f32.mrf.mxu0  ;;  %11843 = vst [vmem:[#allocation32_spill] sm:$0xff] %v10740_v62 }
 0x874   :  { %11838 = vst [vmem:[#allocation28_spill] sm:$0xff] %v10730_v16  ;;  %v10744_v8 = vpop.f32.mrf.mxu1 }
 0x875   :  { %v10734_v9 = vpop.f32.mrf.mxu0  ;;  %11845 = vst [vmem:[#allocation33_spill] sm:$0xff] %v10744_v8 }
 0x876   :  { %11840 = vst [vmem:[#allocation31_spill] sm:$0xff] %v10734_v9  ;;  %v10748_v44 = vpop.f32.mrf.mxu1  ;;  %v11860_v9 = vld [vmem:[#allocation25_spill] sm:$0xff] }
 0x877   :  { %v10738_v7 = vpop.f32.mrf.mxu0  ;;  %11847 = vst [vmem:[#allocation38_spill] sm:$0xff] %v10748_v44  ;;  %v10782_v16 = vrot.slane %v3122_v28, %v11860_v9 }
 0x878   :  { %v9374_v1 = vpop.eup %9373  ;;  %11842 = vst [vmem:[#allocation34_spill] sm:$0xff] %v10738_v7  ;;  %v10752_v52 = vpop.f32.mrf.mxu1 }
 0x879   :  { %v3078_v2 = vmul.f32 %v9374_v1, %v9372_v54  ;;  %v10742_v19 = vpop.f32.mrf.mxu0  ;;  %11849 = vst [vmem:[#allocation37_spill] sm:$0xff] %v10752_v52  ;;  %v11857_v52 = vld [vmem:[#allocation24_spill] sm:$0xff] }
 0x87a   :  { %11844 = vst [vmem:[#allocation35_spill] sm:$0xff] %v10742_v19 }
 0x87b   :  { %v3079_v34 = vpack.c.bf16 %v3078_v2, %v3078_v2  ;;  %v10746_v18 = vpop.f32.mrf.mxu0 }
 0x87c   :  { %11846 = vst [vmem:[#allocation36_spill] sm:$0xff] %v10746_v18  ;;  %v10773_v18 = vrot.slane %v3122_v28, %v11857_v52 }
 0x87d   :  { %3081 = vst [vmem:[#allocation3 + $0x1c] sm:$0xf] %v3079_v34  ;;  %v10750_v51 = vpop.f32.mrf.mxu0  ;;  %v11854_v34 = vld [vmem:[#allocation23_spill] sm:$0xff] }
 0x87e   :  { %11848 = vst [vmem:[#allocation39_spill] sm:$0xff] %v10750_v51 }
 0x884   :  { %v9038_v3 = vld [vmem:[#allocation3 + $0x18] sm:$0xff]  }
 0x885   :  { %3391 = vmatmul.mubr.bf16.gmra.mxu0 %v9038_v3  ;;  %3464 = vmatmul.mubr.bf16.gmra.mxu1 %v9038_v3  ;;  %v10766_v3 = vrot.slane %v3122_v28, %v11854_v34 }
 0x886   :  { %3734 = vmatprep.mubr.bf16.mxu0 %v11817_v17  ;;  %3775 = vmatprep.mubr.bf16.mxu1 %v11817_v17 }
 0x88d   :  { %3735 = vmatmul.mubr.bf16.vlgmr.msra.gmra.mxu0 %v11817_v17  ;;  %3776 = vmatmul.mubr.bf16.vlgmr.msra.gmra.mxu1 %v11817_v17 }
 0x88e   :  { %4011 = vmatpush1.bf16.msra.mxu0 %v10575_v31  ;;  %4052 = vmatpush1.bf16.msra.mxu1 %v10577_v12 }
 0x88f   :  { %4012 = vmatprep.subr.bf16.mxu0 %v10583_v13  ;;  %4053 = vmatprep.subr.bf16.mxu1 %v10585_v10 }
 0x890   :  { %4042 = vmatprep.mubr.bf16.mxu0 %v11817_v17  ;;  %4083 = vmatprep.mubr.bf16.mxu1 %v11817_v17 }
 0x892   :  { %4013 = vmatpush1.bf16.msra.mxu0 %v10587_v35  ;;  %4054 = vmatpush1.bf16.msra.mxu1 %v10589_v36 }
 0x893   :  { %4014 = vmatprep.subr.bf16.mxu0 %v10595_v37  ;;  %4055 = vmatprep.subr.bf16.mxu1 %v10597_v38 }
 0x896   :  { %4015 = vmatpush1.bf16.msra.mxu0 %v10599_v39  ;;  %4056 = vmatpush1.bf16.msra.mxu1 %v10601_v40 }
 0x897   :  { %4016 = vmatprep.subr.bf16.mxu0 %v10607_v41  ;;  %4057 = vmatprep.subr.bf16.mxu1 %v10609_v42 }
 0x89a   :  { %4017 = vmatpush1.bf16.msra.mxu0 %v10611_v43  ;;  %4058 = vmatpush1.bf16.msra.mxu1 %v10613_v45 }
 0x89b   :  { %4018 = vmatprep.subr.bf16.mxu0 %v10621_v47  ;;  %4059 = vmatprep.subr.bf16.mxu1 %v10625_v49 }
 0x89e   :  { %4019 = vmatpush1.bf16.msra.mxu0 %v10619_v46  ;;  %4060 = vmatpush1.bf16.msra.mxu1 %v10623_v48 }
 0x89f   :  { %4020 = vmatprep.subr.bf16.mxu0 %v10627_v50  ;;  %4061 = vmatprep.subr.bf16.mxu1 %v10630_v4 }
 0x8a2   :  { %4021 = vmatpush1.bf16.msra.mxu0 %v10634_v21  ;;  %4062 = vmatpush1.bf16.msra.mxu1 %v10638_v23 }
 0x8a3   :  { %4022 = vmatprep.subr.bf16.mxu0 %v10643_v0  ;;  %4063 = vmatprep.subr.bf16.mxu1 %v10645_v20 }
 0x8a6   :  { %4023 = vmatpush1.bf16.msra.mxu0 %v10647_v30  ;;  %4064 = vmatpush1.bf16.msra.mxu1 %v10649_v11 }
 0x8a7   :  { %4024 = vmatprep.subr.bf16.mxu0 %v10653_v24  ;;  %4065 = vmatprep.subr.bf16.mxu1 %v10655_v14 }
 0x8aa   :  { %4025 = vmatpush1.bf16.msra.mxu0 %v10658_v26  ;;  %4066 = vmatpush1.bf16.msra.mxu1 %v10662_v22 }
 0x8ab   :  { %4318 = vmatprep.subr.bf16.mxu0 %v10571_v15  ;;  %4359 = vmatprep.subr.bf16.mxu1 %v10573_v25 }
 0x945   :  { %v10757_v55 = vpop.f32.mrf.mxu0  ;;  %v10759_v54 = vpop.f32.mrf.mxu1 }
 0x946   :  { %11850 = vst [vmem:[#allocation42_spill] sm:$0xff] %v10757_v55  ;;  %11851 = vst [vmem:[#allocation40_spill] sm:$0xff] %v10759_v54  ;;  %v3363_v54 = vadd.f32 %v3362_v53, %v10766_v3  ;;  %v3438_v53 = vadd.f32 %v3437_v57, %v10782_v16 }
 0x947   :  { %v10761_v1 = vpop.f32.mrf.mxu0  ;;  %v10763_v2 = vpop.f32.mrf.mxu1 }
 0x948   :  { %11852 = vst [vmem:[#allocation43_spill] sm:$0xff] %v10761_v1  ;;  %11853 = vst [vmem:[#allocation41_spill] sm:$0xff] %v10763_v2  ;;  %v3365_v2 = vadd.f32 %v3364_v5, %v10773_v18 }
 0x949   :  { %v10768_v44 = vpop.f32.mrf.mxu0  ;;  %v10770_v51 = vpop.f32.mrf.mxu1 }
 0x94a   :  { %11855 = vst [vmem:[#allocation44_spill] sm:$0xff] %v10768_v44  ;;  %11856 = vst [vmem:[#allocation45_spill] sm:$0xff] %v10770_v51 }
 0x94b   :  { %v10775_v62 = vpop.f32.mrf.mxu0  ;;  %v10777_v8 = vpop.f32.mrf.mxu1 }
 0x94c   :  { %11858 = vst [vmem:[#allocation46_spill] sm:$0xff] %v10775_v62  ;;  %11859 = vst [vmem:[#allocation47_spill] sm:$0xff] %v10777_v8 }
 0x94d   :  { %v3736_v55 = vpop.f32.mrf.mxu0  ;;  %v3777_v1 = vpop.f32.mrf.mxu1 }
 0x94e   :  { %v3784_v19 = vadd.f32 %v3736_v55, %v3363_v54  ;;  %v3436_v55 = vadd.f32 %v3435_v56, %v10786_v6 }
 0x94f   :  { %v3738_v34 = vpop.f32.mrf.mxu0  ;;  %v3779_v7 = vpop.f32.mrf.mxu1 }
 0x950   :  { %v8354_v27 = vmul.f32 -1.442695, %v3784_v19  ;;  %v3785_v44 = vadd.f32 %v3738_v34, %v3365_v2  ;;  %v3787_v5 = vadd.f32 %v3779_v7, %v3438_v53 }
 0x951   :  { %v3740_v32 = vpop.f32.mrf.mxu0  ;;  %v3781_v51 = vpop.f32.mrf.mxu1 }
 0x952   :  { %9375 = vpow2.f32 %v8354_v27  ;;  %v8355_v52 = vmul.f32 -1.442695, %v3785_v44  ;;  %v8356_v19 = vmul.f32 -1.442695, %v3787_v5  ;;  %v3786_v32 = vadd.f32 %v3777_v1, %v3436_v55 }
 0x953   :  { %v3741_v62 = vpop.f32.mrf.mxu0  ;;  %v3782_v8 = vpop.f32.mrf.mxu1  ;;  %v3367_v55 = vadd.f32 %v10714_v58, %v10766_v3 }
 0x954   :  { %9377 = vpow2.f32 %v8355_v52 }
 0x955   :  { %9379 = vpow2.f32 %v8356_v19 }
 0x95f   :  { %v9376_v54 = vpop.eup %9375 }
 0x960   :  { %v3791_v51 = vadd.f32 1.0, %v9376_v54 }
 0x961   :  { %v9378_v27 = vpop.eup %9377 }
 0x962   :  { %9381 = vrcp.f32 %v3791_v51  ;;  %v3797_v44 = vadd.f32 1.0, %v9378_v27  ;;  %v9380_v62 = vpop.eup %9379 }
 0x963   :  { %9383 = vtanh.f32 %v3786_v32  ;;  %v3804_v2 = vadd.f32 1.0, %v9380_v62  ;;  %v3369_v32 = vadd.f32 %v10718_v59, %v10773_v18 }
 0x964   :  { %9385 = vrcp.f32 %v3797_v44 }
 0x965   :  { %9387 = vrcp.f32 %v3804_v2 }
 0x96f   :  { %v9382_v8 = vpop.eup %9381 }
 0x970   :  { %v9384_v52 = vpop.eup %9383 }
 0x971   :  { %v9386_v57 = vpop.eup %9385  ;;  %v3808_v34 = vmul.f32 %v9384_v52, %v9382_v8 }
 0x972   :  { %v3807_v28 = vmul.f32 0.0, %v9386_v57  ;;  %v9388_v56 = vpop.eup %9387 }
 0x974   :  { %v10789_v7 = vadd.f32 %v3808_v34, %v3807_v28  ;;  %v3440_v34 = vadd.f32 %v10716_v63, %v10786_v6 }
 0x976   :  { %9389 = vtanh.f32 %v10789_v7 }
 0x983   :  { %v9390_v1 = vpop.eup %9389 }
 0x984   :  { %v3811_v53 = vmul.f32 %v9390_v1, %v9388_v56 }
 0x986   :  { %v3812_v5 = vpack.c.bf16 %v3811_v53, %v3811_v53 }
 0x988   :  { %3813 = vst [vmem:[#allocation3] sm:$0xf] %v3812_v5  ;;  %4043 = vmatmul.mubr.bf16.vlgmr.msra.gmra.mxu0 %v3812_v5  ;;  %4084 = vmatmul.mubr.bf16.vlgmr.msra.gmra.mxu1 %v3812_v5 }
 0x989   :  { %4319 = vmatpush1.bf16.msra.mxu0 %v10575_v31  ;;  %4360 = vmatpush1.bf16.msra.mxu1 %v10577_v12 }
 0x98a   :  { %4320 = vmatprep.subr.bf16.mxu0 %v10583_v13  ;;  %4361 = vmatprep.subr.bf16.mxu1 %v10585_v10 }
 0x98b   :  { %4350 = vmatprep.mubr.bf16.mxu0 %v11817_v17  ;;  %4391 = vmatprep.mubr.bf16.mxu1 %v11817_v17 }
 0x98d   :  { %4321 = vmatpush1.bf16.msra.mxu0 %v10587_v35  ;;  %4362 = vmatpush1.bf16.msra.mxu1 %v10589_v36 }
 0x98e   :  { %4322 = vmatprep.subr.bf16.mxu0 %v10595_v37  ;;  %4363 = vmatprep.subr.bf16.mxu1 %v10597_v38 }
 0x991   :  { %4323 = vmatpush1.bf16.msra.mxu0 %v10599_v39  ;;  %4364 = vmatpush1.bf16.msra.mxu1 %v10601_v40 }
 0x992   :  { %4324 = vmatprep.subr.bf16.mxu0 %v10607_v41  ;;  %4365 = vmatprep.subr.bf16.mxu1 %v10609_v42 }
 0x995   :  { %4325 = vmatpush1.bf16.msra.mxu0 %v10611_v43  ;;  %4366 = vmatpush1.bf16.msra.mxu1 %v10613_v45 }
 0x996   :  { %4326 = vmatprep.subr.bf16.mxu0 %v10621_v47  ;;  %4367 = vmatprep.subr.bf16.mxu1 %v10625_v49 }
 0x999   :  { %4327 = vmatpush1.bf16.msra.mxu0 %v10619_v46  ;;  %4368 = vmatpush1.bf16.msra.mxu1 %v10623_v48 }
 0x99a   :  { %4328 = vmatprep.subr.bf16.mxu0 %v10627_v50  ;;  %4369 = vmatprep.subr.bf16.mxu1 %v10630_v4 }
 0x99d   :  { %4329 = vmatpush1.bf16.msra.mxu0 %v10634_v21  ;;  %4370 = vmatpush1.bf16.msra.mxu1 %v10638_v23 }
 0x99e   :  { %4330 = vmatprep.subr.bf16.mxu0 %v10643_v0  ;;  %4371 = vmatprep.subr.bf16.mxu1 %v10645_v20 }
 0x9a1   :  { %4331 = vmatpush1.bf16.msra.mxu0 %v10647_v30  ;;  %4372 = vmatpush1.bf16.msra.mxu1 %v10649_v11 }
 0x9a2   :  { %4332 = vmatprep.subr.bf16.mxu0 %v10653_v24  ;;  %4373 = vmatprep.subr.bf16.mxu1 %v10655_v14 }
 0x9a5   :  { %4333 = vmatpush1.bf16.msra.mxu0 %v10658_v26  ;;  %4374 = vmatpush1.bf16.msra.mxu1 %v10662_v22 }
 0x9a6   :  { %4626 = vmatprep.subr.bf16.mxu0 %v10571_v15  ;;  %4667 = vmatprep.subr.bf16.mxu1 %v10573_v25  ;;  %v3442_v25 = vadd.f32 %v10720_v33, %v10782_v16 }
 0xa48   :  { %v4044_v19 = vpop.f32.mrf.mxu0  ;;  %v4085_v54 = vpop.f32.mrf.mxu1 }
 0xa49   :  { %v4092_v51 = vadd.f32 %v4044_v19, %v3367_v55  ;;  %v4094_v59 = vadd.f32 %v4085_v54, %v3440_v34  ;;  %v10886_v34 = vld [vmem:[#allocation9 + $0xec] ss:$16 sps:$4 sm:$0xff]  }
 0xa4a   :  { %v4046_v27 = vpop.f32.mrf.mxu0  ;;  %v4087_v44 = vpop.f32.mrf.mxu1 }
 0xa4b   :  { %v8389_v62 = vmul.f32 -1.442695, %v4092_v51  ;;  %v4093_v8 = vadd.f32 %v4046_v27, %v3369_v32  ;;  %v4095_v58 = vadd.f32 %v4087_v44, %v3442_v25 }
 0xa4c   :  { %v4048_v52 = vpop.f32.mrf.mxu0  ;;  %v4089_v57 = vpop.f32.mrf.mxu1 }
 0xa4d   :  { %9391 = vpow2.f32 %v8389_v62  ;;  %v8390_v2 = vmul.f32 -1.442695, %v4093_v8  ;;  %v8391_v56 = vmul.f32 -1.442695, %v4095_v58  ;;  %v10884_v58 = vld [vmem:[#allocation9 + $0xe4] ss:$16 sps:$4 sm:$0xff]  }
 0xa4e   :  { %v4049_v15 = vpop.f32.mrf.mxu0  ;;  %v4090_v28 = vpop.f32.mrf.mxu1 }
 0xa4f   :  { %9393 = vpow2.f32 %v8390_v2 }
 0xa50   :  { %9395 = vtanh.f32 %v4094_v59  ;;  %v10888_v59 = vld [vmem:[#allocation9 + $0xe0] ss:$16 sps:$4 sm:$0xff]  }
 0xa51   :  { %9397 = vpow2.f32 %v8391_v56  ;;  %v10890_v56 = vld [vmem:[#allocation9 + $0xe8] ss:$16 sps:$4 sm:$0xff]  }
 0xa5a   :  { %v9392_v1 = vpop.eup %9391 }
 0xa5b   :  { %v4099_v53 = vadd.f32 1.0, %v9392_v1  ;;  %v10896_v1 = vld [vmem:[#allocation9 + $0xc4] ss:$16 sps:$4 sm:$0xff]  }
 0xa5c   :  { %v9394_v5 = vpop.eup %9393 }
 0xa5d   :  { %9399 = vrcp.f32 %v4099_v53  ;;  %v4105_v55 = vadd.f32 1.0, %v9394_v5  ;;  %v9396_v19 = vpop.eup %9395  ;;  %v10898_v53 = vld [vmem:[#allocation9 + $0xcc] ss:$16 sps:$4 sm:$0xff]   ;;  %v10900_v5 = vld [vmem:[#allocation9 + $0xc0] ss:$16 sps:$4 sm:$0xff]  }
 0xa5e   :  { %v9398_v32 = vpop.eup %9397 }
 0xa5f   :  { %9401 = vrcp.f32 %v4105_v55  ;;  %v4112_v33 = vadd.f32 1.0, %v9398_v32  ;;  %v10902_v55 = vld [vmem:[#allocation9 + $0xc8] ss:$16 sps:$4 sm:$0xff]   ;;  %v10910_v32 = vld [vmem:[#allocation9 + $0xac] ss:$16 sps:$4 sm:$0xff]  }
 0xa61   :  { %9403 = vrcp.f32 %v4112_v33  ;;  %v10922_v33 = vld [vmem:[#allocation9 + $0x8c] ss:$16 sps:$4 sm:$0xff]  }
 0xa6a   :  { %v9400_v51 = vpop.eup %9399 }
 0xa6b   :  { %v4116_v27 = vmul.f32 %v9400_v51, %v9396_v19  ;;  %v10908_v19 = vld [vmem:[#allocation9 + $0xa4] ss:$16 sps:$4 sm:$0xff]   ;;  %v10912_v51 = vld [vmem:[#allocation9 + $0xa0] ss:$16 sps:$4 sm:$0xff]  }
 0xa6c   :  { %v9402_v62 = vpop.eup %9401 }
 0xa6d   :  { %v4115_v44 = vmul.f32 %v9402_v62, %v10789_v7  ;;  %v10920_v62 = vld [vmem:[#allocation9 + $0x84] ss:$16 sps:$4 sm:$0xff]  }
 0xa6e   :  { %v9404_v63 = vpop.eup %9403 }
 0xa6f   :  { %v10835_v8 = vadd.f32 %v4116_v27, %v4115_v44  ;;  %v10914_v27 = vld [vmem:[#allocation9 + $0xa8] ss:$16 sps:$4 sm:$0xff]   ;;  %v10924_v44 = vld [vmem:[#allocation9 + $0x80] ss:$16 sps:$4 sm:$0xff]  }
 0xa71   :  { %9405 = vtanh.f32 %v10835_v8 }
 0xa7e   :  { %v9406_v54 = vpop.eup %9405 }
 0xa7f   :  { %v4119_v52 = vmul.f32 %v9406_v54, %v9404_v63  ;;  %v10930_v63 = vld [vmem:[#allocation9 + $0x64] ss:$16 sps:$4 sm:$0xff]   ;;  %v10932_v54 = vld [vmem:[#allocation9 + $0x6c] ss:$16 sps:$4 sm:$0xff]  }
 0xa81   :  { %v4120_v57 = vpack.c.bf16 %v4119_v52, %v4119_v52  ;;  %v10936_v52 = vld [vmem:[#allocation9 + $0x60] ss:$16 sps:$4 sm:$0xff]  }
 0xa83   :  { %4121 = vst [vmem:[#allocation3 + $0x4] sm:$0xf] %v4120_v57  ;;  %4351 = vmatmul.mubr.bf16.vlgmr.msra.gmra.mxu0 %v4120_v57  ;;  %4392 = vmatmul.mubr.bf16.vlgmr.msra.gmra.mxu1 %v4120_v57  ;;  %v10938_v57 = vld [vmem:[#allocation9 + $0x68] ss:$16 sps:$4 sm:$0xff]  }
 0xa84   :  { %4627 = vmatpush1.bf16.msra.mxu0 %v10575_v31  ;;  %4668 = vmatpush1.bf16.msra.mxu1 %v10577_v12  ;;  %v3373_v31 = vadd.f32 %v10722_v29, %v10766_v3 }
 0xa85   :  { %4628 = vmatprep.subr.bf16.mxu0 %v10583_v13  ;;  %4669 = vmatprep.subr.bf16.mxu1 %v10585_v10  ;;  %v3375_v10 = vadd.f32 %v10726_v61, %v10773_v18 }
 0xa86   :  { %4658 = vmatprep.mubr.bf16.mxu0 %v11817_v17  ;;  %4699 = vmatprep.mubr.bf16.mxu1 %v11817_v17 }
 0xa88   :  { %4629 = vmatpush1.bf16.msra.mxu0 %v10587_v35  ;;  %4670 = vmatpush1.bf16.msra.mxu1 %v10589_v36 }
 0xa89   :  { %4630 = vmatprep.subr.bf16.mxu0 %v10595_v37  ;;  %4671 = vmatprep.subr.bf16.mxu1 %v10597_v38 }
 0xa8c   :  { %4631 = vmatpush1.bf16.msra.mxu0 %v10599_v39  ;;  %4672 = vmatpush1.bf16.msra.mxu1 %v10601_v40 }
 0xa8d   :  { %4632 = vmatprep.subr.bf16.mxu0 %v10607_v41  ;;  %4673 = vmatprep.subr.bf16.mxu1 %v10609_v42 }
 0xa90   :  { %4633 = vmatpush1.bf16.msra.mxu0 %v10611_v43  ;;  %4674 = vmatpush1.bf16.msra.mxu1 %v10613_v45 }
 0xa91   :  { %4634 = vmatprep.subr.bf16.mxu0 %v10621_v47  ;;  %4675 = vmatprep.subr.bf16.mxu1 %v10625_v49  ;;  %v11863_v49 = vld [vmem:[#allocation27_spill] sm:$0xff] }
 0xa94   :  { %4635 = vmatpush1.bf16.msra.mxu0 %v10619_v46  ;;  %4676 = vmatpush1.bf16.msra.mxu1 %v10623_v48  ;;  %v11862_v46 = vld [vmem:[#allocation26_spill] sm:$0xff] }
 0xa95   :  { %4636 = vmatprep.subr.bf16.mxu0 %v10627_v50  ;;  %4677 = vmatprep.subr.bf16.mxu1 %v10630_v4  ;;  %v3448_v47 = vadd.f32 %v11862_v46, %v10782_v16  ;;  %v3446_v50 = vadd.f32 %v11863_v49, %v10786_v6 }
 0xa98   :  { %4637 = vmatpush1.bf16.msra.mxu0 %v10634_v21  ;;  %4678 = vmatpush1.bf16.msra.mxu1 %v10638_v23 }
 0xa99   :  { %4638 = vmatprep.subr.bf16.mxu0 %v10643_v0  ;;  %4679 = vmatprep.subr.bf16.mxu1 %v10645_v20 }
 0xa9c   :  { %4639 = vmatpush1.bf16.msra.mxu0 %v10647_v30  ;;  %4680 = vmatpush1.bf16.msra.mxu1 %v10649_v11 }
 0xa9d   :  { %4640 = vmatprep.subr.bf16.mxu0 %v10653_v24  ;;  %4681 = vmatprep.subr.bf16.mxu1 %v10655_v14 }
 0xaa0   :  { %4641 = vmatpush1.bf16.msra.mxu0 %v10658_v26  ;;  %4682 = vmatpush1.bf16.msra.mxu1 %v10662_v22 }
 0xaa1   :  { %4934 = vmatprep.subr.bf16.mxu0 %v10884_v58  ;;  %4975 = vmatprep.subr.bf16.mxu1 %v10886_v34 }
 0xb43   :  { %v4352_v12 = vpop.f32.mrf.mxu0  ;;  %v4393_v13 = vpop.f32.mrf.mxu1 }
 0xb44   :  { %v4400_v35 = vadd.f32 %v4352_v12, %v3373_v31  ;;  %v4402_v4 = vadd.f32 %v4393_v13, %v3446_v50  ;;  %v10942_v31 = vld [vmem:[#allocation9 + $0x44] ss:$16 sps:$4 sm:$0xff]   ;;  %v10944_v12 = vld [vmem:[#allocation9 + $0x4c] ss:$16 sps:$4 sm:$0xff]   ;;  %v10948_v13 = vld [vmem:[#allocation9 + $0x40] ss:$16 sps:$4 sm:$0xff]  }
 0xb45   :  { %v4354_v36 = vpop.f32.mrf.mxu0  ;;  %v4395_v37 = vpop.f32.mrf.mxu1 }
 0xb46   :  { %v8424_v38 = vmul.f32 -1.442695, %v4400_v35  ;;  %v4401_v39 = vadd.f32 %v4354_v36, %v3375_v10  ;;  %v4403_v48 = vadd.f32 %v4395_v37, %v3448_v47  ;;  %v10950_v10 = vld [vmem:[#allocation9 + $0x48] ss:$16 sps:$4 sm:$0xff]   ;;  %v10954_v35 = vld [vmem:[#allocation9 + $0x24] ss:$16 sps:$4 sm:$0xff]  }
 0xb47   :  { %v4356_v40 = vpop.f32.mrf.mxu0  ;;  %v4397_v41 = vpop.f32.mrf.mxu1  ;;  %v10956_v36 = vld [vmem:[#allocation9 + $0x2c] ss:$16 sps:$4 sm:$0xff]   ;;  %v10960_v37 = vld [vmem:[#allocation9 + $0x20] ss:$16 sps:$4 sm:$0xff]  }
 0xb48   :  { %9407 = vpow2.f32 %v8424_v38  ;;  %v8425_v42 = vmul.f32 -1.442695, %v4401_v39  ;;  %v8426_v21 = vmul.f32 -1.442695, %v4403_v48  ;;  %v10962_v38 = vld [vmem:[#allocation9 + $0x28] ss:$16 sps:$4 sm:$0xff]  }
 0xb49   :  { %v4357_v43 = vpop.f32.mrf.mxu0  ;;  %v4398_v45 = vpop.f32.mrf.mxu1  ;;  %v10966_v39 = vld [vmem:[#allocation9 + $0x4] ss:$16 sps:$4 sm:$0xff]   ;;  %v10968_v40 = vld [vmem:[#allocation9 + $0xc] ss:$16 sps:$4 sm:$0xff]   ;;  %v10972_v41 = vld [vmem:[#allocation9] ss:$16 sps:$4 sm:$0xff]  }
 0xb4a   :  { %9409 = vpow2.f32 %v8425_v42  ;;  %v10974_v42 = vld [vmem:[#allocation9 + $0x8] ss:$16 sps:$4 sm:$0xff]   ;;  %v11864_v43 = vld [vmem:[#allocation28_spill] sm:$0xff] }
 0xb4b   :  { %9411 = vtanh.f32 %v4402_v4  ;;  %v3377_v45 = vadd.f32 %v11864_v43, %v10766_v3  ;;  %v11865_v48 = vld [vmem:[#allocation31_spill] sm:$0xff] }
 0xb4c   :  { %9413 = vpow2.f32 %v8426_v21  ;;  %v3379_v49 = vadd.f32 %v11865_v48, %v10773_v18 }
 0xb55   :  { %v9408_v23 = vpop.eup %9407 }
 0xb56   :  { %v4407_v0 = vadd.f32 1.0, %v9408_v23 }
 0xb57   :  { %v9410_v20 = vpop.eup %9409 }
 0xb58   :  { %9415 = vrcp.f32 %v4407_v0  ;;  %v4413_v30 = vadd.f32 1.0, %v9410_v20  ;;  %v9412_v11 = vpop.eup %9411 }
 0xb59   :  { %v9414_v24 = vpop.eup %9413 }
 0xb5a   :  { %9417 = vrcp.f32 %v4413_v30  ;;  %v4420_v29 = vadd.f32 1.0, %v9414_v24 }
 0xb5c   :  { %9419 = vrcp.f32 %v4420_v29 }
 0xb65   :  { %v9416_v14 = vpop.eup %9415 }
 0xb66   :  { %v4424_v26 = vmul.f32 %v9416_v14, %v9412_v11 }
 0xb67   :  { %v9418_v22 = vpop.eup %9417 }
 0xb68   :  { %v4423_v61 = vmul.f32 %v9418_v22, %v10835_v8  ;;  %v10926_v8 = vld [vmem:[#allocation9 + $0x88] ss:$16 sps:$4 sm:$0xff]  }
 0xb69   :  { %v9420_v2 = vpop.eup %9419 }
 0xb6a   :  { %v10879_v7 = vadd.f32 %v4424_v26, %v4423_v61  ;;  %v11866_v26 = vld [vmem:[#allocation29_spill] sm:$0xff]  ;;  %v11867_v61 = vld [vmem:[#allocation30_spill] sm:$0xff] }
 0xb6b   :  { %v3452_v22 = vadd.f32 %v11866_v26, %v10782_v16 }
 0xb6c   :  { %9421 = vtanh.f32 %v10879_v7 }
 0xb79   :  { %v9422_v15 = vpop.eup %9421 }
 0xb7a   :  { %v4427_v28 = vmul.f32 %v9422_v15, %v9420_v2  ;;  %v3450_v2 = vadd.f32 %v11867_v61, %v10786_v6 }
 0xb7c   :  { %v4428_v25 = vpack.c.bf16 %v4427_v28, %v4427_v28 }
 0xb7e   :  { %4429 = vst [vmem:[#allocation3 + $0x8] sm:$0xf] %v4428_v25  ;;  %4659 = vmatmul.mubr.bf16.vlgmr.msra.gmra.mxu0 %v4428_v25  ;;  %4700 = vmatmul.mubr.bf16.vlgmr.msra.gmra.mxu1 %v4428_v25 }
 0xb7f   :  { %4966 = vmatprep.mubr.bf16.mxu0 %v11817_v17  ;;  %5007 = vmatprep.mubr.bf16.mxu1 %v11817_v17 }
 0xb80   :  { %4935 = vmatpush1.bf16.msra.mxu0 %v10888_v59  ;;  %4976 = vmatpush1.bf16.msra.mxu1 %v10890_v56 }
 0xb81   :  { %4936 = vmatprep.subr.bf16.mxu0 %v10896_v1  ;;  %4977 = vmatprep.subr.bf16.mxu1 %v10898_v53 }
 0xb84   :  { %4937 = vmatpush1.bf16.msra.mxu0 %v10900_v5  ;;  %4978 = vmatpush1.bf16.msra.mxu1 %v10902_v55 }
 0xb85   :  { %4938 = vmatprep.subr.bf16.mxu0 %v10908_v19  ;;  %4979 = vmatprep.subr.bf16.mxu1 %v10910_v32 }
 0xb88   :  { %4939 = vmatpush1.bf16.msra.mxu0 %v10912_v51  ;;  %4980 = vmatpush1.bf16.msra.mxu1 %v10914_v27 }
 0xb89   :  { %4940 = vmatprep.subr.bf16.mxu0 %v10920_v62  ;;  %4981 = vmatprep.subr.bf16.mxu1 %v10922_v33 }
 0xb8c   :  { %4941 = vmatpush1.bf16.msra.mxu0 %v10924_v44  ;;  %4982 = vmatpush1.bf16.msra.mxu1 %v10926_v8 }
 0xb8d   :  { %4942 = vmatprep.subr.bf16.mxu0 %v10930_v63  ;;  %4983 = vmatprep.subr.bf16.mxu1 %v10932_v54 }
 0xb90   :  { %4943 = vmatpush1.bf16.msra.mxu0 %v10936_v52  ;;  %4984 = vmatpush1.bf16.msra.mxu1 %v10938_v57 }
 0xb91   :  { %4944 = vmatprep.subr.bf16.mxu0 %v10942_v31  ;;  %4985 = vmatprep.subr.bf16.mxu1 %v10944_v12 }
 0xb94   :  { %4945 = vmatpush1.bf16.msra.mxu0 %v10948_v13  ;;  %4986 = vmatpush1.bf16.msra.mxu1 %v10950_v10 }
 0xb95   :  { %4946 = vmatprep.subr.bf16.mxu0 %v10954_v35  ;;  %4987 = vmatprep.subr.bf16.mxu1 %v10956_v36 }
 0xb98   :  { %4947 = vmatpush1.bf16.msra.mxu0 %v10960_v37  ;;  %4988 = vmatpush1.bf16.msra.mxu1 %v10962_v38 }
 0xb99   :  { %4948 = vmatprep.subr.bf16.mxu0 %v10966_v39  ;;  %4989 = vmatprep.subr.bf16.mxu1 %v10968_v40 }
 0xb9c   :  { %4949 = vmatpush1.bf16.msra.mxu0 %v10972_v41  ;;  %4990 = vmatpush1.bf16.msra.mxu1 %v10974_v42 }
 0xb9d   :  { %5242 = vmatprep.subr.bf16.mxu0 %v10884_v58  ;;  %5283 = vmatprep.subr.bf16.mxu1 %v10886_v34 }
 0xc3e   :  { %v4660_v46 = vpop.f32.mrf.mxu0  ;;  %v4701_v47 = vpop.f32.mrf.mxu1 }
 0xc3f   :  { %v4708_v50 = vadd.f32 %v4660_v46, %v3377_v45  ;;  %v4710_v15 = vadd.f32 %v4701_v47, %v3450_v2 }
 0xc40   :  { %v4662_v4 = vpop.f32.mrf.mxu0  ;;  %v4703_v21 = vpop.f32.mrf.mxu1 }
 0xc41   :  { %v8459_v23 = vmul.f32 -1.442695, %v4708_v50  ;;  %v4709_v0 = vadd.f32 %v4662_v4, %v3379_v49  ;;  %v4711_v29 = vadd.f32 %v4703_v21, %v3452_v22 }
 0xc42   :  { %v4664_v20 = vpop.f32.mrf.mxu0  ;;  %v4705_v30 = vpop.f32.mrf.mxu1 }
 0xc43   :  { %9423 = vpow2.f32 %v8459_v23  ;;  %v8460_v11 = vmul.f32 -1.442695, %v4709_v0  ;;  %v8461_v28 = vmul.f32 -1.442695, %v4711_v29  ;;  %v11869_v29 = vld [vmem:[#allocation35_spill] sm:$0xff] }
 0xc44   :  { %v4665_v24 = vpop.f32.mrf.mxu0  ;;  %v4706_v14 = vpop.f32.mrf.mxu1  ;;  %v3385_v61 = vadd.f32 %v11869_v29, %v10773_v18 }
 0xc45   :  { %9425 = vpow2.f32 %v8460_v11 }
 0xc46   :  { %9427 = vtanh.f32 %v4710_v15 }
 0xc47   :  { %9429 = vpow2.f32 %v8461_v28 }
 0xc50   :  { %v9424_v25 = vpop.eup %9423 }
 0xc51   :  { %v4715_v43 = vadd.f32 1.0, %v9424_v25 }
 0xc52   :  { %v9426_v45 = vpop.eup %9425 }
 0xc53   :  { %9431 = vrcp.f32 %v4715_v43  ;;  %v4721_v46 = vadd.f32 1.0, %v9426_v45  ;;  %v9428_v48 = vpop.eup %9427 }
 0xc54   :  { %v9430_v49 = vpop.eup %9429 }
 0xc55   :  { %9433 = vrcp.f32 %v4721_v46  ;;  %v4728_v0 = vadd.f32 1.0, %v9430_v49 }
 0xc57   :  { %9435 = vrcp.f32 %v4728_v0 }
 0xc60   :  { %v9432_v50 = vpop.eup %9431 }
 0xc61   :  { %v4732_v4 = vmul.f32 %v9432_v50, %v9428_v48 }
 0xc62   :  { %v9434_v23 = vpop.eup %9433 }
 0xc63   :  { %v4731_v21 = vmul.f32 %v9434_v23, %v10879_v7  ;;  %v11868_v7 = vld [vmem:[#allocation34_spill] sm:$0xff] }
 0xc64   :  { %v9436_v47 = vpop.eup %9435  ;;  %v3383_v14 = vadd.f32 %v11868_v7, %v10766_v3 }
 0xc65   :  { %v10991_v20 = vadd.f32 %v4732_v4, %v4731_v21  ;;  %v11870_v4 = vld [vmem:[#allocation33_spill] sm:$0xff]  ;;  %v11871_v21 = vld [vmem:[#allocation32_spill] sm:$0xff] }
 0xc66   :  { %v3458_v23 = vadd.f32 %v11870_v4, %v10782_v16 }
 0xc67   :  { %9437 = vtanh.f32 %v10991_v20 }
 0xc74   :  { %v9438_v30 = vpop.eup %9437 }
 0xc75   :  { %v4735_v11 = vmul.f32 %v9438_v30, %v9436_v47  ;;  %v3456_v47 = vadd.f32 %v11871_v21, %v10786_v6 }
 0xc77   :  { %v4736_v24 = vpack.c.bf16 %v4735_v11, %v4735_v11 }
 0xc79   :  { %4737 = vst [vmem:[#allocation3 + $0xc] sm:$0xf] %v4736_v24  ;;  %4967 = vmatmul.mubr.bf16.vlgmr.msra.gmra.mxu0 %v4736_v24  ;;  %5008 = vmatmul.mubr.bf16.vlgmr.msra.gmra.mxu1 %v4736_v24 }
 0xc7a   :  { %5243 = vmatpush1.bf16.msra.mxu0 %v10888_v59  ;;  %5284 = vmatpush1.bf16.msra.mxu1 %v10890_v56 }
 0xc7b   :  { %5244 = vmatprep.subr.bf16.mxu0 %v10896_v1  ;;  %5285 = vmatprep.subr.bf16.mxu1 %v10898_v53 }
 0xc7c   :  { %5274 = vmatprep.mubr.bf16.mxu0 %v11817_v17  ;;  %5315 = vmatprep.mubr.bf16.mxu1 %v11817_v17 }
 0xc7e   :  { %5245 = vmatpush1.bf16.msra.mxu0 %v10900_v5  ;;  %5286 = vmatpush1.bf16.msra.mxu1 %v10902_v55 }
 0xc7f   :  { %5246 = vmatprep.subr.bf16.mxu0 %v10908_v19  ;;  %5287 = vmatprep.subr.bf16.mxu1 %v10910_v32 }
 0xc82   :  { %5247 = vmatpush1.bf16.msra.mxu0 %v10912_v51  ;;  %5288 = vmatpush1.bf16.msra.mxu1 %v10914_v27 }
 0xc83   :  { %5248 = vmatprep.subr.bf16.mxu0 %v10920_v62  ;;  %5289 = vmatprep.subr.bf16.mxu1 %v10922_v33 }
 0xc86   :  { %5249 = vmatpush1.bf16.msra.mxu0 %v10924_v44  ;;  %5290 = vmatpush1.bf16.msra.mxu1 %v10926_v8 }
 0xc87   :  { %5250 = vmatprep.subr.bf16.mxu0 %v10930_v63  ;;  %5291 = vmatprep.subr.bf16.mxu1 %v10932_v54 }
 0xc8a   :  { %5251 = vmatpush1.bf16.msra.mxu0 %v10936_v52  ;;  %5292 = vmatpush1.bf16.msra.mxu1 %v10938_v57 }
 0xc8b   :  { %5252 = vmatprep.subr.bf16.mxu0 %v10942_v31  ;;  %5293 = vmatprep.subr.bf16.mxu1 %v10944_v12 }
 0xc8e   :  { %5253 = vmatpush1.bf16.msra.mxu0 %v10948_v13  ;;  %5294 = vmatpush1.bf16.msra.mxu1 %v10950_v10 }
 0xc8f   :  { %5254 = vmatprep.subr.bf16.mxu0 %v10954_v35  ;;  %5295 = vmatprep.subr.bf16.mxu1 %v10956_v36 }
 0xc92   :  { %5255 = vmatpush1.bf16.msra.mxu0 %v10960_v37  ;;  %5296 = vmatpush1.bf16.msra.mxu1 %v10962_v38 }
 0xc93   :  { %5256 = vmatprep.subr.bf16.mxu0 %v10966_v39  ;;  %5297 = vmatprep.subr.bf16.mxu1 %v10968_v40 }
 0xc96   :  { %5257 = vmatpush1.bf16.msra.mxu0 %v10972_v41  ;;  %5298 = vmatpush1.bf16.msra.mxu1 %v10974_v42 }
 0xc97   :  { %5550 = vmatprep.subr.bf16.mxu0 %v10884_v58  ;;  %5591 = vmatprep.subr.bf16.mxu1 %v10886_v34 }
 0xd39   :  { %v4968_v26 = vpop.f32.mrf.mxu0  ;;  %v5009_v22 = vpop.f32.mrf.mxu1 }
 0xd3a   :  { %v5016_v2 = vadd.f32 %v4968_v26, %v3383_v14  ;;  %v5018_v30 = vadd.f32 %v5009_v22, %v3456_v47 }
 0xd3b   :  { %v4970_v15 = vpop.f32.mrf.mxu0  ;;  %v5011_v28 = vpop.f32.mrf.mxu1 }
 0xd3c   :  { %v8494_v25 = vmul.f32 -1.442695, %v5016_v2  ;;  %v5017_v43 = vadd.f32 %v4970_v15, %v3385_v61  ;;  %v5019_v0 = vadd.f32 %v5011_v28, %v3458_v23 }
 0xd3d   :  { %v4972_v45 = vpop.f32.mrf.mxu0  ;;  %v5013_v46 = vpop.f32.mrf.mxu1 }
 0xd3e   :  { %9439 = vpow2.f32 %v8494_v25  ;;  %v8495_v48 = vmul.f32 -1.442695, %v5017_v43  ;;  %v8496_v11 = vmul.f32 -1.442695, %v5019_v0  ;;  %v11873_v0 = vld [vmem:[#allocation39_spill] sm:$0xff] }
 0xd3f   :  { %v4973_v49 = vpop.f32.mrf.mxu0  ;;  %v5014_v50 = vpop.f32.mrf.mxu1  ;;  %v3389_v21 = vadd.f32 %v11873_v0, %v10773_v18 }
 0xd40   :  { %9441 = vpow2.f32 %v8495_v48 }
 0xd41   :  { %9443 = vtanh.f32 %v5018_v30 }
 0xd42   :  { %9445 = vpow2.f32 %v8496_v11 }
 0xd4b   :  { %v9440_v24 = vpop.eup %9439 }
 0xd4c   :  { %v5023_v7 = vadd.f32 1.0, %v9440_v24 }
 0xd4d   :  { %v9442_v14 = vpop.eup %9441 }
 0xd4e   :  { %9447 = vrcp.f32 %v5023_v7  ;;  %v5029_v26 = vadd.f32 1.0, %v9442_v14  ;;  %v9444_v29 = vpop.eup %9443 }
 0xd4f   :  { %v9446_v61 = vpop.eup %9445 }
 0xd50   :  { %9449 = vrcp.f32 %v5029_v26  ;;  %v5036_v43 = vadd.f32 1.0, %v9446_v61 }
 0xd52   :  { %9451 = vrcp.f32 %v5036_v43 }
 0xd5b   :  { %v9448_v2 = vpop.eup %9447 }
 0xd5c   :  { %v5040_v15 = vmul.f32 %v9448_v2, %v9444_v29 }
 0xd5d   :  { %v9450_v25 = vpop.eup %9449 }
 0xd5e   :  { %v5039_v28 = vmul.f32 %v9450_v25, %v10991_v20  ;;  %v11872_v20 = vld [vmem:[#allocation36_spill] sm:$0xff]  ;;  %v11875_v25 = vld [vmem:[#allocation38_spill] sm:$0xff] }
 0xd5f   :  { %v9452_v22 = vpop.eup %9451  ;;  %v3387_v50 = vadd.f32 %v11872_v20, %v10766_v3  ;;  %v3460_v43 = vadd.f32 %v11875_v25, %v10786_v6 }
 0xd60   :  { %v11037_v45 = vadd.f32 %v5040_v15, %v5039_v28 }
 0xd62   :  { %9453 = vtanh.f32 %v11037_v45 }
 0xd6f   :  { %v9454_v46 = vpop.eup %9453 }
 0xd70   :  { %v5043_v48 = vmul.f32 %v9454_v46, %v9452_v22 }
 0xd72   :  { %v5044_v49 = vpack.c.bf16 %v5043_v48, %v5043_v48 }
 0xd74   :  { %5045 = vst [vmem:[#allocation3 + $0x10] sm:$0xf] %v5044_v49  ;;  %5275 = vmatmul.mubr.bf16.vlgmr.msra.gmra.mxu0 %v5044_v49  ;;  %5316 = vmatmul.mubr.bf16.vlgmr.msra.gmra.mxu1 %v5044_v49 }
 0xd75   :  { %5551 = vmatpush1.bf16.msra.mxu0 %v10888_v59  ;;  %5592 = vmatpush1.bf16.msra.mxu1 %v10890_v56 }
 0xd76   :  { %5552 = vmatprep.subr.bf16.mxu0 %v10896_v1  ;;  %5593 = vmatprep.subr.bf16.mxu1 %v10898_v53 }
 0xd77   :  { %5582 = vmatprep.mubr.bf16.mxu0 %v11817_v17  ;;  %5623 = vmatprep.mubr.bf16.mxu1 %v11817_v17 }
 0xd79   :  { %5553 = vmatpush1.bf16.msra.mxu0 %v10900_v5  ;;  %5594 = vmatpush1.bf16.msra.mxu1 %v10902_v55 }
 0xd7a   :  { %5554 = vmatprep.subr.bf16.mxu0 %v10908_v19  ;;  %5595 = vmatprep.subr.bf16.mxu1 %v10910_v32 }
 0xd7d   :  { %5555 = vmatpush1.bf16.msra.mxu0 %v10912_v51  ;;  %5596 = vmatpush1.bf16.msra.mxu1 %v10914_v27 }
 0xd7e   :  { %5556 = vmatprep.subr.bf16.mxu0 %v10920_v62  ;;  %5597 = vmatprep.subr.bf16.mxu1 %v10922_v33 }
 0xd81   :  { %5557 = vmatpush1.bf16.msra.mxu0 %v10924_v44  ;;  %5598 = vmatpush1.bf16.msra.mxu1 %v10926_v8 }
 0xd82   :  { %5558 = vmatprep.subr.bf16.mxu0 %v10930_v63  ;;  %5599 = vmatprep.subr.bf16.mxu1 %v10932_v54 }
 0xd85   :  { %5559 = vmatpush1.bf16.msra.mxu0 %v10936_v52  ;;  %5600 = vmatpush1.bf16.msra.mxu1 %v10938_v57 }
 0xd86   :  { %5560 = vmatprep.subr.bf16.mxu0 %v10942_v31  ;;  %5601 = vmatprep.subr.bf16.mxu1 %v10944_v12 }
 0xd89   :  { %5561 = vmatpush1.bf16.msra.mxu0 %v10948_v13  ;;  %5602 = vmatpush1.bf16.msra.mxu1 %v10950_v10 }
 0xd8a   :  { %5562 = vmatprep.subr.bf16.mxu0 %v10954_v35  ;;  %5603 = vmatprep.subr.bf16.mxu1 %v10956_v36 }
 0xd8d   :  { %5563 = vmatpush1.bf16.msra.mxu0 %v10960_v37  ;;  %5604 = vmatpush1.bf16.msra.mxu1 %v10962_v38 }
 0xd8e   :  { %5564 = vmatprep.subr.bf16.mxu0 %v10966_v39  ;;  %5605 = vmatprep.subr.bf16.mxu1 %v10968_v40 }
 0xd91   :  { %5565 = vmatpush1.bf16.msra.mxu0 %v10972_v41  ;;  %5606 = vmatpush1.bf16.msra.mxu1 %v10974_v42 }
 0xd92   :  { %5858 = vmatprep.subr.bf16.mxu0 %v10884_v58  ;;  %5899 = vmatprep.subr.bf16.mxu1 %v10886_v34  ;;  %v11874_v34 = vld [vmem:[#allocation37_spill] sm:$0xff] }
 0xd93   :  { %v3462_v2 = vadd.f32 %v11874_v34, %v10782_v16 }
 0xe34   :  { %v5276_v4 = vpop.f32.mrf.mxu0  ;;  %v5317_v23 = vpop.f32.mrf.mxu1 }
 0xe35   :  { %v5324_v47 = vadd.f32 %v5276_v4, %v3387_v50  ;;  %v5326_v28 = vadd.f32 %v5317_v23, %v3460_v43 }
 0xe36   :  { %v5278_v30 = vpop.f32.mrf.mxu0  ;;  %v5319_v11 = vpop.f32.mrf.mxu1 }
 0xe37   :  { %v8529_v24 = vmul.f32 -1.442695, %v5324_v47  ;;  %v5325_v7 = vadd.f32 %v5278_v30, %v3389_v21  ;;  %v5327_v15 = vadd.f32 %v5319_v11, %v3462_v2 }
 0xe38   :  { %v5280_v14 = vpop.f32.mrf.mxu0  ;;  %v5321_v26 = vpop.f32.mrf.mxu1 }
 0xe39   :  { %9455 = vpow2.f32 %v8529_v24  ;;  %v8530_v29 = vmul.f32 -1.442695, %v5325_v7  ;;  %v8531_v22 = vmul.f32 -1.442695, %v5327_v15 }
 0xe3a   :  { %v5281_v58 = vpop.f32.mrf.mxu0  ;;  %v5322_v61 = vpop.f32.mrf.mxu1 }
 0xe3b   :  { %9457 = vpow2.f32 %v8530_v29 }
 0xe3c   :  { %9459 = vtanh.f32 %v5326_v28 }
 0xe3d   :  { %9461 = vpow2.f32 %v8531_v22  ;;  %v9099_v22 = vld [vmem:[#allocation11 + $0xe0] ss:$16 sps:$4 sm:$0xff]  }
 0xe46   :  { %v9456_v46 = vpop.eup %9455 }
 0xe47   :  { %v5331_v48 = vadd.f32 1.0, %v9456_v46  ;;  %v9102_v46 = vld [vmem:[#allocation11 + $0xe8] ss:$16 sps:$4 sm:$0xff]  }
 0xe48   :  { %v9458_v49 = vpop.eup %9457 }
 0xe49   :  { %9463 = vrcp.f32 %v5331_v48  ;;  %v5337_v20 = vadd.f32 1.0, %v9458_v49  ;;  %v9460_v50 = vpop.eup %9459  ;;  %v9107_v49 = vld [vmem:[#allocation11 + $0xc4] ss:$16 sps:$4 sm:$0xff]  }
 0xe4a   :  { %v9462_v4 = vpop.eup %9461 }
 0xe4b   :  { %9465 = vrcp.f32 %v5337_v20  ;;  %v5344_v30 = vadd.f32 1.0, %v9462_v4  ;;  %v9110_v20 = vld [vmem:[#allocation11 + $0xcc] ss:$16 sps:$4 sm:$0xff]   ;;  %v9108_v4 = vld [vmem:[#allocation11 + $0xc8] ss:$16 sps:$4 sm:$0xff]  }
 0xe4d   :  { %9467 = vrcp.f32 %v5344_v30  ;;  %v9114_v30 = vld [vmem:[#allocation11 + $0xa8] ss:$16 sps:$4 sm:$0xff]  }
 0xe56   :  { %v9464_v0 = vpop.eup %9463 }
 0xe57   :  { %v5348_v21 = vmul.f32 %v9464_v0, %v9460_v50  ;;  %v9105_v50 = vld [vmem:[#allocation11 + $0xc0] ss:$16 sps:$4 sm:$0xff]   ;;  %v9113_v0 = vld [vmem:[#allocation11 + $0xa4] ss:$16 sps:$4 sm:$0xff]  }
 0xe58   :  { %v9466_v47 = vpop.eup %9465 }
 0xe59   :  { %v5347_v11 = vmul.f32 %v9466_v47, %v11037_v45  ;;  %v9111_v47 = vld [vmem:[#allocation11 + $0xa0] ss:$16 sps:$4 sm:$0xff]  }
 0xe5a   :  { %v9468_v23 = vpop.eup %9467 }
 0xe5b   :  { %v11083_v24 = vadd.f32 %v5348_v21, %v5347_v11  ;;  %v9116_v21 = vld [vmem:[#allocation11 + $0xac] ss:$16 sps:$4 sm:$0xff]   ;;  %v9119_v11 = vld [vmem:[#allocation11 + $0x84] ss:$16 sps:$4 sm:$0xff]  }
 0xe5d   :  { %9469 = vtanh.f32 %v11083_v24 }
 0xe6a   :  { %v9470_v7 = vpop.eup %9469 }
 0xe6b   :  { %v5351_v14 = vmul.f32 %v9470_v7, %v9468_v23  ;;  %v9117_v23 = vld [vmem:[#allocation11 + $0x80] ss:$16 sps:$4 sm:$0xff]   ;;  %v9120_v7 = vld [vmem:[#allocation11 + $0x88] ss:$16 sps:$4 sm:$0xff]  }
 0xe6d   :  { %v5352_v26 = vpack.c.bf16 %v5351_v14, %v5351_v14  ;;  %v9125_v14 = vld [vmem:[#allocation11 + $0x64] ss:$16 sps:$4 sm:$0xff]  }
 0xe6f   :  { %5353 = vst [vmem:[#allocation3 + $0x14] sm:$0xf] %v5352_v26  ;;  %5583 = vmatmul.mubr.bf16.vlgmr.msra.gmra.mxu0 %v5352_v26  ;;  %5624 = vmatmul.mubr.bf16.vlgmr.msra.gmra.mxu1 %v5352_v26  ;;  %v9128_v26 = vld [vmem:[#allocation11 + $0x6c] ss:$16 sps:$4 sm:$0xff]  }
 0xe70   :  { %5859 = vmatpush1.bf16.msra.mxu0 %v10888_v59  ;;  %5900 = vmatpush1.bf16.msra.mxu1 %v10890_v56  ;;  %v9101_v59 = vld [vmem:[#allocation11 + $0xe4] ss:$16 sps:$4 sm:$0xff]   ;;  %v9104_v56 = vld [vmem:[#allocation11 + $0xec] ss:$16 sps:$4 sm:$0xff]  }
 0xe71   :  { %5860 = vmatprep.subr.bf16.mxu0 %v10896_v1  ;;  %5901 = vmatprep.subr.bf16.mxu1 %v10898_v53  ;;  %v11876_v1 = vld [vmem:[#allocation42_spill] sm:$0xff] }
 0xe72   :  { %5890 = vmatprep.mubr.bf16.mxu0 %v11817_v17  ;;  %5931 = vmatprep.mubr.bf16.mxu1 %v11817_v17  ;;  %v3393_v53 = vadd.f32 %v11876_v1, %v10766_v3  ;;  %v9131_v1 = vld [vmem:[#allocation11 + $0x44] ss:$16 sps:$4 sm:$0xff]  }
 0xe74   :  { %5861 = vmatpush1.bf16.msra.mxu0 %v10900_v5  ;;  %5902 = vmatpush1.bf16.msra.mxu1 %v10902_v55 }
 0xe75   :  { %5862 = vmatprep.subr.bf16.mxu0 %v10908_v19  ;;  %5903 = vmatprep.subr.bf16.mxu1 %v10910_v32  ;;  %v11877_v19 = vld [vmem:[#allocation43_spill] sm:$0xff] }
 0xe76   :  { %v3395_v32 = vadd.f32 %v11877_v19, %v10773_v18  ;;  %v9137_v19 = vld [vmem:[#allocation11 + $0x24] ss:$16 sps:$4 sm:$0xff]  }
 0xe78   :  { %5863 = vmatpush1.bf16.msra.mxu0 %v10912_v51  ;;  %5904 = vmatpush1.bf16.msra.mxu1 %v10914_v27 }
 0xe79   :  { %5864 = vmatprep.subr.bf16.mxu0 %v10920_v62  ;;  %5905 = vmatprep.subr.bf16.mxu1 %v10922_v33 }
 0xe7c   :  { %5865 = vmatpush1.bf16.msra.mxu0 %v10924_v44  ;;  %5906 = vmatpush1.bf16.msra.mxu1 %v10926_v8 }
 0xe7d   :  { %5866 = vmatprep.subr.bf16.mxu0 %v10930_v63  ;;  %5907 = vmatprep.subr.bf16.mxu1 %v10932_v54 }
 0xe80   :  { %5867 = vmatpush1.bf16.msra.mxu0 %v10936_v52  ;;  %5908 = vmatpush1.bf16.msra.mxu1 %v10938_v57 }
 0xe81   :  { %5868 = vmatprep.subr.bf16.mxu0 %v10942_v31  ;;  %5909 = vmatprep.subr.bf16.mxu1 %v10944_v12  ;;  %v11878_v31 = vld [vmem:[#allocation41_spill] sm:$0xff] }
 0xe82   :  { %v3468_v12 = vadd.f32 %v11878_v31, %v10782_v16  ;;  %v11140_v31 = vld [vmem:[#allocation12 + $0xec] ss:$16 sps:$4 sm:$0xff]  }
 0xe84   :  { %5869 = vmatpush1.bf16.msra.mxu0 %v10948_v13  ;;  %5910 = vmatpush1.bf16.msra.mxu1 %v10950_v10  ;;  %v11879_v10 = vld [vmem:[#allocation40_spill] sm:$0xff] }
 0xe85   :  { %5870 = vmatprep.subr.bf16.mxu0 %v10954_v35  ;;  %5911 = vmatprep.subr.bf16.mxu1 %v10956_v36  ;;  %v3466_v35 = vadd.f32 %v11879_v10, %v10786_v6  ;;  %v11150_v10 = vld [vmem:[#allocation12 + $0xc4] ss:$16 sps:$4 sm:$0xff]  }
 0xe88   :  { %5871 = vmatpush1.bf16.msra.mxu0 %v10960_v37  ;;  %5912 = vmatpush1.bf16.msra.mxu1 %v10962_v38 }
 0xe89   :  { %5872 = vmatprep.subr.bf16.mxu0 %v10966_v39  ;;  %5913 = vmatprep.subr.bf16.mxu1 %v10968_v40 }
 0xe8c   :  { %5873 = vmatpush1.bf16.msra.mxu0 %v10972_v41  ;;  %5914 = vmatpush1.bf16.msra.mxu1 %v10974_v42 }
 0xe8d   :  { %6216 = vmatprep.subr.bf16.mxu0 %v9101_v59  ;;  %6289 = vmatprep.subr.bf16.mxu1 %v9104_v56  ;;  %v9123_v59 = vld [vmem:[#allocation11 + $0x60] ss:$16 sps:$4 sm:$0xff]   ;;  %v9126_v56 = vld [vmem:[#allocation11 + $0x68] ss:$16 sps:$4 sm:$0xff]  }
 0xf2f   :  { %v5584_v5 = vpop.f32.mrf.mxu0  ;;  %v5625_v55 = vpop.f32.mrf.mxu1 }
 0xf30   :  { %v5632_v51 = vadd.f32 %v5584_v5, %v3393_v53  ;;  %v5634_v36 = vadd.f32 %v5625_v55, %v3466_v35  ;;  %v9134_v53 = vld [vmem:[#allocation11 + $0x4c] ss:$16 sps:$4 sm:$0xff]   ;;  %v9129_v5 = vld [vmem:[#allocation11 + $0x40] ss:$16 sps:$4 sm:$0xff]   ;;  %v9132_v55 = vld [vmem:[#allocation11 + $0x48] ss:$16 sps:$4 sm:$0xff]  }
 0xf31   :  { %v5586_v27 = vpop.f32.mrf.mxu0  ;;  %v5627_v62 = vpop.f32.mrf.mxu1  ;;  %v11152_v35 = vld [vmem:[#allocation12 + $0xcc] ss:$16 sps:$4 sm:$0xff]  }
 0xf32   :  { %v8564_v33 = vmul.f32 -1.442695, %v5632_v51  ;;  %v5633_v44 = vadd.f32 %v5586_v27, %v3395_v32  ;;  %v5635_v13 = vadd.f32 %v5627_v62, %v3468_v12  ;;  %v9140_v32 = vld [vmem:[#allocation11 + $0x2c] ss:$16 sps:$4 sm:$0xff]   ;;  %v9135_v51 = vld [vmem:[#allocation11 + $0x20] ss:$16 sps:$4 sm:$0xff]  }
 0xf33   :  { %v5588_v8 = vpop.f32.mrf.mxu0  ;;  %v5629_v63 = vpop.f32.mrf.mxu1  ;;  %v9138_v27 = vld [vmem:[#allocation11 + $0x28] ss:$16 sps:$4 sm:$0xff]   ;;  %v9143_v62 = vld [vmem:[#allocation11 + $0x4] ss:$16 sps:$4 sm:$0xff]   ;;  %v11142_v12 = vld [vmem:[#allocation12 + $0xe0] ss:$16 sps:$4 sm:$0xff]  }
 0xf34   :  { %9471 = vpow2.f32 %v8564_v33  ;;  %v8565_v54 = vmul.f32 -1.442695, %v5633_v44  ;;  %v8566_v37 = vmul.f32 -1.442695, %v5635_v13  ;;  %v9146_v33 = vld [vmem:[#allocation11 + $0xc] ss:$16 sps:$4 sm:$0xff]  }
 0xf35   :  { %v5589_v52 = vpop.f32.mrf.mxu0  ;;  %v5630_v57 = vpop.f32.mrf.mxu1  ;;  %v9141_v44 = vld [vmem:[#allocation11] ss:$16 sps:$4 sm:$0xff]   ;;  %v9144_v8 = vld [vmem:[#allocation11 + $0x8] ss:$16 sps:$4 sm:$0xff]  }
 0xf36   :  { %9473 = vpow2.f32 %v8565_v54  ;;  %v9147_v63 = vld [vmem:[#allocation3] sm:$0xff]   ;;  %v9148_v54 = vld [vmem:[#allocation3 + $0x8] sm:$0xff]   ;;  %v9149_v52 = vld [vmem:[#allocation3 + $0x10] sm:$0xff]  }
 0xf37   :  { %9475 = vtanh.f32 %v5634_v36  ;;  %v11138_v57 = vld [vmem:[#allocation12 + $0xe4] ss:$16 sps:$4 sm:$0xff]   ;;  %v11144_v13 = vld [vmem:[#allocation12 + $0xe8] ss:$16 sps:$4 sm:$0xff]   ;;  %v11154_v36 = vld [vmem:[#allocation12 + $0xc0] ss:$16 sps:$4 sm:$0xff]  }
 0xf38   :  { %9477 = vpow2.f32 %v8566_v37  ;;  %v11156_v37 = vld [vmem:[#allocation12 + $0xc8] ss:$16 sps:$4 sm:$0xff]  }
 0xf41   :  { %v9472_v38 = vpop.eup %9471 }
 0xf42   :  { %v5639_v39 = vadd.f32 1.0, %v9472_v38  ;;  %v11162_v38 = vld [vmem:[#allocation12 + $0xa4] ss:$16 sps:$4 sm:$0xff]  }
 0xf43   :  { %v9474_v40 = vpop.eup %9473 }
 0xf44   :  { %9479 = vrcp.f32 %v5639_v39  ;;  %v5645_v41 = vadd.f32 1.0, %v9474_v40  ;;  %v9476_v42 = vpop.eup %9475  ;;  %v11164_v39 = vld [vmem:[#allocation12 + $0xac] ss:$16 sps:$4 sm:$0xff]   ;;  %v11166_v40 = vld [vmem:[#allocation12 + $0xa0] ss:$16 sps:$4 sm:$0xff]  }
 0xf45   :  { %v9478_v45 = vpop.eup %9477 }
 0xf46   :  { %9481 = vrcp.f32 %v5645_v41  ;;  %v5652_v34 = vadd.f32 1.0, %v9478_v45  ;;  %v11168_v41 = vld [vmem:[#allocation12 + $0xa8] ss:$16 sps:$4 sm:$0xff]   ;;  %v11176_v45 = vld [vmem:[#allocation12 + $0x8c] ss:$16 sps:$4 sm:$0xff]  }
 0xf48   :  { %9483 = vrcp.f32 %v5652_v34  ;;  %v11188_v34 = vld [vmem:[#allocation12 + $0x6c] ss:$16 sps:$4 sm:$0xff]  }
 0xf51   :  { %v9480_v29 = vpop.eup %9479 }
 0xf52   :  { %v5656_v58 = vmul.f32 %v9480_v29, %v9476_v42  ;;  %v11174_v42 = vld [vmem:[#allocation12 + $0x84] ss:$16 sps:$4 sm:$0xff]   ;;  %v11178_v29 = vld [vmem:[#allocation12 + $0x80] ss:$16 sps:$4 sm:$0xff]  }
 0xf53   :  { %v9482_v61 = vpop.eup %9481 }
 0xf54   :  { %v5655_v2 = vmul.f32 %v9482_v61, %v11083_v24  ;;  %v9122_v24 = vld [vmem:[#allocation11 + $0x8c] ss:$16 sps:$4 sm:$0xff]   ;;  %v11186_v61 = vld [vmem:[#allocation12 + $0x64] ss:$16 sps:$4 sm:$0xff]  }
 0xf55   :  { %v9484_v25 = vpop.eup %9483 }
 0xf56   :  { %v11127_v15 = vadd.f32 %v5656_v58, %v5655_v2  ;;  %v11180_v58 = vld [vmem:[#allocation12 + $0x88] ss:$16 sps:$4 sm:$0xff]   ;;  %v11190_v2 = vld [vmem:[#allocation12 + $0x60] ss:$16 sps:$4 sm:$0xff]  }
 0xf58   :  { %9485 = vtanh.f32 %v11127_v15 }
 0xf65   :  { %v9486_v43 = vpop.eup %9485 }
 0xf66   :  { %v5659_v28 = vmul.f32 %v9486_v43, %v9484_v25  ;;  %v11192_v25 = vld [vmem:[#allocation12 + $0x68] ss:$16 sps:$4 sm:$0xff]   ;;  %v11194_v43 = vld [vmem:[#allocation12 + $0x44] ss:$16 sps:$4 sm:$0xff]  }
 0xf68   :  { %v5660_v48 = vpack.c.bf16 %v5659_v28, %v5659_v28  ;;  %v11196_v28 = vld [vmem:[#allocation12 + $0x4c] ss:$16 sps:$4 sm:$0xff]  }
 0xf6a   :  { %5661 = vst [vmem:[#allocation3 + $0x18] sm:$0xf] %v5660_v48  ;;  %5891 = vmatmul.mubr.bf16.vlgmr.msra.gmra.mxu0 %v5660_v48  ;;  %5932 = vmatmul.mubr.bf16.vlgmr.msra.gmra.mxu1 %v5660_v48  ;;  %v11210_v48 = vld [vmem:[#allocation12 + $0x24] ss:$16 sps:$4 sm:$0xff]  }
 0xf6b   :  { %6217 = vmatpush1.bf16.msra.mxu0 %v9099_v22  ;;  %6290 = vmatpush1.bf16.msra.mxu1 %v9102_v46  ;;  %v11202_v22 = vld [vmem:[#allocation12 + $0x40] ss:$16 sps:$4 sm:$0xff]   ;;  %v11204_v46 = vld [vmem:[#allocation12 + $0x48] ss:$16 sps:$4 sm:$0xff]  }
 0xf6c   :  { %6218 = vmatprep.subr.bf16.mxu0 %v9107_v49  ;;  %6291 = vmatprep.subr.bf16.mxu1 %v9110_v20  ;;  %v11212_v49 = vld [vmem:[#allocation12 + $0x2c] ss:$16 sps:$4 sm:$0xff]   ;;  %v11214_v20 = vld [vmem:[#allocation12 + $0x20] ss:$16 sps:$4 sm:$0xff]  }
 0xf6d   :  { %6248 = vmatprep.mubr.bf16.mxu0 %v11817_v17  ;;  %6321 = vmatprep.mubr.bf16.mxu1 %v11817_v17 }
 0xf6f   :  { %6219 = vmatpush1.bf16.msra.mxu0 %v9105_v50  ;;  %6292 = vmatpush1.bf16.msra.mxu1 %v9108_v4  ;;  %v11216_v50 = vld [vmem:[#allocation12 + $0x28] ss:$16 sps:$4 sm:$0xff]   ;;  %v11218_v4 = vld [vmem:[#allocation12 + $0x4] ss:$16 sps:$4 sm:$0xff]  }
 0xf70   :  { %6220 = vmatprep.subr.bf16.mxu0 %v9113_v0  ;;  %6293 = vmatprep.subr.bf16.mxu1 %v9116_v21  ;;  %v11222_v0 = vld [vmem:[#allocation12 + $0xc] ss:$16 sps:$4 sm:$0xff]   ;;  %v11226_v21 = vld [vmem:[#allocation12] ss:$16 sps:$4 sm:$0xff]  }
 0xf73   :  { %6221 = vmatpush1.bf16.msra.mxu0 %v9111_v47  ;;  %6294 = vmatpush1.bf16.msra.mxu1 %v9114_v30  ;;  %v11228_v47 = vld [vmem:[#allocation12 + $0x8] ss:$16 sps:$4 sm:$0xff]   ;;  %v11880_v30 = vld [vmem:[#allocation44_spill] sm:$0xff] }
 0xf74   :  { %6222 = vmatprep.subr.bf16.mxu0 %v9119_v11  ;;  %6295 = vmatprep.subr.bf16.mxu1 %v9122_v24  ;;  %v3397_v11 = vadd.f32 %v11880_v30, %v10766_v3 }
 0xf77   :  { %6223 = vmatpush1.bf16.msra.mxu0 %v9117_v23  ;;  %6296 = vmatpush1.bf16.msra.mxu1 %v9120_v7  ;;  %v11881_v7 = vld [vmem:[#allocation46_spill] sm:$0xff] }
 0xf78   :  { %6224 = vmatprep.subr.bf16.mxu0 %v9125_v14  ;;  %6297 = vmatprep.subr.bf16.mxu1 %v9128_v26  ;;  %v3399_v14 = vadd.f32 %v11881_v7, %v10773_v18 }
 0xf7b   :  { %6225 = vmatpush1.bf16.msra.mxu0 %v9123_v59  ;;  %6298 = vmatpush1.bf16.msra.mxu1 %v9126_v56 }
 0xf7c   :  { %6226 = vmatprep.subr.bf16.mxu0 %v9131_v1  ;;  %6299 = vmatprep.subr.bf16.mxu1 %v9134_v53 }
 0xf7f   :  { %6227 = vmatpush1.bf16.msra.mxu0 %v9129_v5  ;;  %6300 = vmatpush1.bf16.msra.mxu1 %v9132_v55 }
 0xf80   :  { %6228 = vmatprep.subr.bf16.mxu0 %v9137_v19  ;;  %6301 = vmatprep.subr.bf16.mxu1 %v9140_v32 }
 0xf83   :  { %6229 = vmatpush1.bf16.msra.mxu0 %v9135_v51  ;;  %6302 = vmatpush1.bf16.msra.mxu1 %v9138_v27  ;;  %v11882_v27 = vld [vmem:[#allocation47_spill] sm:$0xff] }
 0xf84   :  { %6230 = vmatprep.subr.bf16.mxu0 %v9143_v62  ;;  %6303 = vmatprep.subr.bf16.mxu1 %v9146_v33  ;;  %v3472_v3 = vadd.f32 %v11882_v27, %v10782_v16  ;;  %v11883_v33 = vld [vmem:[#allocation45_spill] sm:$0xff] }
 0xf87   :  { %6231 = vmatpush1.bf16.msra.mxu0 %v9141_v44  ;;  %6304 = vmatpush1.bf16.msra.mxu1 %v9144_v8  ;;  %v3470_v44 = vadd.f32 %v11883_v33, %v10786_v6 }
 0xf88   :  { %6590 = vmatprep.subr.bf16.mxu0 %v11138_v57  ;;  %6631 = vmatprep.subr.bf16.mxu1 %v11140_v31 }
 0xf8a   :  { %6249 = vmatmul.mubr.bf16.vlgmr.msra.gmra.mxu0 %v9147_v63  ;;  %6322 = vmatmul.mubr.bf16.vlgmr.msra.gmra.mxu1 %v9147_v63 }
 0xf8b   :  { %6258 = vmatprep.mubr.bf16.mxu0 %v11817_v17  ;;  %6331 = vmatprep.mubr.bf16.mxu1 %v11817_v17 }
 0xf8c   :  { %6591 = vmatpush1.bf16.msra.mxu0 %v11142_v12  ;;  %6632 = vmatpush1.bf16.msra.mxu1 %v11144_v13 }
 0xf8d   :  { %6592 = vmatprep.subr.bf16.mxu0 %v11150_v10  ;;  %6633 = vmatprep.subr.bf16.mxu1 %v11152_v35 }
 0xf90   :  { %6593 = vmatpush1.bf16.msra.mxu0 %v11154_v36  ;;  %6634 = vmatpush1.bf16.msra.mxu1 %v11156_v37 }
 0xf91   :  { %6594 = vmatprep.subr.bf16.mxu0 %v11162_v38  ;;  %6635 = vmatprep.subr.bf16.mxu1 %v11164_v39 }
 0xf92   :  { %6259 = vmatmul.mubr.bf16.gmra.mxu0 %v9148_v54  ;;  %6332 = vmatmul.mubr.bf16.gmra.mxu1 %v9148_v54 }
 0xf93   :  { %6268 = vmatprep.mubr.bf16.mxu0 %v11817_v17  ;;  %6341 = vmatprep.mubr.bf16.mxu1 %v11817_v17 }
 0xf94   :  { %6595 = vmatpush1.bf16.msra.mxu0 %v11166_v40  ;;  %6636 = vmatpush1.bf16.msra.mxu1 %v11168_v41 }
 0xf95   :  { %6596 = vmatprep.subr.bf16.mxu0 %v11174_v42  ;;  %6637 = vmatprep.subr.bf16.mxu1 %v11176_v45 }
 0xf98   :  { %6597 = vmatpush1.bf16.msra.mxu0 %v11178_v29  ;;  %6638 = vmatpush1.bf16.msra.mxu1 %v11180_v58 }
 0xf99   :  { %6598 = vmatprep.subr.bf16.mxu0 %v11186_v61  ;;  %6639 = vmatprep.subr.bf16.mxu1 %v11188_v34 }
 0xf9a   :  { %6269 = vmatmul.mubr.bf16.gmra.mxu0 %v9149_v52  ;;  %6342 = vmatmul.mubr.bf16.gmra.mxu1 %v9149_v52 }
 0xf9b   :  { %6278 = vmatprep.mubr.bf16.mxu0 %v11817_v17  ;;  %6351 = vmatprep.mubr.bf16.mxu1 %v11817_v17 }
 0xf9c   :  { %6599 = vmatpush1.bf16.msra.mxu0 %v11190_v2  ;;  %6640 = vmatpush1.bf16.msra.mxu1 %v11192_v25 }
 0xf9d   :  { %6600 = vmatprep.subr.bf16.mxu0 %v11194_v43  ;;  %6641 = vmatprep.subr.bf16.mxu1 %v11196_v28 }
 0xfa0   :  { %6601 = vmatpush1.bf16.msra.mxu0 %v11202_v22  ;;  %6642 = vmatpush1.bf16.msra.mxu1 %v11204_v46 }
 0xfa1   :  { %6602 = vmatprep.subr.bf16.mxu0 %v11210_v48  ;;  %6643 = vmatprep.subr.bf16.mxu1 %v11212_v49 }
 0xfa4   :  { %6603 = vmatpush1.bf16.msra.mxu0 %v11214_v20  ;;  %6644 = vmatpush1.bf16.msra.mxu1 %v11216_v50 }
 0xfa5   :  { %6604 = vmatprep.subr.bf16.mxu0 %v11218_v4  ;;  %6645 = vmatprep.subr.bf16.mxu1 %v11222_v0 }
 0xfa8   :  { %6605 = vmatpush1.bf16.msra.mxu0 %v11226_v21  ;;  %6646 = vmatpush1.bf16.msra.mxu1 %v11228_v47 }
 0xfa9   :  { %6705 = vmatprep.subr.bf16.mxu0 %v11138_v57  ;;  %6746 = vmatprep.subr.bf16.mxu1 %v11140_v31 }
0x102a   :  { %v5892_v24 = vpop.f32.mrf.mxu0  ;;  %v5933_v23 = vpop.f32.mrf.mxu1 }
0x102b   :  { %v5940_v26 = vadd.f32 %v5892_v24, %v3397_v11  ;;  %v5942_v18 = vadd.f32 %v5933_v23, %v3470_v44 }
0x102c   :  { %v5894_v59 = vpop.f32.mrf.mxu0  ;;  %v5935_v56 = vpop.f32.mrf.mxu1 }
0x102d   :  { %v8599_v1 = vmul.f32 -1.442695, %v5940_v26  ;;  %v5941_v53 = vadd.f32 %v5894_v59, %v3399_v14  ;;  %v5943_v62 = vadd.f32 %v5935_v56, %v3472_v3 }
0x102e   :  { %v5896_v5 = vpop.f32.mrf.mxu0  ;;  %v5937_v55 = vpop.f32.mrf.mxu1 }
0x102f   :  { %9487 = vpow2.f32 %v8599_v1  ;;  %v8600_v19 = vmul.f32 -1.442695, %v5941_v53  ;;  %v8601_v8 = vmul.f32 -1.442695, %v5943_v62 }
0x1030   :  { %v5897_v32 = vpop.f32.mrf.mxu0  ;;  %v5938_v51 = vpop.f32.mrf.mxu1 }
0x1031   :  { %9489 = vpow2.f32 %v8600_v19 }
0x1032   :  { %9491 = vtanh.f32 %v5942_v18 }
0x1033   :  { %9493 = vpow2.f32 %v8601_v8 }
0x103c   :  { %v9488_v63 = vpop.eup %9487 }
0x103d   :  { %v5947_v54 = vadd.f32 1.0, %v9488_v63 }
0x103e   :  { %v9490_v52 = vpop.eup %9489 }
0x103f   :  { %9495 = vrcp.f32 %v5947_v54  ;;  %v5953_v30 = vadd.f32 1.0, %v9490_v52  ;;  %v9492_v11 = vpop.eup %9491 }
0x1040   :  { %v9494_v24 = vpop.eup %9493 }
0x1041   :  { %9497 = vrcp.f32 %v5953_v30  ;;  %v5960_v16 = vadd.f32 1.0, %v9494_v24 }
0x1043   :  { %9499 = vrcp.f32 %v5960_v16 }
0x104a   :  { %v6323_v55 = vpop.f32.mrf.mxu1 }
0x104c   :  { %v9496_v7 = vpop.eup %9495  ;;  %v6325_v32 = vpop.f32.mrf.mxu1 }
0x104d   :  { %v5964_v14 = vmul.f32 %v9496_v7, %v9492_v11 }
0x104e   :  { %v9498_v26 = vpop.eup %9497  ;;  %v11285_v27 = vpop.f32.mrf.mxu1 }
0x104f   :  { %v5963_v59 = vmul.f32 %v9498_v26, %v11127_v15  ;;  %v6250_v15 = vpop.f32.mrf.mxu0 }
0x1050   :  { %v9500_v6 = vpop.eup %9499  ;;  %v11289_v62 = vpop.f32.mrf.mxu1 }
0x1051   :  { %v5965_v56 = vadd.f32 %v5964_v14, %v5963_v59  ;;  %v6252_v19 = vpop.f32.mrf.mxu0 }
0x1052   :  { %v11293_v44 = vpop.f32.mrf.mxu1 }
0x1053   :  { %9501 = vtanh.f32 %v5965_v56  ;;  %v11283_v51 = vpop.f32.mrf.mxu0  ;;  %11884 = vst [vmem:[#allocation25_spill] sm:$0xff] %v11293_v44 }
0x1054   :  { %v11297_v8 = vpop.f32.mrf.mxu1 }
0x1055   :  { %v11287_v3 = vpop.f32.mrf.mxu0  ;;  %11885 = vst [vmem:[#allocation22_spill] sm:$0xff] %v11297_v8 }
0x1056   :  { %v11301_v54 = vpop.f32.mrf.mxu1 }
0x1057   :  { %v11291_v33 = vpop.f32.mrf.mxu0  ;;  %11887 = vst [vmem:[#allocation27_spill] sm:$0xff] %v11301_v54 }
0x1058   :  { %v11305_v30 = vpop.f32.mrf.mxu1 }
0x1059   :  { %v11295_v18 = vpop.f32.mrf.mxu0  ;;  %11889 = vst [vmem:[#allocation31_spill] sm:$0xff] %v11305_v30 }
0x105a   :  { %v11309_v24 = vpop.f32.mrf.mxu1 }
0x105b   :  { %v11299_v63 = vpop.f32.mrf.mxu0  ;;  %11891 = vst [vmem:[#allocation30_spill] sm:$0xff] %v11309_v24  ;;  %v11902_v24 = vld [vmem:[#allocation23_spill] sm:$0xff] }
0x105c   :  { %11886 = vst [vmem:[#allocation26_spill] sm:$0xff] %v11299_v63  ;;  %v11313_v14 = vpop.f32.mrf.mxu1 }
0x105d   :  { %v11303_v52 = vpop.f32.mrf.mxu0  ;;  %11893 = vst [vmem:[#allocation35_spill] sm:$0xff] %v11313_v14 }
0x105e   :  { %11888 = vst [vmem:[#allocation28_spill] sm:$0xff] %v11303_v52  ;;  %v11317_v16 = vpop.f32.mrf.mxu1 }
0x105f   :  { %v11307_v11 = vpop.f32.mrf.mxu0  ;;  %11895 = vst [vmem:[#allocation32_spill] sm:$0xff] %v11317_v16 }
0x1060   :  { %v9502_v23 = vpop.eup %9501  ;;  %11890 = vst [vmem:[#allocation29_spill] sm:$0xff] %v11307_v11  ;;  %v11321_v56 = vpop.f32.mrf.mxu1 }
0x1061   :  { %v5967_v1 = vmul.f32 %v9502_v23, %v9500_v6  ;;  %v11311_v7 = vpop.f32.mrf.mxu0  ;;  %11897 = vst [vmem:[#allocation39_spill] sm:$0xff] %v11321_v56  ;;  %v6010_v6 = vld [vmem:[%s11774_s9] sm:$0xf]  ;;  %v11905_v56 = vld [vmem:[#allocation24_spill] sm:$0xff] }
0x1062   :  { %11892 = vst [vmem:[#allocation34_spill] sm:$0xff] %v11311_v7  ;;  %v11342_v14 = vrot.slane %v6010_v6, %v11905_v56  ;;  %v11351_v44 = vrot.slane %v6010_v6, %v11860_v9  ;;  %v11355_v8 = vrot.slane %v6010_v6, %v11861_v60 }
0x1063   :  { %v5968_v53 = vpack.c.bf16 %v5967_v1, %v5967_v1  ;;  %v11315_v26 = vpop.f32.mrf.mxu0 }
0x1064   :  { %11894 = vst [vmem:[#allocation33_spill] sm:$0xff] %v11315_v26  ;;  %v11335_v26 = vrot.slane %v6010_v6, %v11902_v24 }
0x1065   :  { %5969 = vst [vmem:[#allocation3 + $0x1c] sm:$0xf] %v5968_v53  ;;  %v11319_v59 = vpop.f32.mrf.mxu0 }
0x1066   :  { %11896 = vst [vmem:[#allocation36_spill] sm:$0xff] %v11319_v59 }
0x106c   :  { %v9186_v5 = vld [vmem:[#allocation3 + $0x18] sm:$0xff]  }
0x106d   :  { %6279 = vmatmul.mubr.bf16.gmra.mxu0 %v9186_v5  ;;  %6352 = vmatmul.mubr.bf16.gmra.mxu1 %v9186_v5 }
0x106e   :  { %6622 = vmatprep.mubr.bf16.mxu0 %v11817_v17  ;;  %6663 = vmatprep.mubr.bf16.mxu1 %v11817_v17 }
0x1075   :  { %6623 = vmatmul.mubr.bf16.vlgmr.msra.gmra.mxu0 %v11817_v17  ;;  %6664 = vmatmul.mubr.bf16.vlgmr.msra.gmra.mxu1 %v11817_v17 }
0x1076   :  { %6706 = vmatpush1.bf16.msra.mxu0 %v11142_v12  ;;  %6747 = vmatpush1.bf16.msra.mxu1 %v11144_v13 }
0x1077   :  { %6707 = vmatprep.subr.bf16.mxu0 %v11150_v10  ;;  %6748 = vmatprep.subr.bf16.mxu1 %v11152_v35 }
0x1078   :  { %6737 = vmatprep.mubr.bf16.mxu0 %v11817_v17  ;;  %6778 = vmatprep.mubr.bf16.mxu1 %v11817_v17 }
0x107a   :  { %6708 = vmatpush1.bf16.msra.mxu0 %v11154_v36  ;;  %6749 = vmatpush1.bf16.msra.mxu1 %v11156_v37 }
0x107b   :  { %6709 = vmatprep.subr.bf16.mxu0 %v11162_v38  ;;  %6750 = vmatprep.subr.bf16.mxu1 %v11164_v39 }
0x107e   :  { %6710 = vmatpush1.bf16.msra.mxu0 %v11166_v40  ;;  %6751 = vmatpush1.bf16.msra.mxu1 %v11168_v41 }
0x107f   :  { %6711 = vmatprep.subr.bf16.mxu0 %v11174_v42  ;;  %6752 = vmatprep.subr.bf16.mxu1 %v11176_v45 }
0x1082   :  { %6712 = vmatpush1.bf16.msra.mxu0 %v11178_v29  ;;  %6753 = vmatpush1.bf16.msra.mxu1 %v11180_v58 }
0x1083   :  { %6713 = vmatprep.subr.bf16.mxu0 %v11186_v61  ;;  %6754 = vmatprep.subr.bf16.mxu1 %v11188_v34 }
0x1086   :  { %6714 = vmatpush1.bf16.msra.mxu0 %v11190_v2  ;;  %6755 = vmatpush1.bf16.msra.mxu1 %v11192_v25 }
0x1087   :  { %6715 = vmatprep.subr.bf16.mxu0 %v11194_v43  ;;  %6756 = vmatprep.subr.bf16.mxu1 %v11196_v28 }
0x108a   :  { %6716 = vmatpush1.bf16.msra.mxu0 %v11202_v22  ;;  %6757 = vmatpush1.bf16.msra.mxu1 %v11204_v46 }
0x108b   :  { %6717 = vmatprep.subr.bf16.mxu0 %v11210_v48  ;;  %6758 = vmatprep.subr.bf16.mxu1 %v11212_v49 }
0x108e   :  { %6718 = vmatpush1.bf16.msra.mxu0 %v11214_v20  ;;  %6759 = vmatpush1.bf16.msra.mxu1 %v11216_v50 }
0x108f   :  { %6719 = vmatprep.subr.bf16.mxu0 %v11218_v4  ;;  %6760 = vmatprep.subr.bf16.mxu1 %v11222_v0 }
0x1092   :  { %6720 = vmatpush1.bf16.msra.mxu0 %v11226_v21  ;;  %6761 = vmatpush1.bf16.msra.mxu1 %v11228_v47 }
0x1093   :  { %6820 = vmatprep.subr.bf16.mxu0 %v11138_v57  ;;  %6861 = vmatprep.subr.bf16.mxu1 %v11140_v31 }
0x112d   :  { %v11326_v23 = vpop.f32.mrf.mxu0  ;;  %v11328_v1 = vpop.f32.mrf.mxu1 }
0x112e   :  { %11898 = vst [vmem:[#allocation37_spill] sm:$0xff] %v11326_v23  ;;  %11899 = vst [vmem:[#allocation38_spill] sm:$0xff] %v11328_v1  ;;  %v6251_v1 = vadd.f32 %v6250_v15, %v11335_v26  ;;  %v6326_v15 = vadd.f32 %v6325_v32, %v11351_v44 }
0x112f   :  { %v11330_v53 = vpop.f32.mrf.mxu0  ;;  %v11332_v5 = vpop.f32.mrf.mxu1 }
0x1130   :  { %11900 = vst [vmem:[#allocation42_spill] sm:$0xff] %v11330_v53  ;;  %11901 = vst [vmem:[#allocation43_spill] sm:$0xff] %v11332_v5  ;;  %v6253_v5 = vadd.f32 %v6252_v19, %v11342_v14 }
0x1131   :  { %v11337_v16 = vpop.f32.mrf.mxu0  ;;  %v11339_v59 = vpop.f32.mrf.mxu1 }
0x1132   :  { %11903 = vst [vmem:[#allocation41_spill] sm:$0xff] %v11337_v16  ;;  %11904 = vst [vmem:[#allocation40_spill] sm:$0xff] %v11339_v59 }
0x1133   :  { %v11344_v7 = vpop.f32.mrf.mxu0  ;;  %v11346_v11 = vpop.f32.mrf.mxu1 }
0x1134   :  { %11906 = vst [vmem:[#allocation44_spill] sm:$0xff] %v11344_v7  ;;  %11907 = vst [vmem:[#allocation46_spill] sm:$0xff] %v11346_v11 }
0x1135   :  { %v6624_v23 = vpop.f32.mrf.mxu0  ;;  %v6665_v53 = vpop.f32.mrf.mxu1 }
0x1136   :  { %v6672_v54 = vadd.f32 %v6624_v23, %v6251_v1  ;;  %v6324_v23 = vadd.f32 %v6323_v55, %v11355_v8 }
0x1137   :  { %v6626_v24 = vpop.f32.mrf.mxu0  ;;  %v6667_v30 = vpop.f32.mrf.mxu1 }
0x1138   :  { %v8670_v52 = vmul.f32 -1.442695, %v6672_v54  ;;  %v6673_v16 = vadd.f32 %v6626_v24, %v6253_v5  ;;  %v6675_v19 = vadd.f32 %v6667_v30, %v6326_v15  ;;  %v6255_v15 = vadd.f32 %v11283_v51, %v11335_v26 }
0x1139   :  { %v6628_v63 = vpop.f32.mrf.mxu0  ;;  %v6669_v59 = vpop.f32.mrf.mxu1  ;;  %v6330_v51 = vadd.f32 %v11289_v62, %v11351_v44 }
0x113a   :  { %9503 = vpow2.f32 %v8670_v52  ;;  %v8671_v56 = vmul.f32 -1.442695, %v6673_v16  ;;  %v8672_v54 = vmul.f32 -1.442695, %v6675_v19  ;;  %v6674_v63 = vadd.f32 %v6665_v53, %v6324_v23 }
0x113b   :  { %v6629_v7 = vpop.f32.mrf.mxu0  ;;  %v6670_v11 = vpop.f32.mrf.mxu1 }
0x113c   :  { %9505 = vpow2.f32 %v8671_v56 }
0x113d   :  { %9507 = vpow2.f32 %v8672_v54  ;;  %v6257_v54 = vadd.f32 %v11287_v3, %v11342_v14 }
0x1147   :  { %v9504_v24 = vpop.eup %9503 }
0x1148   :  { %v6679_v59 = vadd.f32 1.0, %v9504_v24 }
0x1149   :  { %v9506_v52 = vpop.eup %9505 }
0x114a   :  { %9509 = vrcp.f32 %v6679_v59  ;;  %v6685_v9 = vadd.f32 1.0, %v9506_v52  ;;  %v9508_v11 = vpop.eup %9507 }
0x114b   :  { %9511 = vtanh.f32 %v6674_v63  ;;  %v6692_v56 = vadd.f32 1.0, %v9508_v11 }
0x114c   :  { %9513 = vrcp.f32 %v6685_v9 }
0x114d   :  { %9515 = vrcp.f32 %v6692_v56 }
0x1157   :  { %v9510_v7 = vpop.eup %9509 }
0x1158   :  { %v9512_v16 = vpop.eup %9511 }
0x1159   :  { %v9514_v32 = vpop.eup %9513  ;;  %v6696_v6 = vmul.f32 %v9512_v16, %v9510_v7 }
0x115a   :  { %v6695_v60 = vmul.f32 0.0, %v9514_v32  ;;  %v9516_v55 = vpop.eup %9515 }
0x115c   :  { %v11358_v30 = vadd.f32 %v6696_v6, %v6695_v60  ;;  %v6328_v6 = vadd.f32 %v11285_v27, %v11355_v8 }
0x115e   :  { %9517 = vtanh.f32 %v11358_v30 }
0x116b   :  { %v9518_v1 = vpop.eup %9517 }
0x116c   :  { %v6699_v53 = vmul.f32 %v9518_v1, %v9516_v55 }
0x116e   :  { %v6704_v5 = vpack.c.bf16 %v6699_v53, %v6699_v53 }
0x1170   :  { %6738 = vmatmul.mubr.bf16.vlgmr.msra.gmra.mxu0 %v6704_v5  ;;  %6779 = vmatmul.mubr.bf16.vlgmr.msra.gmra.mxu1 %v6704_v5 }
0x1171   :  { %6821 = vmatpush1.bf16.msra.mxu0 %v11142_v12  ;;  %6862 = vmatpush1.bf16.msra.mxu1 %v11144_v13 }
0x1172   :  { %6822 = vmatprep.subr.bf16.mxu0 %v11150_v10  ;;  %6863 = vmatprep.subr.bf16.mxu1 %v11152_v35 }
0x1173   :  { %6852 = vmatprep.mubr.bf16.mxu0 %v11817_v17  ;;  %6893 = vmatprep.mubr.bf16.mxu1 %v11817_v17 }
0x1175   :  { %6823 = vmatpush1.bf16.msra.mxu0 %v11154_v36  ;;  %6864 = vmatpush1.bf16.msra.mxu1 %v11156_v37 }
0x1176   :  { %6824 = vmatprep.subr.bf16.mxu0 %v11162_v38  ;;  %6865 = vmatprep.subr.bf16.mxu1 %v11164_v39 }
0x1179   :  { %6825 = vmatpush1.bf16.msra.mxu0 %v11166_v40  ;;  %6866 = vmatpush1.bf16.msra.mxu1 %v11168_v41 }
0x117a   :  { %6826 = vmatprep.subr.bf16.mxu0 %v11174_v42  ;;  %6867 = vmatprep.subr.bf16.mxu1 %v11176_v45 }
0x117d   :  { %6827 = vmatpush1.bf16.msra.mxu0 %v11178_v29  ;;  %6868 = vmatpush1.bf16.msra.mxu1 %v11180_v58 }
0x117e   :  { %6828 = vmatprep.subr.bf16.mxu0 %v11186_v61  ;;  %6869 = vmatprep.subr.bf16.mxu1 %v11188_v34 }
0x1181   :  { %6829 = vmatpush1.bf16.msra.mxu0 %v11190_v2  ;;  %6870 = vmatpush1.bf16.msra.mxu1 %v11192_v25 }
0x1182   :  { %6830 = vmatprep.subr.bf16.mxu0 %v11194_v43  ;;  %6871 = vmatprep.subr.bf16.mxu1 %v11196_v28 }
0x1185   :  { %6831 = vmatpush1.bf16.msra.mxu0 %v11202_v22  ;;  %6872 = vmatpush1.bf16.msra.mxu1 %v11204_v46 }
0x1186   :  { %6832 = vmatprep.subr.bf16.mxu0 %v11210_v48  ;;  %6873 = vmatprep.subr.bf16.mxu1 %v11212_v49 }
0x1189   :  { %6833 = vmatpush1.bf16.msra.mxu0 %v11214_v20  ;;  %6874 = vmatpush1.bf16.msra.mxu1 %v11216_v50 }
0x118a   :  { %6834 = vmatprep.subr.bf16.mxu0 %v11218_v4  ;;  %6875 = vmatprep.subr.bf16.mxu1 %v11222_v0 }
0x118d   :  { %6835 = vmatpush1.bf16.msra.mxu0 %v11226_v21  ;;  %6876 = vmatpush1.bf16.msra.mxu1 %v11228_v47 }
0x118e   :  { %6935 = vmatprep.subr.bf16.mxu0 %v11138_v57  ;;  %6976 = vmatprep.subr.bf16.mxu1 %v11140_v31 }
0x1230   :  { %v6739_v19 = vpop.f32.mrf.mxu0  ;;  %v6780_v23 = vpop.f32.mrf.mxu1 }
0x1231   :  { %v6787_v24 = vadd.f32 %v6739_v19, %v6255_v15  ;;  %v6789_v3 = vadd.f32 %v6780_v23, %v6328_v6 }
0x1232   :  { %v6741_v63 = vpop.f32.mrf.mxu0  ;;  %v6782_v59 = vpop.f32.mrf.mxu1 }
0x1233   :  { %v8673_v52 = vmul.f32 -1.442695, %v6787_v24  ;;  %v6788_v9 = vadd.f32 %v6741_v63, %v6257_v54  ;;  %v6790_v60 = vadd.f32 %v6782_v59, %v6330_v51 }
0x1234   :  { %v6743_v11 = vpop.f32.mrf.mxu0  ;;  %v6784_v7 = vpop.f32.mrf.mxu1 }
0x1235   :  { %9519 = vpow2.f32 %v8673_v52  ;;  %v8674_v16 = vmul.f32 -1.442695, %v6788_v9  ;;  %v8675_v55 = vmul.f32 -1.442695, %v6790_v60 }
0x1236   :  { %v6744_v32 = vpop.f32.mrf.mxu0  ;;  %v6785_v56 = vpop.f32.mrf.mxu1 }
0x1237   :  { %9521 = vpow2.f32 %v8674_v16  ;;  %v6263_v56 = vadd.f32 %v11295_v18, %v11342_v14 }
0x1238   :  { %9523 = vtanh.f32 %v6789_v3 }
0x1239   :  { %9525 = vpow2.f32 %v8675_v55 }
0x1242   :  { %v9520_v1 = vpop.eup %9519 }
0x1243   :  { %v6794_v53 = vadd.f32 1.0, %v9520_v1 }
0x1244   :  { %v9522_v5 = vpop.eup %9521 }
0x1245   :  { %9527 = vrcp.f32 %v6794_v53  ;;  %v6800_v15 = vadd.f32 1.0, %v9522_v5  ;;  %v9524_v19 = vpop.eup %9523 }
0x1246   :  { %v9526_v54 = vpop.eup %9525 }
0x1247   :  { %9529 = vrcp.f32 %v6800_v15  ;;  %v6807_v62 = vadd.f32 1.0, %v9526_v54  ;;  %v11908_v54 = vld [vmem:[#allocation22_spill] sm:$0xff] }
0x1249   :  { %9531 = vrcp.f32 %v6807_v62 }
0x1252   :  { %v9528_v24 = vpop.eup %9527 }
0x1253   :  { %v6811_v63 = vmul.f32 %v9528_v24, %v9524_v19 }
0x1254   :  { %v9530_v52 = vpop.eup %9529 }
0x1255   :  { %v6810_v59 = vmul.f32 %v9530_v52, %v11358_v30  ;;  %v6261_v30 = vadd.f32 %v11291_v33, %v11335_v26  ;;  %v6336_v33 = vadd.f32 %v11908_v54, %v11351_v44  ;;  %v11911_v54 = vld [vmem:[#allocation28_spill] sm:$0xff] }
0x1256   :  { %v9532_v27 = vpop.eup %9531 }
0x1257   :  { %v11404_v9 = vadd.f32 %v6811_v63, %v6810_v59  ;;  %v11909_v63 = vld [vmem:[#allocation25_spill] sm:$0xff] }
0x1258   :  { %v6334_v52 = vadd.f32 %v11909_v63, %v11355_v8 }
0x1259   :  { %9533 = vtanh.f32 %v11404_v9 }
0x1266   :  { %v9534_v23 = vpop.eup %9533 }
0x1267   :  { %v6814_v11 = vmul.f32 %v9534_v23, %v9532_v27 }
0x1269   :  { %v6819_v7 = vpack.c.bf16 %v6814_v11, %v6814_v11 }
0x126b   :  { %6853 = vmatmul.mubr.bf16.vlgmr.msra.gmra.mxu0 %v6819_v7  ;;  %6894 = vmatmul.mubr.bf16.vlgmr.msra.gmra.mxu1 %v6819_v7 }
0x126c   :  { %6936 = vmatpush1.bf16.msra.mxu0 %v11142_v12  ;;  %6977 = vmatpush1.bf16.msra.mxu1 %v11144_v13 }
0x126d   :  { %6937 = vmatprep.subr.bf16.mxu0 %v11150_v10  ;;  %6978 = vmatprep.subr.bf16.mxu1 %v11152_v35 }
0x126e   :  { %6967 = vmatprep.mubr.bf16.mxu0 %v11817_v17  ;;  %7008 = vmatprep.mubr.bf16.mxu1 %v11817_v17 }
0x1270   :  { %6938 = vmatpush1.bf16.msra.mxu0 %v11154_v36  ;;  %6979 = vmatpush1.bf16.msra.mxu1 %v11156_v37 }
0x1271   :  { %6939 = vmatprep.subr.bf16.mxu0 %v11162_v38  ;;  %6980 = vmatprep.subr.bf16.mxu1 %v11164_v39 }
0x1274   :  { %6940 = vmatpush1.bf16.msra.mxu0 %v11166_v40  ;;  %6981 = vmatpush1.bf16.msra.mxu1 %v11168_v41 }
0x1275   :  { %6941 = vmatprep.subr.bf16.mxu0 %v11174_v42  ;;  %6982 = vmatprep.subr.bf16.mxu1 %v11176_v45 }
0x1278   :  { %6942 = vmatpush1.bf16.msra.mxu0 %v11178_v29  ;;  %6983 = vmatpush1.bf16.msra.mxu1 %v11180_v58 }
0x1279   :  { %6943 = vmatprep.subr.bf16.mxu0 %v11186_v61  ;;  %6984 = vmatprep.subr.bf16.mxu1 %v11188_v34 }
0x127c   :  { %6944 = vmatpush1.bf16.msra.mxu0 %v11190_v2  ;;  %6985 = vmatpush1.bf16.msra.mxu1 %v11192_v25 }
0x127d   :  { %6945 = vmatprep.subr.bf16.mxu0 %v11194_v43  ;;  %6986 = vmatprep.subr.bf16.mxu1 %v11196_v28 }
0x1280   :  { %6946 = vmatpush1.bf16.msra.mxu0 %v11202_v22  ;;  %6987 = vmatpush1.bf16.msra.mxu1 %v11204_v46 }
0x1281   :  { %6947 = vmatprep.subr.bf16.mxu0 %v11210_v48  ;;  %6988 = vmatprep.subr.bf16.mxu1 %v11212_v49 }
0x1284   :  { %6948 = vmatpush1.bf16.msra.mxu0 %v11214_v20  ;;  %6989 = vmatpush1.bf16.msra.mxu1 %v11216_v50 }
0x1285   :  { %6949 = vmatprep.subr.bf16.mxu0 %v11218_v4  ;;  %6990 = vmatprep.subr.bf16.mxu1 %v11222_v0 }
0x1288   :  { %6950 = vmatpush1.bf16.msra.mxu0 %v11226_v21  ;;  %6991 = vmatpush1.bf16.msra.mxu1 %v11228_v47 }
0x1289   :  { %7050 = vmatprep.subr.bf16.mxu0 %v11138_v57  ;;  %7091 = vmatprep.subr.bf16.mxu1 %v11140_v31 }
0x132b   :  { %v6854_v16 = vpop.f32.mrf.mxu0  ;;  %v6895_v32 = vpop.f32.mrf.mxu1 }
0x132c   :  { %v6902_v51 = vadd.f32 %v6854_v16, %v6261_v30  ;;  %v6904_v18 = vadd.f32 %v6895_v32, %v6334_v52 }
0x132d   :  { %v6856_v60 = vpop.f32.mrf.mxu0  ;;  %v6897_v6 = vpop.f32.mrf.mxu1 }
0x132e   :  { %v8676_v3 = vmul.f32 -1.442695, %v6902_v51  ;;  %v6903_v55 = vadd.f32 %v6856_v60, %v6263_v56  ;;  %v6905_v24 = vadd.f32 %v6897_v6, %v6336_v33  ;;  %v6267_v33 = vadd.f32 %v11911_v54, %v11342_v14 }
0x132f   :  { %v6858_v1 = vpop.f32.mrf.mxu0  ;;  %v6899_v53 = vpop.f32.mrf.mxu1 }
0x1330   :  { %9535 = vpow2.f32 %v8676_v3  ;;  %v8677_v5 = vmul.f32 -1.442695, %v6903_v55  ;;  %v8678_v62 = vmul.f32 -1.442695, %v6905_v24 }
0x1331   :  { %v6859_v15 = vpop.f32.mrf.mxu0  ;;  %v6900_v19 = vpop.f32.mrf.mxu1 }
0x1332   :  { %9537 = vpow2.f32 %v8677_v5 }
0x1333   :  { %9539 = vtanh.f32 %v6904_v18 }
0x1334   :  { %9541 = vpow2.f32 %v8678_v62 }
0x133d   :  { %v9536_v59 = vpop.eup %9535 }
0x133e   :  { %v6909_v27 = vadd.f32 1.0, %v9536_v59 }
0x133f   :  { %v9538_v23 = vpop.eup %9537 }
0x1340   :  { %9543 = vrcp.f32 %v6909_v27  ;;  %v6915_v11 = vadd.f32 1.0, %v9538_v23  ;;  %v9540_v7 = vpop.eup %9539 }
0x1341   :  { %v9542_v30 = vpop.eup %9541 }
0x1342   :  { %9545 = vrcp.f32 %v6915_v11  ;;  %v6922_v60 = vadd.f32 1.0, %v9542_v30  ;;  %v11912_v30 = vld [vmem:[#allocation31_spill] sm:$0xff] }
0x1344   :  { %9547 = vrcp.f32 %v6922_v60 }
0x134d   :  { %v9544_v16 = vpop.eup %9543 }
0x134e   :  { %v6926_v56 = vmul.f32 %v9544_v16, %v9540_v7  ;;  %v6340_v16 = vadd.f32 %v11912_v30, %v11351_v44 }
0x134f   :  { %v9546_v51 = vpop.eup %9545 }
0x1350   :  { %v6925_v6 = vmul.f32 %v9546_v51, %v11404_v9  ;;  %v11910_v9 = vld [vmem:[#allocation26_spill] sm:$0xff]  ;;  %v11913_v51 = vld [vmem:[#allocation27_spill] sm:$0xff] }
0x1351   :  { %v9548_v32 = vpop.eup %9547  ;;  %v6265_v5 = vadd.f32 %v11910_v9, %v11335_v26  ;;  %v6338_v60 = vadd.f32 %v11913_v51, %v11355_v8  ;;  %v11545_v51 = vld [vmem:[#allocation12 + $0xe0] ss:$16 sps:$4 sm:$0xff]  }
0x1352   :  { %v11450_v3 = vadd.f32 %v6926_v56, %v6925_v6 }
0x1354   :  { %9549 = vtanh.f32 %v11450_v3 }
0x1361   :  { %v9550_v55 = vpop.eup %9549 }
0x1362   :  { %v6929_v1 = vmul.f32 %v9550_v55, %v9548_v32 }
0x1364   :  { %v6934_v53 = vpack.c.bf16 %v6929_v1, %v6929_v1 }
0x1366   :  { %6968 = vmatmul.mubr.bf16.vlgmr.msra.gmra.mxu0 %v6934_v53  ;;  %7009 = vmatmul.mubr.bf16.vlgmr.msra.gmra.mxu1 %v6934_v53 }
0x1367   :  { %7051 = vmatpush1.bf16.msra.mxu0 %v11142_v12  ;;  %7092 = vmatpush1.bf16.msra.mxu1 %v11144_v13 }
0x1368   :  { %7052 = vmatprep.subr.bf16.mxu0 %v11150_v10  ;;  %7093 = vmatprep.subr.bf16.mxu1 %v11152_v35 }
0x1369   :  { %7082 = vmatprep.mubr.bf16.mxu0 %v11817_v17  ;;  %7123 = vmatprep.mubr.bf16.mxu1 %v11817_v17 }
0x136b   :  { %7053 = vmatpush1.bf16.msra.mxu0 %v11154_v36  ;;  %7094 = vmatpush1.bf16.msra.mxu1 %v11156_v37 }
0x136c   :  { %7054 = vmatprep.subr.bf16.mxu0 %v11162_v38  ;;  %7095 = vmatprep.subr.bf16.mxu1 %v11164_v39 }
0x136f   :  { %7055 = vmatpush1.bf16.msra.mxu0 %v11166_v40  ;;  %7096 = vmatpush1.bf16.msra.mxu1 %v11168_v41 }
0x1370   :  { %7056 = vmatprep.subr.bf16.mxu0 %v11174_v42  ;;  %7097 = vmatprep.subr.bf16.mxu1 %v11176_v45 }
0x1373   :  { %7057 = vmatpush1.bf16.msra.mxu0 %v11178_v29  ;;  %7098 = vmatpush1.bf16.msra.mxu1 %v11180_v58 }
0x1374   :  { %7058 = vmatprep.subr.bf16.mxu0 %v11186_v61  ;;  %7099 = vmatprep.subr.bf16.mxu1 %v11188_v34 }
0x1377   :  { %7059 = vmatpush1.bf16.msra.mxu0 %v11190_v2  ;;  %7100 = vmatpush1.bf16.msra.mxu1 %v11192_v25 }
0x1378   :  { %7060 = vmatprep.subr.bf16.mxu0 %v11194_v43  ;;  %7101 = vmatprep.subr.bf16.mxu1 %v11196_v28 }
0x137b   :  { %7061 = vmatpush1.bf16.msra.mxu0 %v11202_v22  ;;  %7102 = vmatpush1.bf16.msra.mxu1 %v11204_v46 }
0x137c   :  { %7062 = vmatprep.subr.bf16.mxu0 %v11210_v48  ;;  %7103 = vmatprep.subr.bf16.mxu1 %v11212_v49 }
0x137f   :  { %7063 = vmatpush1.bf16.msra.mxu0 %v11214_v20  ;;  %7104 = vmatpush1.bf16.msra.mxu1 %v11216_v50 }
0x1380   :  { %7064 = vmatprep.subr.bf16.mxu0 %v11218_v4  ;;  %7105 = vmatprep.subr.bf16.mxu1 %v11222_v0 }
0x1383   :  { %7065 = vmatpush1.bf16.msra.mxu0 %v11226_v21  ;;  %7106 = vmatpush1.bf16.msra.mxu1 %v11228_v47 }
0x1384   :  { %7165 = vmatprep.subr.bf16.mxu0 %v11138_v57  ;;  %7206 = vmatprep.subr.bf16.mxu1 %v11140_v31 }
0x1426   :  { %v6969_v15 = vpop.f32.mrf.mxu0  ;;  %v7010_v19 = vpop.f32.mrf.mxu1 }
0x1427   :  { %v7017_v24 = vadd.f32 %v6969_v15, %v6265_v5  ;;  %v7019_v6 = vadd.f32 %v7010_v19, %v6338_v60  ;;  %v11548_v60 = vld [vmem:[#allocation12 + $0xe8] ss:$16 sps:$4 sm:$0xff]  }
0x1428   :  { %v6971_v63 = vpop.f32.mrf.mxu0  ;;  %v7012_v52 = vpop.f32.mrf.mxu1 }
0x1429   :  { %v8679_v18 = vmul.f32 -1.442695, %v7017_v24  ;;  %v7018_v62 = vadd.f32 %v6971_v63, %v6267_v33  ;;  %v7020_v56 = vadd.f32 %v7012_v52, %v6340_v16 }
0x142a   :  { %v6973_v59 = vpop.f32.mrf.mxu0  ;;  %v7014_v27 = vpop.f32.mrf.mxu1 }
0x142b   :  { %9551 = vpow2.f32 %v8679_v18  ;;  %v8680_v23 = vmul.f32 -1.442695, %v7018_v62  ;;  %v8681_v32 = vmul.f32 -1.442695, %v7020_v56 }
0x142c   :  { %v6974_v11 = vpop.f32.mrf.mxu0  ;;  %v7015_v7 = vpop.f32.mrf.mxu1 }
0x142d   :  { %9553 = vpow2.f32 %v8680_v23 }
0x142e   :  { %9555 = vtanh.f32 %v7019_v6  ;;  %v11551_v6 = vld [vmem:[#allocation12 + $0xc4] ss:$16 sps:$4 sm:$0xff]  }
0x142f   :  { %9557 = vpow2.f32 %v8681_v32  ;;  %v11554_v32 = vld [vmem:[#allocation12 + $0xcc] ss:$16 sps:$4 sm:$0xff]  }
0x1438   :  { %v9552_v55 = vpop.eup %9551 }
0x1439   :  { %v7024_v1 = vadd.f32 1.0, %v9552_v55  ;;  %v11559_v55 = vld [vmem:[#allocation12 + $0xc0] ss:$16 sps:$4 sm:$0xff]  }
0x143a   :  { %v9554_v53 = vpop.eup %9553 }
0x143b   :  { %9559 = vrcp.f32 %v7024_v1  ;;  %v7030_v9 = vadd.f32 1.0, %v9554_v53  ;;  %v9556_v5 = vpop.eup %9555  ;;  %v11562_v1 = vld [vmem:[#allocation12 + $0xc8] ss:$16 sps:$4 sm:$0xff]   ;;  %v11565_v53 = vld [vmem:[#allocation12 + $0xa4] ss:$16 sps:$4 sm:$0xff]  }
0x143c   :  { %v9558_v15 = vpop.eup %9557 }
0x143d   :  { %9561 = vrcp.f32 %v7030_v9  ;;  %v7037_v63 = vadd.f32 1.0, %v9558_v15  ;;  %v11568_v9 = vld [vmem:[#allocation12 + $0xac] ss:$16 sps:$4 sm:$0xff]   ;;  %v11574_v15 = vld [vmem:[#allocation12 + $0xa8] ss:$16 sps:$4 sm:$0xff]  }
0x143f   :  { %9563 = vrcp.f32 %v7037_v63  ;;  %v11586_v63 = vld [vmem:[#allocation12 + $0x88] ss:$16 sps:$4 sm:$0xff]  }
0x1448   :  { %v9560_v54 = vpop.eup %9559 }
0x1449   :  { %v7041_v33 = vmul.f32 %v9560_v54, %v9556_v5  ;;  %v11571_v5 = vld [vmem:[#allocation12 + $0xa0] ss:$16 sps:$4 sm:$0xff]   ;;  %v11577_v54 = vld [vmem:[#allocation12 + $0x84] ss:$16 sps:$4 sm:$0xff]  }
0x144a   :  { %v9562_v24 = vpop.eup %9561 }
0x144b   :  { %v7040_v52 = vmul.f32 %v9562_v24, %v11450_v3  ;;  %v11583_v24 = vld [vmem:[#allocation12 + $0x80] ss:$16 sps:$4 sm:$0xff]  }
0x144c   :  { %v9564_v19 = vpop.eup %9563 }
0x144d   :  { %v11496_v18 = vadd.f32 %v7041_v33, %v7040_v52  ;;  %v11580_v33 = vld [vmem:[#allocation12 + $0x8c] ss:$16 sps:$4 sm:$0xff]   ;;  %v11589_v52 = vld [vmem:[#allocation12 + $0x64] ss:$16 sps:$4 sm:$0xff]  }
0x144f   :  { %9565 = vtanh.f32 %v11496_v18 }
0x145c   :  { %v9566_v62 = vpop.eup %9565 }
0x145d   :  { %v7044_v59 = vmul.f32 %v9566_v62, %v9564_v19  ;;  %v11595_v19 = vld [vmem:[#allocation12 + $0x60] ss:$16 sps:$4 sm:$0xff]   ;;  %v11598_v62 = vld [vmem:[#allocation12 + $0x68] ss:$16 sps:$4 sm:$0xff]  }
0x145f   :  { %v7049_v27 = vpack.c.bf16 %v7044_v59, %v7044_v59  ;;  %v11601_v59 = vld [vmem:[#allocation12 + $0x44] ss:$16 sps:$4 sm:$0xff]  }
0x1461   :  { %7083 = vmatmul.mubr.bf16.vlgmr.msra.gmra.mxu0 %v7049_v27  ;;  %7124 = vmatmul.mubr.bf16.vlgmr.msra.gmra.mxu1 %v7049_v27  ;;  %v11604_v27 = vld [vmem:[#allocation12 + $0x4c] ss:$16 sps:$4 sm:$0xff]  }
0x1462   :  { %7166 = vmatpush1.bf16.msra.mxu0 %v11142_v12  ;;  %7207 = vmatpush1.bf16.msra.mxu1 %v11144_v13  ;;  %v11914_v12 = vld [vmem:[#allocation29_spill] sm:$0xff] }
0x1463   :  { %7167 = vmatprep.subr.bf16.mxu0 %v11150_v10  ;;  %7208 = vmatprep.subr.bf16.mxu1 %v11152_v35  ;;  %v6271_v13 = vadd.f32 %v11914_v12, %v11335_v26  ;;  %v11607_v12 = vld [vmem:[#allocation12 + $0x40] ss:$16 sps:$4 sm:$0xff]  }
0x1464   :  { %7197 = vmatprep.mubr.bf16.mxu0 %v11817_v17  ;;  %7238 = vmatprep.mubr.bf16.mxu1 %v11817_v17 }
0x1466   :  { %7168 = vmatpush1.bf16.msra.mxu0 %v11154_v36  ;;  %7209 = vmatpush1.bf16.msra.mxu1 %v11156_v37  ;;  %v11915_v36 = vld [vmem:[#allocation34_spill] sm:$0xff] }
0x1467   :  { %7169 = vmatprep.subr.bf16.mxu0 %v11162_v38  ;;  %7210 = vmatprep.subr.bf16.mxu1 %v11164_v39  ;;  %v6273_v37 = vadd.f32 %v11915_v36, %v11342_v14  ;;  %v11619_v36 = vld [vmem:[#allocation12 + $0x20] ss:$16 sps:$4 sm:$0xff]  }
0x146a   :  { %7170 = vmatpush1.bf16.msra.mxu0 %v11166_v40  ;;  %7211 = vmatpush1.bf16.msra.mxu1 %v11168_v41 }
0x146b   :  { %7171 = vmatprep.subr.bf16.mxu0 %v11174_v42  ;;  %7212 = vmatprep.subr.bf16.mxu1 %v11176_v45 }
0x146e   :  { %7172 = vmatpush1.bf16.msra.mxu0 %v11178_v29  ;;  %7213 = vmatpush1.bf16.msra.mxu1 %v11180_v58 }
0x146f   :  { %7173 = vmatprep.subr.bf16.mxu0 %v11186_v61  ;;  %7214 = vmatprep.subr.bf16.mxu1 %v11188_v34 }
0x1472   :  { %7174 = vmatpush1.bf16.msra.mxu0 %v11190_v2  ;;  %7215 = vmatpush1.bf16.msra.mxu1 %v11192_v25  ;;  %v11917_v25 = vld [vmem:[#allocation30_spill] sm:$0xff] }
0x1473   :  { %7175 = vmatprep.subr.bf16.mxu0 %v11194_v43  ;;  %7216 = vmatprep.subr.bf16.mxu1 %v11196_v28  ;;  %v6344_v43 = vadd.f32 %v11917_v25, %v11355_v8 }
0x1476   :  { %7176 = vmatpush1.bf16.msra.mxu0 %v11202_v22  ;;  %7217 = vmatpush1.bf16.msra.mxu1 %v11204_v46 }
0x1477   :  { %7177 = vmatprep.subr.bf16.mxu0 %v11210_v48  ;;  %7218 = vmatprep.subr.bf16.mxu1 %v11212_v49 }
0x147a   :  { %7178 = vmatpush1.bf16.msra.mxu0 %v11214_v20  ;;  %7219 = vmatpush1.bf16.msra.mxu1 %v11216_v50 }
0x147b   :  { %7179 = vmatprep.subr.bf16.mxu0 %v11218_v4  ;;  %7220 = vmatprep.subr.bf16.mxu1 %v11222_v0 }
0x147e   :  { %7180 = vmatpush1.bf16.msra.mxu0 %v11226_v21  ;;  %7221 = vmatpush1.bf16.msra.mxu1 %v11228_v47 }
0x147f   :  { %7280 = vmatprep.subr.bf16.mxu0 %v11138_v57  ;;  %7321 = vmatprep.subr.bf16.mxu1 %v11140_v31  ;;  %v11916_v31 = vld [vmem:[#allocation35_spill] sm:$0xff] }
0x1480   :  { %v6346_v34 = vadd.f32 %v11916_v31, %v11351_v44  ;;  %v11919_v31 = vld [vmem:[#allocation36_spill] sm:$0xff] }
0x1521   :  { %v7084_v10 = vpop.f32.mrf.mxu0  ;;  %v7125_v35 = vpop.f32.mrf.mxu1 }
0x1522   :  { %v7132_v38 = vadd.f32 %v7084_v10, %v6271_v13  ;;  %v7134_v28 = vadd.f32 %v7125_v35, %v6344_v43  ;;  %v11610_v13 = vld [vmem:[#allocation12 + $0x48] ss:$16 sps:$4 sm:$0xff]   ;;  %v11613_v10 = vld [vmem:[#allocation12 + $0x24] ss:$16 sps:$4 sm:$0xff]   ;;  %v11616_v35 = vld [vmem:[#allocation12 + $0x2c] ss:$16 sps:$4 sm:$0xff]  }
0x1523   :  { %v7086_v39 = vpop.f32.mrf.mxu0  ;;  %v7127_v40 = vpop.f32.mrf.mxu1 }
0x1524   :  { %v8682_v41 = vmul.f32 -1.442695, %v7132_v38  ;;  %v7133_v42 = vadd.f32 %v7086_v39, %v6273_v37  ;;  %v7135_v2 = vadd.f32 %v7127_v40, %v6346_v34  ;;  %v11622_v37 = vld [vmem:[#allocation12 + $0x28] ss:$16 sps:$4 sm:$0xff]   ;;  %v11625_v38 = vld [vmem:[#allocation12 + $0x4] ss:$16 sps:$4 sm:$0xff]   ;;  %v6277_v34 = vadd.f32 %v11919_v31, %v11342_v14 }
0x1525   :  { %v7088_v45 = vpop.f32.mrf.mxu0  ;;  %v7129_v29 = vpop.f32.mrf.mxu1  ;;  %v11628_v39 = vld [vmem:[#allocation12 + $0xc] ss:$16 sps:$4 sm:$0xff]   ;;  %v11631_v40 = vld [vmem:[#allocation12] ss:$16 sps:$4 sm:$0xff]  }
0x1526   :  { %9567 = vpow2.f32 %v8682_v41  ;;  %v8683_v58 = vmul.f32 -1.442695, %v7133_v42  ;;  %v8684_v22 = vmul.f32 -1.442695, %v7135_v2  ;;  %v11634_v41 = vld [vmem:[#allocation12 + $0x8] ss:$16 sps:$4 sm:$0xff]  }
0x1527   :  { %v7089_v57 = vpop.f32.mrf.mxu0  ;;  %v7130_v61 = vpop.f32.mrf.mxu1  ;;  %v9697_v42 = vld [vmem:[#allocation12 + $0xe4] ss:$16 sps:$4 sm:$0xff]   ;;  %v9698_v45 = vld [vmem:[#allocation12 + $0xec] ss:$16 sps:$4 sm:$0xff]  }
0x1528   :  { %9569 = vpow2.f32 %v8683_v58  ;;  %v11918_v29 = vld [vmem:[#allocation33_spill] sm:$0xff] }
0x1529   :  { %9571 = vtanh.f32 %v7134_v28  ;;  %v6275_v58 = vadd.f32 %v11918_v29, %v11335_v26 }
0x152a   :  { %9573 = vpow2.f32 %v8684_v22 }
0x1533   :  { %v9568_v46 = vpop.eup %9567 }
0x1534   :  { %v7139_v48 = vadd.f32 1.0, %v9568_v46 }
0x1535   :  { %v9570_v49 = vpop.eup %9569 }
0x1536   :  { %9575 = vrcp.f32 %v7139_v48  ;;  %v7145_v20 = vadd.f32 1.0, %v9570_v49  ;;  %v9572_v50 = vpop.eup %9571 }
0x1537   :  { %v9574_v4 = vpop.eup %9573 }
0x1538   :  { %9577 = vrcp.f32 %v7145_v20  ;;  %v7152_v3 = vadd.f32 1.0, %v9574_v4  ;;  %v11920_v4 = vld [vmem:[#allocation39_spill] sm:$0xff] }
0x153a   :  { %9579 = vrcp.f32 %v7152_v3 }
0x1543   :  { %v9576_v0 = vpop.eup %9575 }
0x1544   :  { %v7156_v21 = vmul.f32 %v9576_v0, %v9572_v50  ;;  %v6350_v0 = vadd.f32 %v11920_v4, %v11351_v44 }
0x1545   :  { %v9578_v47 = vpop.eup %9577 }
0x1546   :  { %v7155_v23 = vmul.f32 %v9578_v47, %v11496_v18  ;;  %v11592_v18 = vld [vmem:[#allocation12 + $0x6c] ss:$16 sps:$4 sm:$0xff]   ;;  %v11921_v47 = vld [vmem:[#allocation32_spill] sm:$0xff] }
0x1547   :  { %v9580_v7 = vpop.eup %9579  ;;  %v6348_v3 = vadd.f32 %v11921_v47, %v11355_v8  ;;  %v9201_v47 = vld [vmem:[%s11775_s10 + $0x74] ss:$8 sps:$4 sm:$0xff]  }
0x1548   :  { %v11542_v11 = vadd.f32 %v7156_v21, %v7155_v23 }
0x154a   :  { %9581 = vtanh.f32 %v11542_v11 }
0x1557   :  { %v9582_v30 = vpop.eup %9581 }
0x1558   :  { %v7159_v16 = vmul.f32 %v9582_v30, %v9580_v7 }
0x155a   :  { %v7164_v56 = vpack.c.bf16 %v7159_v16, %v7159_v16 }
0x155c   :  { %7198 = vmatmul.mubr.bf16.vlgmr.msra.gmra.mxu0 %v7164_v56  ;;  %7239 = vmatmul.mubr.bf16.vlgmr.msra.gmra.mxu1 %v7164_v56 }
0x155d   :  { %7281 = vmatpush1.bf16.msra.mxu0 %v11545_v51  ;;  %7322 = vmatpush1.bf16.msra.mxu1 %v11548_v60 }
0x155e   :  { %7282 = vmatprep.subr.bf16.mxu0 %v11551_v6  ;;  %7323 = vmatprep.subr.bf16.mxu1 %v11554_v32 }
0x155f   :  { %7312 = vmatprep.mubr.bf16.mxu0 %v11817_v17  ;;  %7353 = vmatprep.mubr.bf16.mxu1 %v11817_v17 }
0x1561   :  { %7283 = vmatpush1.bf16.msra.mxu0 %v11559_v55  ;;  %7324 = vmatpush1.bf16.msra.mxu1 %v11562_v1 }
0x1562   :  { %7284 = vmatprep.subr.bf16.mxu0 %v11565_v53  ;;  %7325 = vmatprep.subr.bf16.mxu1 %v11568_v9 }
0x1565   :  { %7285 = vmatpush1.bf16.msra.mxu0 %v11571_v5  ;;  %7326 = vmatpush1.bf16.msra.mxu1 %v11574_v15 }
0x1566   :  { %7286 = vmatprep.subr.bf16.mxu0 %v11577_v54  ;;  %7327 = vmatprep.subr.bf16.mxu1 %v11580_v33 }
0x1569   :  { %7287 = vmatpush1.bf16.msra.mxu0 %v11583_v24  ;;  %7328 = vmatpush1.bf16.msra.mxu1 %v11586_v63 }
0x156a   :  { %7288 = vmatprep.subr.bf16.mxu0 %v11589_v52  ;;  %7329 = vmatprep.subr.bf16.mxu1 %v11592_v18 }
0x156d   :  { %7289 = vmatpush1.bf16.msra.mxu0 %v11595_v19  ;;  %7330 = vmatpush1.bf16.msra.mxu1 %v11598_v62 }
0x156e   :  { %7290 = vmatprep.subr.bf16.mxu0 %v11601_v59  ;;  %7331 = vmatprep.subr.bf16.mxu1 %v11604_v27 }
0x1571   :  { %7291 = vmatpush1.bf16.msra.mxu0 %v11607_v12  ;;  %7332 = vmatpush1.bf16.msra.mxu1 %v11610_v13 }
0x1572   :  { %7292 = vmatprep.subr.bf16.mxu0 %v11613_v10  ;;  %7333 = vmatprep.subr.bf16.mxu1 %v11616_v35 }
0x1575   :  { %7293 = vmatpush1.bf16.msra.mxu0 %v11619_v36  ;;  %7334 = vmatpush1.bf16.msra.mxu1 %v11622_v37 }
0x1576   :  { %7294 = vmatprep.subr.bf16.mxu0 %v11625_v38  ;;  %7335 = vmatprep.subr.bf16.mxu1 %v11628_v39 }
0x1579   :  { %7295 = vmatpush1.bf16.msra.mxu0 %v11631_v40  ;;  %7336 = vmatpush1.bf16.msra.mxu1 %v11634_v41 }
0x157a   :  { %7395 = vmatprep.subr.bf16.mxu0 %v9697_v42  ;;  %7436 = vmatprep.subr.bf16.mxu1 %v9698_v45 }
0x161c   :  { %v7199_v57 = vpop.f32.mrf.mxu0  ;;  %v7240_v61 = vpop.f32.mrf.mxu1 }
0x161d   :  { %v7247_v2 = vadd.f32 %v7199_v57, %v6275_v58  ;;  %v7249_v23 = vadd.f32 %v7240_v61, %v6348_v3  ;;  %v9199_v3 = vld [vmem:[%s11775_s10 + $0x70] ss:$8 sps:$4 sm:$0xff]  }
0x161e   :  { %v7201_v25 = vpop.f32.mrf.mxu0  ;;  %v7242_v43 = vpop.f32.mrf.mxu1 }
0x161f   :  { %v8685_v28 = vmul.f32 -1.442695, %v7247_v2  ;;  %v7248_v22 = vadd.f32 %v7201_v25, %v6277_v34  ;;  %v7250_v21 = vadd.f32 %v7242_v43, %v6350_v0 }
0x1620   :  { %v7203_v46 = vpop.f32.mrf.mxu0  ;;  %v7244_v48 = vpop.f32.mrf.mxu1 }
0x1621   :  { %9583 = vpow2.f32 %v8685_v28  ;;  %v8686_v49 = vmul.f32 -1.442695, %v7248_v22  ;;  %v8687_v7 = vmul.f32 -1.442695, %v7250_v21 }
0x1622   :  { %v7204_v20 = vpop.f32.mrf.mxu0  ;;  %v7245_v50 = vpop.f32.mrf.mxu1 }
0x1623   :  { %9585 = vpow2.f32 %v8686_v49 }
0x1624   :  { %9587 = vtanh.f32 %v7249_v23  ;;  %v9204_v23 = vld [vmem:[%s11775_s10 + $0x64] ss:$8 sps:$4 sm:$0xff]  }
0x1625   :  { %9589 = vpow2.f32 %v8687_v7  ;;  %v9202_v7 = vld [vmem:[%s11775_s10 + $0x60] ss:$8 sps:$4 sm:$0xff]  }
0x162e   :  { %v9584_v30 = vpop.eup %9583 }
0x162f   :  { %v7254_v16 = vadd.f32 1.0, %v9584_v30  ;;  %v9205_v30 = vld [vmem:[%s11775_s10 + $0x50] ss:$8 sps:$4 sm:$0xff]  }
0x1630   :  { %v9586_v56 = vpop.eup %9585 }
0x1631   :  { %9591 = vrcp.f32 %v7254_v16  ;;  %v7260_v42 = vadd.f32 1.0, %v9586_v56  ;;  %v9588_v45 = vpop.eup %9587  ;;  %v9210_v16 = vld [vmem:[%s11775_s10 + $0x44] ss:$8 sps:$4 sm:$0xff]   ;;  %v9208_v56 = vld [vmem:[%s11775_s10 + $0x40] ss:$8 sps:$4 sm:$0xff]  }
0x1632   :  { %v9590_v29 = vpop.eup %9589 }
0x1633   :  { %9593 = vrcp.f32 %v7260_v42  ;;  %v7267_v34 = vadd.f32 1.0, %v9590_v29  ;;  %v9211_v42 = vld [vmem:[%s11775_s10 + $0x30] ss:$8 sps:$4 sm:$0xff]   ;;  %v9216_v29 = vld [vmem:[%s11775_s10 + $0x24] ss:$8 sps:$4 sm:$0xff]  }
0x1635   :  { %9595 = vrcp.f32 %v7267_v34  ;;  %v9222_v34 = vld [vmem:[%s11775_s10 + $0x4] ss:$8 sps:$4 sm:$0xff]  }
0x163e   :  { %v9592_v58 = vpop.eup %9591 }
0x163f   :  { %v7271_v57 = vmul.f32 %v9592_v58, %v9588_v45  ;;  %v9213_v45 = vld [vmem:[%s11775_s10 + $0x34] ss:$8 sps:$4 sm:$0xff]   ;;  %v9214_v58 = vld [vmem:[%s11775_s10 + $0x20] ss:$8 sps:$4 sm:$0xff]  }
0x1640   :  { %v9594_v31 = vpop.eup %9593 }
0x1641   :  { %v7270_v2 = vmul.f32 %v9594_v31, %v11542_v11  ;;  %v11922_v11 = vld [vmem:[#allocation37_spill] sm:$0xff] }
0x1642   :  { %v9596_v61 = vpop.eup %9595  ;;  %v9217_v31 = vld [vmem:[%s11775_s10 + $0x10] ss:$8 sps:$4 sm:$0xff]  }
0x1643   :  { %v11646_v25 = vadd.f32 %v7271_v57, %v7270_v2  ;;  %v9219_v57 = vld [vmem:[%s11775_s10 + $0x14] ss:$8 sps:$4 sm:$0xff]   ;;  %v9220_v2 = vld [vmem:[%s11775_s10] ss:$8 sps:$4 sm:$0xff]  }
0x1645   :  { %9597 = vtanh.f32 %v11646_v25 }
0x1652   :  { %v9598_v43 = vpop.eup %9597 }
0x1653   :  { %v7274_v28 = vmul.f32 %v9598_v43, %v9596_v61  ;;  %v9224_v61 = vld [vmem:[#allocation14 + $0x38] sm:$0xff]   ;;  %v9225_v43 = vld [vmem:[#allocation14 + $0x70] sm:$0xff]  }
0x1655   :  { %v7279_v22 = vpack.c.bf16 %v7274_v28, %v7274_v28  ;;  %v9226_v28 = vld [vmem:[#allocation14 + $0x30] sm:$0xff]  }
0x1657   :  { %7313 = vmatmul.mubr.bf16.vlgmr.msra.gmra.mxu0 %v7279_v22  ;;  %7354 = vmatmul.mubr.bf16.vlgmr.msra.gmra.mxu1 %v7279_v22  ;;  %v9227_v22 = vld [vmem:[#allocation14 + $0x68] sm:$0xff]  }
0x1658   :  { %7396 = vmatpush1.bf16.msra.mxu0 %v11545_v51  ;;  %7437 = vmatpush1.bf16.msra.mxu1 %v11548_v60  ;;  %v6281_v51 = vadd.f32 %v11922_v11, %v11335_v26  ;;  %v9228_v11 = vld [vmem:[#allocation14 + $0x28] sm:$0xff]  }
0x1659   :  { %7397 = vmatprep.subr.bf16.mxu0 %v11551_v6  ;;  %7438 = vmatprep.subr.bf16.mxu1 %v11554_v32  ;;  %v11923_v32 = vld [vmem:[#allocation42_spill] sm:$0xff] }
0x165a   :  { %7427 = vmatprep.mubr.bf16.mxu0 %v11817_v17  ;;  %7468 = vmatprep.mubr.bf16.mxu1 %v11817_v17 }
0x165c   :  { %7398 = vmatpush1.bf16.msra.mxu0 %v11559_v55  ;;  %7439 = vmatpush1.bf16.msra.mxu1 %v11562_v1  ;;  %v6283_v55 = vadd.f32 %v11923_v32, %v11342_v14 }
0x165d   :  { %7399 = vmatprep.subr.bf16.mxu0 %v11565_v53  ;;  %7440 = vmatprep.subr.bf16.mxu1 %v11568_v9 }
0x1660   :  { %7400 = vmatpush1.bf16.msra.mxu0 %v11571_v5  ;;  %7441 = vmatpush1.bf16.msra.mxu1 %v11574_v15 }
0x1661   :  { %7401 = vmatprep.subr.bf16.mxu0 %v11577_v54  ;;  %7442 = vmatprep.subr.bf16.mxu1 %v11580_v33 }
0x1664   :  { %7402 = vmatpush1.bf16.msra.mxu0 %v11583_v24  ;;  %7443 = vmatpush1.bf16.msra.mxu1 %v11586_v63 }
0x1665   :  { %7403 = vmatprep.subr.bf16.mxu0 %v11589_v52  ;;  %7444 = vmatprep.subr.bf16.mxu1 %v11592_v18  ;;  %v11924_v18 = vld [vmem:[#allocation43_spill] sm:$0xff] }
0x1668   :  { %7404 = vmatpush1.bf16.msra.mxu0 %v11595_v19  ;;  %7445 = vmatpush1.bf16.msra.mxu1 %v11598_v62  ;;  %v6356_v19 = vadd.f32 %v11924_v18, %v11351_v44 }
0x1669   :  { %7405 = vmatprep.subr.bf16.mxu0 %v11601_v59  ;;  %7446 = vmatprep.subr.bf16.mxu1 %v11604_v27  ;;  %v11925_v59 = vld [vmem:[#allocation38_spill] sm:$0xff] }
0x166a   :  { %v6354_v27 = vadd.f32 %v11925_v59, %v11355_v8  ;;  %v11929_v59 = vld [vmem:[#allocation40_spill] sm:$0xff] }
0x166c   :  { %7406 = vmatpush1.bf16.msra.mxu0 %v11607_v12  ;;  %7447 = vmatpush1.bf16.msra.mxu1 %v11610_v13 }
0x166d   :  { %7407 = vmatprep.subr.bf16.mxu0 %v11613_v10  ;;  %7448 = vmatprep.subr.bf16.mxu1 %v11616_v35 }
0x1670   :  { %7408 = vmatpush1.bf16.msra.mxu0 %v11619_v36  ;;  %7449 = vmatpush1.bf16.msra.mxu1 %v11622_v37 }
0x1671   :  { %7409 = vmatprep.subr.bf16.mxu0 %v11625_v38  ;;  %7450 = vmatprep.subr.bf16.mxu1 %v11628_v39 }
0x1674   :  { %7410 = vmatpush1.bf16.msra.mxu0 %v11631_v40  ;;  %7451 = vmatpush1.bf16.msra.mxu1 %v11634_v41 }
0x1675   :  { %7614 = vmatprep.subr.bf16.mxu0 %v9201_v47  ;;  %v9231_v47 = vld [vmem:[#allocation14 + $0x58] sm:$0xff]  }
0x1717   :  { %v7314_v60 = vpop.f32.mrf.mxu0  ;;  %v7355_v6 = vpop.f32.mrf.mxu1 }
0x1718   :  { %v7362_v1 = vadd.f32 %v7314_v60, %v6281_v51  ;;  %v7364_v12 = vadd.f32 %v7355_v6, %v6354_v27  ;;  %v11926_v51 = vld [vmem:[#allocation41_spill] sm:$0xff]  ;;  %v6358_v27 = vadd.f32 %v11929_v59, %v11355_v8 }
0x1719   :  { %v7316_v53 = vpop.f32.mrf.mxu0  ;;  %v7357_v9 = vpop.f32.mrf.mxu1  ;;  %v6285_v60 = vadd.f32 %v11926_v51, %v11335_v26 }
0x171a   :  { %v8688_v5 = vmul.f32 -1.442695, %v7362_v1  ;;  %v7363_v15 = vadd.f32 %v7316_v53, %v6283_v55  ;;  %v7365_v62 = vadd.f32 %v7357_v9, %v6356_v19  ;;  %v11927_v55 = vld [vmem:[#allocation44_spill] sm:$0xff]  ;;  %v11928_v19 = vld [vmem:[#allocation46_spill] sm:$0xff] }
0x171b   :  { %v7318_v54 = vpop.f32.mrf.mxu0  ;;  %v7359_v33 = vpop.f32.mrf.mxu1  ;;  %v6287_v1 = vadd.f32 %v11927_v55, %v11342_v14  ;;  %v6360_v26 = vadd.f32 %v11928_v19, %v11351_v44  ;;  %v9242_v55 = vld [vmem:[#allocation15 + $0x20] sm:$0xff]  }
0x171c   :  { %9599 = vpow2.f32 %v8688_v5  ;;  %v8689_v24 = vmul.f32 -1.442695, %v7363_v15  ;;  %v8690_v13 = vmul.f32 -1.442695, %v7365_v62 }
0x171d   :  { %v7319_v63 = vpop.f32.mrf.mxu0  ;;  %v7360_v52 = vpop.f32.mrf.mxu1 }
0x171e   :  { %9601 = vpow2.f32 %v8689_v24 }
0x171f   :  { %9603 = vtanh.f32 %v7364_v12 }
0x1720   :  { %9605 = vpow2.f32 %v8690_v13 }
0x1729   :  { %v9600_v10 = vpop.eup %9599 }
0x172a   :  { %v7369_v35 = vadd.f32 1.0, %v9600_v10 }
0x172b   :  { %v9602_v36 = vpop.eup %9601 }
0x172c   :  { %9607 = vrcp.f32 %v7369_v35  ;;  %v7375_v37 = vadd.f32 1.0, %v9602_v36  ;;  %v9604_v38 = vpop.eup %9603 }
0x172d   :  { %v9606_v39 = vpop.eup %9605 }
0x172e   :  { %9609 = vrcp.f32 %v7375_v37  ;;  %v7382_v48 = vadd.f32 1.0, %v9606_v39 }
0x1730   :  { %9611 = vrcp.f32 %v7382_v48 }
0x1739   :  { %v9608_v40 = vpop.eup %9607 }
0x173a   :  { %v7386_v41 = vmul.f32 %v9608_v40, %v9604_v38 }
0x173b   :  { %v9610_v46 = vpop.eup %9609 }
0x173c   :  { %v7385_v49 = vmul.f32 %v9610_v46, %v11646_v25  ;;  %v9223_v25 = vld [vmem:[#allocation14 + $0x78] sm:$0xff]  }
0x173d   :  { %v9612_v50 = vpop.eup %9611  ;;  %8737 = vmatprep.subr.bf16.mxu1 %v9223_v25 }
0x173e   :  { %v11690_v20 = vadd.f32 %v7386_v41, %v7385_v49 }
0x1740   :  { %9613 = vtanh.f32 %v11690_v20 }
0x174d   :  { %v9614_v4 = vpop.eup %9613 }
0x174e   :  { %v7389_v0 = vmul.f32 %v9614_v4, %v9612_v50 }
0x1750   :  { %v7394_v21 = vpack.c.bf16 %v7389_v0, %v7389_v0  ;;  %v9229_v0 = vld [vmem:[#allocation14 + $0x60] sm:$0xff]  }
0x1752   :  { %7428 = vmatmul.mubr.bf16.vlgmr.msra.gmra.mxu0 %v7394_v21  ;;  %7469 = vmatmul.mubr.bf16.vlgmr.msra.gmra.mxu1 %v7394_v21  ;;  %v9230_v21 = vld [vmem:[#allocation14 + $0x20] sm:$0xff]  }
0x1753   :  { %7646 = vmatprep.mubr.bf16.mxu0 %v11817_v17  ;;  %7615 = vmatpush1.bf16.msra.mxu0 %v9199_v3  ;;  %v9207_v17 = vld [vmem:[%s11775_s10 + $0x54] ss:$8 sps:$4 sm:$0xff]  }
0x1754   :  { %7616 = vmatprep.subr.bf16.mxu0 %v9204_v23  ;;  %8738 = vmatpush3.bf16.msra.mxu1 %v9224_v61  ;;  %v9232_v3 = vld [vmem:[#allocation14 + $0x18] sm:$0xff]   ;;  %v9233_v23 = vld [vmem:[#allocation14 + $0x50] sm:$0xff]  }
0x1755   :  { %8739 = vmatprep.subr.bf16.mxu1 %v9225_v43 }
0x1757   :  { %7617 = vmatpush1.bf16.msra.mxu0 %v9202_v7  ;;  %v9234_v7 = vld [vmem:[#allocation14 + $0x10] sm:$0xff]  }
0x1758   :  { %7618 = vmatprep.subr.bf16.mxu0 %v9207_v17  ;;  %8740 = vmatpush3.bf16.msra.mxu1 %v9226_v28  ;;  %v9236_v17 = vld [vmem:[#allocation14 + $0x8] sm:$0xff]  }
0x1759   :  { %8741 = vmatprep.subr.bf16.mxu1 %v9227_v22 }
0x175b   :  { %7619 = vmatpush1.bf16.msra.mxu0 %v9205_v30  ;;  %v9237_v30 = vld [vmem:[#allocation14 + $0x40] sm:$0xff]  }
0x175c   :  { %7620 = vmatprep.subr.bf16.mxu0 %v9210_v16  ;;  %8742 = vmatpush3.bf16.msra.mxu1 %v9228_v11  ;;  %v9238_v16 = vld [vmem:[#allocation14] sm:$0xff]  }
0x175d   :  { %8743 = vmatprep.subr.bf16.mxu1 %v9229_v0 }
0x175f   :  { %7621 = vmatpush1.bf16.msra.mxu0 %v9208_v56  ;;  %v9239_v56 = vld [vmem:[#allocation15 + $0x38] sm:$0xff]  }
0x1760   :  { %7622 = vmatprep.subr.bf16.mxu0 %v9213_v45  ;;  %8744 = vmatpush3.bf16.msra.mxu1 %v9230_v21  ;;  %v9240_v45 = vld [vmem:[#allocation15 + $0x30] sm:$0xff]  }
0x1761   :  { %8745 = vmatprep.subr.bf16.mxu1 %v9231_v47 }
0x1763   :  { %7623 = vmatpush1.bf16.msra.mxu0 %v9211_v42  ;;  %v9882_v42 = vmov 0.0  }
0x1764   :  { %7624 = vmatprep.subr.bf16.mxu0 %v9216_v29  ;;  %8746 = vmatpush3.bf16.msra.mxu1 %v9232_v3  ;;  %v7522_v29 = vld [vmem:[%s11776_s11] sm:$0x3] }
0x1765   :  { %8747 = vmatprep.subr.bf16.mxu1 %v9233_v23 }
0x1767   :  { %7625 = vmatpush1.bf16.msra.mxu0 %v9214_v58  ;;  %v11930_v58 = vld [vmem:[#allocation23_spill] sm:$0xff] }
0x1768   :  { %7626 = vmatprep.subr.bf16.mxu0 %v9219_v57  ;;  %8748 = vmatpush3.bf16.msra.mxu1 %v9234_v7  ;;  %v7527_v57 = vrot.slane %v7522_v29, %v11930_v58 }
0x176b   :  { %7627 = vmatpush1.bf16.msra.mxu0 %v9217_v31  ;;  %v11931_v31 = vld [vmem:[#allocation24_spill] sm:$0xff] }
0x176c   :  { %7628 = vmatprep.subr.bf16.mxu0 %v9222_v34  ;;  %v7531_v34 = vrot.slane %v7522_v29, %v11931_v31 }
0x176f   :  { %7629 = vmatpush1.bf16.msra.mxu0 %v9220_v2 }
0x1770   :  { %8768 = vmatprep.subr.bf16.mxu0 %v9882_v42 }
0x1812   :  { %v7429_v6 = vpop.f32.mrf.mxu0  ;;  %v7470_v32 = vpop.f32.mrf.mxu1 }
0x1813   :  { %v7477_v53 = vadd.f32 %v7429_v6, %v6285_v60  ;;  %v7479_v14 = vadd.f32 %v7470_v32, %v6358_v27  ;;  %v9241_v32 = vld [vmem:[#allocation15 + $0x28] sm:$0xff]  }
0x1814   :  { %v7431_v9 = vpop.f32.mrf.mxu0  ;;  %v7472_v5 = vpop.f32.mrf.mxu1 }
0x1815   :  { %v8691_v15 = vmul.f32 -1.442695, %v7477_v53  ;;  %v7478_v54 = vadd.f32 %v7431_v9, %v6287_v1  ;;  %v7480_v62 = vadd.f32 %v7472_v5, %v6360_v26  ;;  %v9243_v1 = vld [vmem:[#allocation15 + $0x18] sm:$0xff]   ;;  %v9244_v53 = vld [vmem:[#allocation15 + $0x10] sm:$0xff]   ;;  %v9245_v9 = vld [vmem:[#allocation15 + $0x8] sm:$0xff]  }
0x1816   :  { %v7433_v33 = vpop.f32.mrf.mxu0  ;;  %v7474_v24 = vpop.f32.mrf.mxu1  ;;  %v9246_v5 = vld [vmem:[#allocation15] sm:$0xff]  }
0x1817   :  { %9615 = vpow2.f32 %v8691_v15  ;;  %v8692_v63 = vmul.f32 -1.442695, %v7478_v54  ;;  %v8693_v12 = vmul.f32 -1.442695, %v7480_v62  ;;  %v8710_v54 = vld [vmem:[%s11778_s13] ss:$0 sm:$0xff] }
0x1818   :  { %v7434_v52 = vpop.f32.mrf.mxu0  ;;  %v7475_v18 = vpop.f32.mrf.mxu1  ;;  %v8727_v62 = vld [vmem:[%s11780_s15] ss:$0 sm:$0xff] }
0x1819   :  { %9617 = vpow2.f32 %v8692_v63 }
0x181a   :  { %9619 = vtanh.f32 %v7479_v14 }
0x181b   :  { %9621 = vpow2.f32 %v8693_v12 }
0x1824   :  { %v9616_v13 = vpop.eup %9615 }
0x1825   :  { %v7484_v10 = vadd.f32 1.0, %v9616_v13 }
0x1826   :  { %v9618_v35 = vpop.eup %9617 }
0x1827   :  { %9623 = vrcp.f32 %v7484_v10  ;;  %v7490_v36 = vadd.f32 1.0, %v9618_v35  ;;  %v9620_v37 = vpop.eup %9619 }
0x1828   :  { %v9622_v38 = vpop.eup %9621 }
0x1829   :  { %9625 = vrcp.f32 %v7490_v36  ;;  %v7497_v44 = vadd.f32 1.0, %v9622_v38 }
0x182b   :  { %9627 = vrcp.f32 %v7497_v44 }
0x1834   :  { %v9624_v39 = vpop.eup %9623 }
0x1835   :  { %v7501_v40 = vmul.f32 %v9624_v39, %v9620_v37 }
0x1836   :  { %v9626_v41 = vpop.eup %9625 }
0x1837   :  { %v7500_v46 = vmul.f32 %v9626_v41, %v11690_v20  ;;  %v9235_v20 = vld [vmem:[#allocation14 + $0x48] sm:$0xff]  }
0x1838   :  { %v9628_v8 = vpop.eup %9627  ;;  %8749 = vmatprep.subr.bf16.mxu1 %v9235_v20 }
0x1839   :  { %v7502_v48 = vadd.f32 %v7501_v40, %v7500_v46  ;;  %8750 = vmatpush3.bf16.msra.mxu1 %v9236_v17 }
0x183a   :  { %8751 = vmatprep.subr.bf16.mxu1 %v9237_v30 }
0x183b   :  { %9629 = vtanh.f32 %v7502_v48 }
0x183d   :  { %8752 = vmatpush3.bf16.msra.mxu1 %v9238_v16 }
0x1848   :  { %v9630_v49 = vpop.eup %9629 }
0x1849   :  { %v7504_v50 = vmul.f32 %v9630_v49, %v9628_v8 }
0x184b   :  { %v7505_v4 = vpack.c.bf16 %v7504_v50, %v7504_v50 }
0x184d   :  { %7647 = vmatmul.mubr.bf16.vlgmr.msra.gmra.mxu0 %v7505_v4 }
0x184e   :  { %8769 = vmatpush3.bf16.msra.mxu0 %v9239_v56  ;;  %8784 = vmatprep.mubr.msk.bf16.mxu0 %vm9883_vm0, %v9882_v42 }
0x184f   :  { %8770 = vmatprep.subr.bf16.mxu0 %v9882_v42 }
0x1852   :  { %8771 = vmatpush3.bf16.msra.mxu0 %v9240_v45 }
0x1853   :  { %8772 = vmatprep.subr.bf16.mxu0 %v9882_v42 }
0x1856   :  { %8773 = vmatpush3.bf16.msra.mxu0 %v9241_v32 }
0x1857   :  { %8774 = vmatprep.subr.bf16.mxu0 %v9882_v42 }
0x185a   :  { %8775 = vmatpush3.bf16.msra.mxu0 %v9242_v55 }
0x185b   :  { %8776 = vmatprep.subr.bf16.mxu0 %v9882_v42 }
0x185e   :  { %8777 = vmatpush3.bf16.msra.mxu0 %v9243_v1 }
0x185f   :  { %8778 = vmatprep.subr.bf16.mxu0 %v9882_v42 }
0x1862   :  { %8779 = vmatpush3.bf16.msra.mxu0 %v9244_v53 }
0x1863   :  { %8780 = vmatprep.subr.bf16.mxu0 %v9882_v42 }
0x1866   :  { %8781 = vmatpush3.bf16.msra.mxu0 %v9245_v9 }
0x1867   :  { %8782 = vmatprep.subr.bf16.mxu0 %v9882_v42 }
0x186a   :  { %8783 = vmatpush3.bf16.msra.mxu0 %v9246_v5 }
0x190d   :  { %v7648_v2 = vpop.f32.mrf.mxu0 }
0x190e   :  { %v7649_v25 = vadd.f32 %v7648_v2, %v7527_v57 }
0x190f   :  { %v7650_v61 = vpop.f32.mrf.mxu0 }
0x1910   :  { %v7651_v43 = vadd.f32 %v7650_v61, %v7531_v34  ;;  %9631 = vtanh.f32 %v7649_v25 }
0x1911   :  { %v7652_v28 = vpop.f32.mrf.mxu0 }
0x1912   :  { %9633 = vtanh.f32 %v7651_v43 }
0x1913   :  { %v7653_v22 = vpop.f32.mrf.mxu0 }
0x191d   :  { %v9632_v11 = vpop.eup %9631 }
0x191e   :  { %v7657_v6 = vpack.c.bf16 %v9632_v11, %v9632_v11 }
0x191f   :  { %v9634_v51 = vpop.eup %9633 }
0x1920   :  { %v7658_v60 = vpack.c.bf16 %v9634_v51, %v9634_v51 }
0x1922   :  { %7826 = vmatprep.mubr.bf16.mxu1 %v7658_v60 }
0x1923   :  { %7827 = vmatmul.mubr.bf16.vlgmr.msra.gmra.mxu1 %v7657_v6 }
0x19e3   :  { %v8753_v15 = vpop.f32.mrf.mxu1 }
0x19e5   :  { %v8754_v33 = vpop.f32.mrf.mxu1 }
0x19e6   :  { %v8755_v24 = vadd.f32 %v8754_v33, %v8753_v15 }
0x19e7   :  { %v8756_v63 = vpop.f32.mrf.mxu1 }
0x19e8   :  { %v7829_v52 = vadd.f32 %v8755_v24, %v8710_v54 }
0x19e9   :  { %v8757_v18 = vpop.f32.mrf.mxu1 }
0x19ea   :  { %9635 = vtanh.f32 %v7829_v52 }
0x19f7   :  { %v9636_v19 = vpop.eup %9635 }
0x19f8   :  { %v7835_v26 = vpack.c.bf16 %v9636_v19, %v9636_v19 }
0x19fa   :  { %8785 = vmatmul.mubr.bf16.vlgmr.msra.gmra.mxu0 %v7835_v26 }
0x1aba   :  { %v7941_v59 = vpop.f32.mrf.mxu0 }
0x1abb   :  { %v7942_v27 = vadd.f32 %v8727_v62, %v7941_v59 }
0x1abc   :  { %v8786_v14 = vpop.f32.mrf.mxu0 }
0x1abd   :  { %v8736_v12 = vmul.f32 -1.442695, %v7942_v27 }
0x1abe   :  { %v7944_v13 = vpop.f32.mrf.mxu0 }
0x1abf   :  { %9637 = vpow2.f32 %v8736_v12 }
0x1ac0   :  { %v8787_v10 = vpop.f32.mrf.mxu0 }
0x1acc   :  { %v9638_v35 = vpop.eup %9637 }
0x1acd   :  { %v7950_v36 = vadd.f32 1.0, %v9638_v35 }
0x1acf   :  { %9639 = vrcp.f32 %v7950_v36 }
0x1adc   :  { %v9640_v37 = vpop.eup %9639 }
0x1add   :  { %7953 = vst [vmem:[%s11781_s16] sm:$0xff] %v9640_v37 }
0x1ade   :  { %7958 = vsyncpa [#allocation5], 1 }
0x1adf   :  { %7959 = vsyncpa [#allocation7], 1 }
0x1ae0   :  { %7960 = vsyncpa [#allocation10], 1 }
0x1ae1   :  { %7961 = vsyncpa [#allocation13], 1 }
0x1ae2   :  { %7962 = vsyncpa [#allocation16], 1 }

</bundles_post_ra>
